<compile_context>
chip_gen: v5e
topology: v5e:2x2
jax: 0.10.0
libtpu: 0.0.40
codegen_flags: <defaults>
</compile_context>

<pallas_src>
import functools

import jax
import jax.numpy as jnp
from jax.experimental import pallas as pl
from jax.experimental.pallas import tpu as pltpu

HIDDEN = 64
NUM_RNN_LAYERS = 2
GRID_NUM = 5          # KANLayer default: number of grid intervals
SPLINE_K = 3          # KANLayer default: spline order
LAYER_NUMS = (HIDDEN, 32, 1)
# TODO(synk): `layer_nums_small_nobi` comes from KAN.train_kan (not available); assumed
#             [64, 32, 1] (input = hidden 64, scalar head so the final .squeeze(1) works).
KAN_OUT_PAD = 128     # every KAN weight padded to a full lane tile -> lane-dense matmuls/store


def _round_up(v, m):
    return ((v + m - 1) // m) * m


def _grid_knots(num=GRID_NUM, k=SPLINE_K, grid_range=(-1.0, 1.0)):
    """Extended uniform B-spline knot vector (Python floats, baked into the kernel)."""
    h = (grid_range[1] - grid_range[0]) / num
    return tuple(grid_range[0] + i * h for i in range(-k, num + k + 1))


# ---------------------------------------------------------------------------
# Cox-de Boor bases as a list of 2-D lane-dense (B, in) slabs.
# Pure jnp -> usable both inside the Pallas kernel and in the pure-JAX reference.
# Knot values and reciprocal denominators are compile-time Python constants.
# ---------------------------------------------------------------------------
def _spline_bases(x, knots, k):
    P = len(knots)
    bases = [jnp.logical_and(x >= knots[j], x < knots[j + 1]).astype(jnp.float32)
             for j in range(P - 1)]
    for p in range(1, k + 1):
        nxt = []
        for j in range(P - 1 - p):
            left = (x - knots[j]) * (1.0 / (knots[j + p] - knots[j]))
            right = (knots[j + p + 1] - x) * (1.0 / (knots[j + p + 1] - knots[j + 1]))
            nxt.append(left * bases[j] + right * bases[j + 1])
        bases = nxt
    return bases                                  # len = num + k, each (B, in) f32


# ---------------------------------------------------------------------------
# Fused forward kernel: 2-layer tanh RNN (fused 128-lane recurrence) + KAN head + sigmoid
# ---------------------------------------------------------------------------
def _fused_forward_kernel(x_ref, w_ref, bias_ref, out_ref, *,
                          T, B, F_pad, k, knots, kan_dims):
    # x_ref:    ((T+1)*B, F_pad) bf16   time-major, last time block is zeros
    # w_ref:    (F_pad + 128 + sum_K, 128) bf16  packed [W_in ; W_rec ; W_kan1 ; W_kan2]
    # bias_ref: (1, 128) f32             [b1 | b2]
    # out_ref:  (B, 128) f32
    H = HIDDEN
    H2 = 2 * H
    ncoef = len(knots) - 1 - k

    # --- per-step additive slab [gx1_t | b2], one hoisted matmul + one f32 bias add.
    # W_in = [Wih1^T | 0]  -> right half of the dot is exactly zero, bias fills in b2.
    w_in = w_ref[0:F_pad, :]                                           # (F_pad, 128)
    slab = jnp.dot(x_ref[...], w_in,
                   preferred_element_type=jnp.float32) + bias_ref[...]  # ((T+1)*B, 128) f32

    # --- fused, time-skewed recurrence.  State s = [h1_t | h2_{t-1}].
    w_rec = w_ref[F_pad:F_pad + H2, :]                                 # (128, 128) bf16
    # step 0 (h1_{-1} = h2_{-1} = 0):  h1_0 = tanh(gx1_0), h2 lanes stay 0.
    s = jnp.concatenate([jnp.tanh(slab[0:B, :H]),
                         jnp.zeros((B, H), jnp.float32)], axis=1)      # (B, 128)
    for t in range(T):                       # fully unrolled; T dependent matmuls total
        s = jnp.tanh(slab[(t + 1) * B:(t + 2) * B, :]
                     + jnp.dot(s.astype(jnp.bfloat16), w_rec,
                               preferred_element_type=jnp.float32))
        # after iter t: s = [h1_{t+1} | h2_t]  (last iter's h1 half is discarded)
    act = s[:, H:]                                                     # h2_{T-1}  (B, H)

    # --- KAN head: each layer = one lane-concat of basis slabs + ONE MXU matmul.
    woff = F_pad + H2
    for (in_dim, _out_dim) in kan_dims:
        xin = act[:, :in_dim]
        feats = _spline_bases(xin, knots, k) + [jax.nn.silu(xin)]
        xfeat = jnp.concatenate(feats, axis=1)                         # (B, (ncoef+1)*in)
        kdim = (ncoef + 1) * in_dim
        act = jnp.dot(xfeat.astype(jnp.bfloat16), w_ref[woff:woff + kdim, :],
                      preferred_element_type=jnp.float32)              # (B, 128)
        woff += kdim

    out_ref[...] = jax.nn.sigmoid(act)        # lane-dense (B, 128) store; lane 0 is real


# ---------------------------------------------------------------------------
# Parameter construction (synthetic, matches module parameter shapes)
# ---------------------------------------------------------------------------
def init_params(key, feature_number):
    H = HIDDEN
    params = {"rnn": [], "kan": []}
    k_iter = key

    for layer in range(NUM_RNN_LAYERS):
        din = feature_number if layer == 0 else H
        k_iter, k1, k2, k3, k4 = jax.random.split(k_iter, 5)
        bound = 1.0 / float(H) ** 0.5
        params["rnn"].append(dict(
            wih=jax.random.uniform(k1, (H, din), jnp.float32, -bound, bound),
            whh=jax.random.uniform(k2, (H, H), jnp.float32, -bound, bound),
            bih=jax.random.uniform(k3, (H,), jnp.float32, -bound, bound),
            bhh=jax.random.uniform(k4, (H,), jnp.float32, -bound, bound)))

    ncoef = GRID_NUM + SPLINE_K
    for li in range(len(LAYER_NUMS) - 1):
        in_dim, out_dim = LAYER_NUMS[li], LAYER_NUMS[li + 1]
        k_iter, kc, kb = jax.random.split(k_iter, 3)
        params["kan"].append(dict(
            coef=0.1 * jax.random.normal(kc, (ncoef, in_dim, out_dim), jnp.float32),
            scale_sp=jnp.ones((in_dim, out_dim), jnp.float32),
            mask=jnp.ones((in_dim, out_dim), jnp.float32),
            scale_base=0.1 * jax.random.normal(kb, (in_dim, out_dim), jnp.float32)))
    return params


def pack_params(params, feature_number):
    """Pack all weights into one bf16 slab + one f32 bias row (3 input DMAs total)."""
    H, H2 = HIDDEN, 2 * HIDDEN
    F = feature_number
    F_pad = _round_up(max(F, 1), 16)
    lp1, lp2 = params["rnn"]

    # input projection [Wih1^T | 0], rows padded to a bf16 sublane multiple
    w_in = jnp.zeros((F_pad, H2), jnp.float32).at[:F, :H].set(lp1["wih"].T)
    # packed recurrence weight [[Whh1^T, Wih2^T],[0, Whh2^T]]
    top = jnp.concatenate([lp1["whh"].T, lp2["wih"].T], axis=1)
    bot = jnp.concatenate([jnp.zeros((H, H), jnp.float32), lp2["whh"].T], axis=1)
    w_rec = jnp.concatenate([top, bot], axis=0)
    bias = jnp.concatenate([lp1["bih"] + lp1["bhh"],
                            lp2["bih"] + lp2["bhh"]]).reshape(1, H2).astype(jnp.float32)

    pieces = [w_in, w_rec]
    kan_dims = []
    for kp in params["kan"]:
        coef = kp["coef"]
        ncoef, in_dim, out_dim = coef.shape
        wsp = coef * (kp["scale_sp"] * kp["mask"])[None]           # (ncoef, in, out)
        wb = kp["scale_base"] * kp["mask"]                         # (in, out)
        wkan = jnp.concatenate([wsp.reshape(ncoef * in_dim, out_dim), wb], axis=0)
        wkan = jnp.pad(wkan, ((0, 0), (0, KAN_OUT_PAD - out_dim)))  # lane-pad to 128
        pieces.append(wkan)
        kan_dims.append((in_dim, out_dim))

    w_slab = jnp.concatenate(pieces, axis=0).astype(jnp.bfloat16)
    return dict(w_slab=w_slab, bias=bias, F=F, F_pad=F_pad, kan_dims=tuple(kan_dims))


# ---------------------------------------------------------------------------
# Wrapper (mirrors RNN_small_kan.forward)
# ---------------------------------------------------------------------------
def rnn_small_kan_forward(packed, x):
    """x: (B, T, F) batch-first, like the PyTorch module.  Returns (B,)."""
    Bsz, T, F = x.shape
    assert F == packed["F"]
    Bp = _round_up(max(Bsz, 1), 16)            # bf16 sublane tile
    F_pad = packed["F_pad"]

    xt = jnp.transpose(x, (1, 0, 2)).astype(jnp.float32)            # (T, B, F) time-major
    # pad: one extra (zero) time block for the final skewed step, batch->Bp, feat->F_pad
    xt = jnp.pad(xt, ((0, 1), (0, Bp - Bsz), (0, F_pad - F)))
    x2 = xt.reshape((T + 1) * Bp, F_pad).astype(jnp.bfloat16)

    kernel = functools.partial(_fused_forward_kernel, T=T, B=Bp, F_pad=F_pad,
                               k=SPLINE_K, knots=_grid_knots(),
                               kan_dims=packed["kan_dims"])
    out = pl.pallas_call(
        kernel,
        out_shape=jax.ShapeDtypeStruct((Bp, KAN_OUT_PAD), jnp.float32),
        in_specs=[pl.BlockSpec(memory_space=pltpu.MemorySpace.VMEM)] * 3,
        out_specs=pl.BlockSpec(memory_space=pltpu.MemorySpace.VMEM),
    )(x2, packed["w_slab"], packed["bias"])
    # sigmoid already applied in-kernel; take real batch rows + scalar head lane
    return out[:Bsz, 0]


# ---------------------------------------------------------------------------
# Pure-JAX reference (standard 2-layer stacked RNN; mirrors the kernel's bf16
# matmul-operand casts, validates the fused/skewed recurrence + single-dot KAN)
# ---------------------------------------------------------------------------
def _c32(a):
    return a.astype(jnp.bfloat16).astype(jnp.float32)


def _ref_forward(params, x):
    Bsz, T, _ = x.shape
    knots = _grid_knots()
    seq = x.astype(jnp.float32)
    for lp in params["rnn"]:
        wih_t = lp["wih"].T
        whh_t = lp["whh"].T
        b = (lp["bih"] + lp["bhh"]).reshape(1, HIDDEN)
        h = jnp.zeros((Bsz, HIDDEN), jnp.float32)
        outs = []
        for t in range(T):
            h = jnp.tanh(_c32(seq[:, t, :]) @ _c32(wih_t) + _c32(h) @ _c32(whh_t) + b)
            outs.append(h)
        seq = jnp.stack(outs, axis=1)
    act = seq[:, -1, :]                                # output[:, -1, :]
    for kp in params["kan"]:
        wsp = kp["coef"] * (kp["scale_sp"] * kp["mask"])[None]
        wb = kp["scale_base"] * kp["mask"]
        bases = _spline_bases(act, knots, SPLINE_K)
        acc = _c32(jax.nn.silu(act)) @ _c32(wb)
        for c, bc in enumerate(bases):
            acc = acc + _c32(bc) @ _c32(wsp[c])
        act = acc
    return jax.nn.sigmoid(act)[:, 0]


if __name__ == "__main__":
    B, T, F = 2, 8, 16                                 # batch, seq, Feature_number
    key = jax.random.PRNGKey(0)
    kx, kp = jax.random.split(key)
    x = jax.random.normal(kx, (B, T, F), jnp.float32)
    params = init_params(kp, F)
    packed = pack_params(params, F)

    fwd = jax.jit(functools.partial(rnn_small_kan_forward, packed))
    out = fwd(x)
    jax.block_until_ready(out)

    assert out.shape == (B,), out.shape
    assert bool(jnp.all(jnp.isfinite(out)))
    ref = _ref_forward(params, x)
    assert bool(jnp.allclose(out, ref, atol=1e-2, rtol=1e-2)), (out, ref)
    print("KERNEL_OK")
</pallas_src>

<mosaic_0001>
module attributes {stable_mosaic.version = 11 : i64} {
  func.func @_fused_forward_kernel(%arg0: memref<144x16xbf16, #tpu.memory_space<vmem>>, %arg1: memref<1008x128xbf16, #tpu.memory_space<vmem>>, %arg2: memref<1x128xf32, #tpu.memory_space<vmem>>, %arg3: memref<16x128xf32, #tpu.memory_space<vmem>>) attributes {dimension_semantics = [], scalar_prefetch = 0 : i64, scratch_operands = 0 : i64, tpu.core_type = #tpu.core_type<tc>} {
    %c0 = arith.constant 0 : index
    %c0_0 = arith.constant 0 : index
    %0 = vector.load %arg1[%c0, %c0_0] : memref<1008x128xbf16, #tpu.memory_space<vmem>>, vector<16x128xbf16>
    %c0_1 = arith.constant 0 : index
    %c0_2 = arith.constant 0 : index
    %1 = vector.load %arg0[%c0_1, %c0_2] : memref<144x16xbf16, #tpu.memory_space<vmem>>, vector<144x16xbf16>
    %cst = arith.constant dense<0.000000e+00> : vector<144x128xf32>
    %2 = tpu.matmul %1, %0, %cst {dimension_numbers = #tpu.dot_dimension_numbers<[1], [0], [0], [1], [0, 0, 1, 1], [], []>} : vector<144x16xbf16>, vector<16x128xbf16>, vector<144x128xf32> -> vector<144x128xf32>
    %c0_3 = arith.constant 0 : index
    %c0_4 = arith.constant 0 : index
    %3 = vector.load %arg2[%c0_3, %c0_4] : memref<1x128xf32, #tpu.memory_space<vmem>>, vector<1x128xf32>
    %4 = vector.broadcast %3 : vector<1x128xf32> to vector<144x128xf32>
    %5 = arith.addf %2, %4 : vector<144x128xf32>
    %c16 = arith.constant 16 : index
    %c0_5 = arith.constant 0 : index
    %6 = vector.load %arg1[%c16, %c0_5] : memref<1008x128xbf16, #tpu.memory_space<vmem>>, vector<128x128xbf16>
    %7 = vector.extract_strided_slice %5 {offsets = [0, 0], sizes = [16, 64], strides = [1, 1]} : vector<144x128xf32> to vector<16x64xf32>
    %8 = math.tanh %7 : vector<16x64xf32>
    %cst_6 = arith.constant 0.000000e+00 : f32
    %9 = vector.broadcast %cst_6 : f32 to vector<16x64xf32>
    %10 = tpu.concatenate %8, %9 in 1 : vector<16x64xf32>, vector<16x64xf32> -> vector<16x128xf32>
    %11 = vector.extract_strided_slice %5 {offsets = [16, 0], sizes = [16, 128], strides = [1, 1]} : vector<144x128xf32> to vector<16x128xf32>
    %12 = arith.truncf %10 : vector<16x128xf32> to vector<16x128xbf16>
    %cst_7 = arith.constant dense<0.000000e+00> : vector<16x128xf32>
    %13 = tpu.matmul %12, %6, %cst_7 {dimension_numbers = #tpu.dot_dimension_numbers<[1], [0], [0], [1], [0, 0, 1, 1], [], []>} : vector<16x128xbf16>, vector<128x128xbf16>, vector<16x128xf32> -> vector<16x128xf32>
    %14 = arith.addf %11, %13 : vector<16x128xf32>
    %15 = math.tanh %14 : vector<16x128xf32>
    %16 = vector.extract_strided_slice %5 {offsets = [32, 0], sizes = [16, 128], strides = [1, 1]} : vector<144x128xf32> to vector<16x128xf32>
    %17 = arith.truncf %15 : vector<16x128xf32> to vector<16x128xbf16>
    %cst_8 = arith.constant dense<0.000000e+00> : vector<16x128xf32>
    %18 = tpu.matmul %17, %6, %cst_8 {dimension_numbers = #tpu.dot_dimension_numbers<[1], [0], [0], [1], [0, 0, 1, 1], [], []>} : vector<16x128xbf16>, vector<128x128xbf16>, vector<16x128xf32> -> vector<16x128xf32>
    %19 = arith.addf %16, %18 : vector<16x128xf32>
    %20 = math.tanh %19 : vector<16x128xf32>
    %21 = vector.extract_strided_slice %5 {offsets = [48, 0], sizes = [16, 128], strides = [1, 1]} : vector<144x128xf32> to vector<16x128xf32>
    %22 = arith.truncf %20 : vector<16x128xf32> to vector<16x128xbf16>
    %cst_9 = arith.constant dense<0.000000e+00> : vector<16x128xf32>
    %23 = tpu.matmul %22, %6, %cst_9 {dimension_numbers = #tpu.dot_dimension_numbers<[1], [0], [0], [1], [0, 0, 1, 1], [], []>} : vector<16x128xbf16>, vector<128x128xbf16>, vector<16x128xf32> -> vector<16x128xf32>
    %24 = arith.addf %21, %23 : vector<16x128xf32>
    %25 = math.tanh %24 : vector<16x128xf32>
    %26 = vector.extract_strided_slice %5 {offsets = [64, 0], sizes = [16, 128], strides = [1, 1]} : vector<144x128xf32> to vector<16x128xf32>
    %27 = arith.truncf %25 : vector<16x128xf32> to vector<16x128xbf16>
    %cst_10 = arith.constant dense<0.000000e+00> : vector<16x128xf32>
    %28 = tpu.matmul %27, %6, %cst_10 {dimension_numbers = #tpu.dot_dimension_numbers<[1], [0], [0], [1], [0, 0, 1, 1], [], []>} : vector<16x128xbf16>, vector<128x128xbf16>, vector<16x128xf32> -> vector<16x128xf32>
    %29 = arith.addf %26, %28 : vector<16x128xf32>
    %30 = math.tanh %29 : vector<16x128xf32>
    %31 = vector.extract_strided_slice %5 {offsets = [80, 0], sizes = [16, 128], strides = [1, 1]} : vector<144x128xf32> to vector<16x128xf32>
    %32 = arith.truncf %30 : vector<16x128xf32> to vector<16x128xbf16>
    %cst_11 = arith.constant dense<0.000000e+00> : vector<16x128xf32>
    %33 = tpu.matmul %32, %6, %cst_11 {dimension_numbers = #tpu.dot_dimension_numbers<[1], [0], [0], [1], [0, 0, 1, 1], [], []>} : vector<16x128xbf16>, vector<128x128xbf16>, vector<16x128xf32> -> vector<16x128xf32>
    %34 = arith.addf %31, %33 : vector<16x128xf32>
    %35 = math.tanh %34 : vector<16x128xf32>
    %36 = vector.extract_strided_slice %5 {offsets = [96, 0], sizes = [16, 128], strides = [1, 1]} : vector<144x128xf32> to vector<16x128xf32>
    %37 = arith.truncf %35 : vector<16x128xf32> to vector<16x128xbf16>
    %cst_12 = arith.constant dense<0.000000e+00> : vector<16x128xf32>
    %38 = tpu.matmul %37, %6, %cst_12 {dimension_numbers = #tpu.dot_dimension_numbers<[1], [0], [0], [1], [0, 0, 1, 1], [], []>} : vector<16x128xbf16>, vector<128x128xbf16>, vector<16x128xf32> -> vector<16x128xf32>
    %39 = arith.addf %36, %38 : vector<16x128xf32>
    %40 = math.tanh %39 : vector<16x128xf32>
    %41 = vector.extract_strided_slice %5 {offsets = [112, 0], sizes = [16, 128], strides = [1, 1]} : vector<144x128xf32> to vector<16x128xf32>
    %42 = arith.truncf %40 : vector<16x128xf32> to vector<16x128xbf16>
    %cst_13 = arith.constant dense<0.000000e+00> : vector<16x128xf32>
    %43 = tpu.matmul %42, %6, %cst_13 {dimension_numbers = #tpu.dot_dimension_numbers<[1], [0], [0], [1], [0, 0, 1, 1], [], []>} : vector<16x128xbf16>, vector<128x128xbf16>, vector<16x128xf32> -> vector<16x128xf32>
    %44 = arith.addf %41, %43 : vector<16x128xf32>
    %45 = math.tanh %44 : vector<16x128xf32>
    %46 = vector.extract_strided_slice %5 {offsets = [128, 0], sizes = [16, 128], strides = [1, 1]} : vector<144x128xf32> to vector<16x128xf32>
    %47 = arith.truncf %45 : vector<16x128xf32> to vector<16x128xbf16>
    %cst_14 = arith.constant dense<0.000000e+00> : vector<16x128xf32>
    %48 = tpu.matmul %47, %6, %cst_14 {dimension_numbers = #tpu.dot_dimension_numbers<[1], [0], [0], [1], [0, 0, 1, 1], [], []>} : vector<16x128xbf16>, vector<128x128xbf16>, vector<16x128xf32> -> vector<16x128xf32>
    %49 = arith.addf %46, %48 : vector<16x128xf32>
    %50 = math.tanh %49 : vector<16x128xf32>
    %51 = vector.extract_strided_slice %50 {offsets = [0, 64], sizes = [16, 64], strides = [1, 1]} : vector<16x128xf32> to vector<16x64xf32>
    %cst_15 = arith.constant -2.200000e+00 : f32
    %52 = vector.broadcast %cst_15 : f32 to vector<16x64xf32>
    %53 = arith.cmpf oge, %51, %52 : vector<16x64xf32>
    %cst_16 = arith.constant -1.800000e+00 : f32
    %54 = vector.broadcast %cst_16 : f32 to vector<16x64xf32>
    %55 = arith.cmpf olt, %51, %54 : vector<16x64xf32>
    %56 = arith.andi %53, %55 : vector<16x64xi1>
    %57 = arith.extui %56 : vector<16x64xi1> to vector<16x64xi32>
    %58 = arith.sitofp %57 : vector<16x64xi32> to vector<16x64xf32>
    %cst_17 = arith.constant -1.800000e+00 : f32
    %59 = vector.broadcast %cst_17 : f32 to vector<16x64xf32>
    %60 = arith.cmpf oge, %51, %59 : vector<16x64xf32>
    %cst_18 = arith.constant -1.400000e+00 : f32
    %61 = vector.broadcast %cst_18 : f32 to vector<16x64xf32>
    %62 = arith.cmpf olt, %51, %61 : vector<16x64xf32>
    %63 = arith.andi %60, %62 : vector<16x64xi1>
    %64 = arith.extui %63 : vector<16x64xi1> to vector<16x64xi32>
    %65 = arith.sitofp %64 : vector<16x64xi32> to vector<16x64xf32>
    %cst_19 = arith.constant -1.400000e+00 : f32
    %66 = vector.broadcast %cst_19 : f32 to vector<16x64xf32>
    %67 = arith.cmpf oge, %51, %66 : vector<16x64xf32>
    %cst_20 = arith.constant -1.000000e+00 : f32
    %68 = vector.broadcast %cst_20 : f32 to vector<16x64xf32>
    %69 = arith.cmpf olt, %51, %68 : vector<16x64xf32>
    %70 = arith.andi %67, %69 : vector<16x64xi1>
    %71 = arith.extui %70 : vector<16x64xi1> to vector<16x64xi32>
    %72 = arith.sitofp %71 : vector<16x64xi32> to vector<16x64xf32>
    %cst_21 = arith.constant -1.000000e+00 : f32
    %73 = vector.broadcast %cst_21 : f32 to vector<16x64xf32>
    %74 = arith.cmpf oge, %51, %73 : vector<16x64xf32>
    %cst_22 = arith.constant -6.000000e-01 : f32
    %75 = vector.broadcast %cst_22 : f32 to vector<16x64xf32>
    %76 = arith.cmpf olt, %51, %75 : vector<16x64xf32>
    %77 = arith.andi %74, %76 : vector<16x64xi1>
    %78 = arith.extui %77 : vector<16x64xi1> to vector<16x64xi32>
    %79 = arith.sitofp %78 : vector<16x64xi32> to vector<16x64xf32>
    %cst_23 = arith.constant -6.000000e-01 : f32
    %80 = vector.broadcast %cst_23 : f32 to vector<16x64xf32>
    %81 = arith.cmpf oge, %51, %80 : vector<16x64xf32>
    %cst_24 = arith.constant -2.000000e-01 : f32
    %82 = vector.broadcast %cst_24 : f32 to vector<16x64xf32>
    %83 = arith.cmpf olt, %51, %82 : vector<16x64xf32>
    %84 = arith.andi %81, %83 : vector<16x64xi1>
    %85 = arith.extui %84 : vector<16x64xi1> to vector<16x64xi32>
    %86 = arith.sitofp %85 : vector<16x64xi32> to vector<16x64xf32>
    %cst_25 = arith.constant -2.000000e-01 : f32
    %87 = vector.broadcast %cst_25 : f32 to vector<16x64xf32>
    %88 = arith.cmpf oge, %51, %87 : vector<16x64xf32>
    %cst_26 = arith.constant 2.000000e-01 : f32
    %89 = vector.broadcast %cst_26 : f32 to vector<16x64xf32>
    %90 = arith.cmpf olt, %51, %89 : vector<16x64xf32>
    %91 = arith.andi %88, %90 : vector<16x64xi1>
    %92 = arith.extui %91 : vector<16x64xi1> to vector<16x64xi32>
    %93 = arith.sitofp %92 : vector<16x64xi32> to vector<16x64xf32>
    %cst_27 = arith.constant 2.000000e-01 : f32
    %94 = vector.broadcast %cst_27 : f32 to vector<16x64xf32>
    %95 = arith.cmpf oge, %51, %94 : vector<16x64xf32>
    %cst_28 = arith.constant 6.000000e-01 : f32
    %96 = vector.broadcast %cst_28 : f32 to vector<16x64xf32>
    %97 = arith.cmpf olt, %51, %96 : vector<16x64xf32>
    %98 = arith.andi %95, %97 : vector<16x64xi1>
    %99 = arith.extui %98 : vector<16x64xi1> to vector<16x64xi32>
    %100 = arith.sitofp %99 : vector<16x64xi32> to vector<16x64xf32>
    %cst_29 = arith.constant 6.000000e-01 : f32
    %101 = vector.broadcast %cst_29 : f32 to vector<16x64xf32>
    %102 = arith.cmpf oge, %51, %101 : vector<16x64xf32>
    %cst_30 = arith.constant 1.000000e+00 : f32
    %103 = vector.broadcast %cst_30 : f32 to vector<16x64xf32>
    %104 = arith.cmpf olt, %51, %103 : vector<16x64xf32>
    %105 = arith.andi %102, %104 : vector<16x64xi1>
    %106 = arith.extui %105 : vector<16x64xi1> to vector<16x64xi32>
    %107 = arith.sitofp %106 : vector<16x64xi32> to vector<16x64xf32>
    %cst_31 = arith.constant 1.000000e+00 : f32
    %108 = vector.broadcast %cst_31 : f32 to vector<16x64xf32>
    %109 = arith.cmpf oge, %51, %108 : vector<16x64xf32>
    %cst_32 = arith.constant 1.400000e+00 : f32
    %110 = vector.broadcast %cst_32 : f32 to vector<16x64xf32>
    %111 = arith.cmpf olt, %51, %110 : vector<16x64xf32>
    %112 = arith.andi %109, %111 : vector<16x64xi1>
    %113 = arith.extui %112 : vector<16x64xi1> to vector<16x64xi32>
    %114 = arith.sitofp %113 : vector<16x64xi32> to vector<16x64xf32>
    %cst_33 = arith.constant 1.400000e+00 : f32
    %115 = vector.broadcast %cst_33 : f32 to vector<16x64xf32>
    %116 = arith.cmpf oge, %51, %115 : vector<16x64xf32>
    %cst_34 = arith.constant 1.800000e+00 : f32
    %117 = vector.broadcast %cst_34 : f32 to vector<16x64xf32>
    %118 = arith.cmpf olt, %51, %117 : vector<16x64xf32>
    %119 = arith.andi %116, %118 : vector<16x64xi1>
    %120 = arith.extui %119 : vector<16x64xi1> to vector<16x64xi32>
    %121 = arith.sitofp %120 : vector<16x64xi32> to vector<16x64xf32>
    %cst_35 = arith.constant 1.800000e+00 : f32
    %122 = vector.broadcast %cst_35 : f32 to vector<16x64xf32>
    %123 = arith.cmpf oge, %51, %122 : vector<16x64xf32>
    %cst_36 = arith.constant 2.200000e+00 : f32
    %124 = vector.broadcast %cst_36 : f32 to vector<16x64xf32>
    %125 = arith.cmpf olt, %51, %124 : vector<16x64xf32>
    %126 = arith.andi %123, %125 : vector<16x64xi1>
    %127 = arith.extui %126 : vector<16x64xi1> to vector<16x64xi32>
    %128 = arith.sitofp %127 : vector<16x64xi32> to vector<16x64xf32>
    %cst_37 = arith.constant -2.200000e+00 : f32
    %129 = vector.broadcast %cst_37 : f32 to vector<16x64xf32>
    %130 = arith.subf %51, %129 : vector<16x64xf32>
    %cst_38 = arith.constant 2.500000e+00 : f32
    %131 = vector.broadcast %cst_38 : f32 to vector<16x64xf32>
    %132 = arith.mulf %130, %131 : vector<16x64xf32>
    %cst_39 = arith.constant -1.400000e+00 : f32
    %133 = vector.broadcast %cst_39 : f32 to vector<16x64xf32>
    %134 = arith.subf %133, %51 : vector<16x64xf32>
    %cst_40 = arith.constant 2.500000e+00 : f32
    %135 = vector.broadcast %cst_40 : f32 to vector<16x64xf32>
    %136 = arith.mulf %134, %135 : vector<16x64xf32>
    %137 = arith.mulf %132, %58 : vector<16x64xf32>
    %138 = arith.mulf %136, %65 : vector<16x64xf32>
    %139 = arith.addf %137, %138 : vector<16x64xf32>
    %cst_41 = arith.constant -1.800000e+00 : f32
    %140 = vector.broadcast %cst_41 : f32 to vector<16x64xf32>
    %141 = arith.subf %51, %140 : vector<16x64xf32>
    %cst_42 = arith.constant 2.500000e+00 : f32
    %142 = vector.broadcast %cst_42 : f32 to vector<16x64xf32>
    %143 = arith.mulf %141, %142 : vector<16x64xf32>
    %cst_43 = arith.constant -1.000000e+00 : f32
    %144 = vector.broadcast %cst_43 : f32 to vector<16x64xf32>
    %145 = arith.subf %144, %51 : vector<16x64xf32>
    %cst_44 = arith.constant 2.500000e+00 : f32
    %146 = vector.broadcast %cst_44 : f32 to vector<16x64xf32>
    %147 = arith.mulf %145, %146 : vector<16x64xf32>
    %148 = arith.mulf %143, %65 : vector<16x64xf32>
    %149 = arith.mulf %147, %72 : vector<16x64xf32>
    %150 = arith.addf %148, %149 : vector<16x64xf32>
    %cst_45 = arith.constant -1.400000e+00 : f32
    %151 = vector.broadcast %cst_45 : f32 to vector<16x64xf32>
    %152 = arith.subf %51, %151 : vector<16x64xf32>
    %cst_46 = arith.constant 2.500000e+00 : f32
    %153 = vector.broadcast %cst_46 : f32 to vector<16x64xf32>
    %154 = arith.mulf %152, %153 : vector<16x64xf32>
    %cst_47 = arith.constant -6.000000e-01 : f32
    %155 = vector.broadcast %cst_47 : f32 to vector<16x64xf32>
    %156 = arith.subf %155, %51 : vector<16x64xf32>
    %cst_48 = arith.constant 2.500000e+00 : f32
    %157 = vector.broadcast %cst_48 : f32 to vector<16x64xf32>
    %158 = arith.mulf %156, %157 : vector<16x64xf32>
    %159 = arith.mulf %154, %72 : vector<16x64xf32>
    %160 = arith.mulf %158, %79 : vector<16x64xf32>
    %161 = arith.addf %159, %160 : vector<16x64xf32>
    %cst_49 = arith.constant -1.000000e+00 : f32
    %162 = vector.broadcast %cst_49 : f32 to vector<16x64xf32>
    %163 = arith.subf %51, %162 : vector<16x64xf32>
    %cst_50 = arith.constant 2.500000e+00 : f32
    %164 = vector.broadcast %cst_50 : f32 to vector<16x64xf32>
    %165 = arith.mulf %163, %164 : vector<16x64xf32>
    %cst_51 = arith.constant -2.000000e-01 : f32
    %166 = vector.broadcast %cst_51 : f32 to vector<16x64xf32>
    %167 = arith.subf %166, %51 : vector<16x64xf32>
    %cst_52 = arith.constant 2.500000e+00 : f32
    %168 = vector.broadcast %cst_52 : f32 to vector<16x64xf32>
    %169 = arith.mulf %167, %168 : vector<16x64xf32>
    %170 = arith.mulf %165, %79 : vector<16x64xf32>
    %171 = arith.mulf %169, %86 : vector<16x64xf32>
    %172 = arith.addf %170, %171 : vector<16x64xf32>
    %cst_53 = arith.constant -6.000000e-01 : f32
    %173 = vector.broadcast %cst_53 : f32 to vector<16x64xf32>
    %174 = arith.subf %51, %173 : vector<16x64xf32>
    %cst_54 = arith.constant 2.500000e+00 : f32
    %175 = vector.broadcast %cst_54 : f32 to vector<16x64xf32>
    %176 = arith.mulf %174, %175 : vector<16x64xf32>
    %cst_55 = arith.constant 2.000000e-01 : f32
    %177 = vector.broadcast %cst_55 : f32 to vector<16x64xf32>
    %178 = arith.subf %177, %51 : vector<16x64xf32>
    %cst_56 = arith.constant 2.500000e+00 : f32
    %179 = vector.broadcast %cst_56 : f32 to vector<16x64xf32>
    %180 = arith.mulf %178, %179 : vector<16x64xf32>
    %181 = arith.mulf %176, %86 : vector<16x64xf32>
    %182 = arith.mulf %180, %93 : vector<16x64xf32>
    %183 = arith.addf %181, %182 : vector<16x64xf32>
    %cst_57 = arith.constant -2.000000e-01 : f32
    %184 = vector.broadcast %cst_57 : f32 to vector<16x64xf32>
    %185 = arith.subf %51, %184 : vector<16x64xf32>
    %cst_58 = arith.constant 2.500000e+00 : f32
    %186 = vector.broadcast %cst_58 : f32 to vector<16x64xf32>
    %187 = arith.mulf %185, %186 : vector<16x64xf32>
    %cst_59 = arith.constant 6.000000e-01 : f32
    %188 = vector.broadcast %cst_59 : f32 to vector<16x64xf32>
    %189 = arith.subf %188, %51 : vector<16x64xf32>
    %cst_60 = arith.constant 2.500000e+00 : f32
    %190 = vector.broadcast %cst_60 : f32 to vector<16x64xf32>
    %191 = arith.mulf %189, %190 : vector<16x64xf32>
    %192 = arith.mulf %187, %93 : vector<16x64xf32>
    %193 = arith.mulf %191, %100 : vector<16x64xf32>
    %194 = arith.addf %192, %193 : vector<16x64xf32>
    %cst_61 = arith.constant 2.000000e-01 : f32
    %195 = vector.broadcast %cst_61 : f32 to vector<16x64xf32>
    %196 = arith.subf %51, %195 : vector<16x64xf32>
    %cst_62 = arith.constant 2.500000e+00 : f32
    %197 = vector.broadcast %cst_62 : f32 to vector<16x64xf32>
    %198 = arith.mulf %196, %197 : vector<16x64xf32>
    %cst_63 = arith.constant 1.000000e+00 : f32
    %199 = vector.broadcast %cst_63 : f32 to vector<16x64xf32>
    %200 = arith.subf %199, %51 : vector<16x64xf32>
    %cst_64 = arith.constant 2.500000e+00 : f32
    %201 = vector.broadcast %cst_64 : f32 to vector<16x64xf32>
    %202 = arith.mulf %200, %201 : vector<16x64xf32>
    %203 = arith.mulf %198, %100 : vector<16x64xf32>
    %204 = arith.mulf %202, %107 : vector<16x64xf32>
    %205 = arith.addf %203, %204 : vector<16x64xf32>
    %cst_65 = arith.constant 6.000000e-01 : f32
    %206 = vector.broadcast %cst_65 : f32 to vector<16x64xf32>
    %207 = arith.subf %51, %206 : vector<16x64xf32>
    %cst_66 = arith.constant 2.500000e+00 : f32
    %208 = vector.broadcast %cst_66 : f32 to vector<16x64xf32>
    %209 = arith.mulf %207, %208 : vector<16x64xf32>
    %cst_67 = arith.constant 1.400000e+00 : f32
    %210 = vector.broadcast %cst_67 : f32 to vector<16x64xf32>
    %211 = arith.subf %210, %51 : vector<16x64xf32>
    %cst_68 = arith.constant 2.500000e+00 : f32
    %212 = vector.broadcast %cst_68 : f32 to vector<16x64xf32>
    %213 = arith.mulf %211, %212 : vector<16x64xf32>
    %214 = arith.mulf %209, %107 : vector<16x64xf32>
    %215 = arith.mulf %213, %114 : vector<16x64xf32>
    %216 = arith.addf %214, %215 : vector<16x64xf32>
    %cst_69 = arith.constant 1.000000e+00 : f32
    %217 = vector.broadcast %cst_69 : f32 to vector<16x64xf32>
    %218 = arith.subf %51, %217 : vector<16x64xf32>
    %cst_70 = arith.constant 2.500000e+00 : f32
    %219 = vector.broadcast %cst_70 : f32 to vector<16x64xf32>
    %220 = arith.mulf %218, %219 : vector<16x64xf32>
    %cst_71 = arith.constant 1.800000e+00 : f32
    %221 = vector.broadcast %cst_71 : f32 to vector<16x64xf32>
    %222 = arith.subf %221, %51 : vector<16x64xf32>
    %cst_72 = arith.constant 2.500000e+00 : f32
    %223 = vector.broadcast %cst_72 : f32 to vector<16x64xf32>
    %224 = arith.mulf %222, %223 : vector<16x64xf32>
    %225 = arith.mulf %220, %114 : vector<16x64xf32>
    %226 = arith.mulf %224, %121 : vector<16x64xf32>
    %227 = arith.addf %225, %226 : vector<16x64xf32>
    %cst_73 = arith.constant 1.400000e+00 : f32
    %228 = vector.broadcast %cst_73 : f32 to vector<16x64xf32>
    %229 = arith.subf %51, %228 : vector<16x64xf32>
    %cst_74 = arith.constant 2.500000e+00 : f32
    %230 = vector.broadcast %cst_74 : f32 to vector<16x64xf32>
    %231 = arith.mulf %229, %230 : vector<16x64xf32>
    %cst_75 = arith.constant 2.200000e+00 : f32
    %232 = vector.broadcast %cst_75 : f32 to vector<16x64xf32>
    %233 = arith.subf %232, %51 : vector<16x64xf32>
    %cst_76 = arith.constant 2.500000e+00 : f32
    %234 = vector.broadcast %cst_76 : f32 to vector<16x64xf32>
    %235 = arith.mulf %233, %234 : vector<16x64xf32>
    %236 = arith.mulf %231, %121 : vector<16x64xf32>
    %237 = arith.mulf %235, %128 : vector<16x64xf32>
    %238 = arith.addf %236, %237 : vector<16x64xf32>
    %cst_77 = arith.constant -2.200000e+00 : f32
    %239 = vector.broadcast %cst_77 : f32 to vector<16x64xf32>
    %240 = arith.subf %51, %239 : vector<16x64xf32>
    %cst_78 = arith.constant 1.250000e+00 : f32
    %241 = vector.broadcast %cst_78 : f32 to vector<16x64xf32>
    %242 = arith.mulf %240, %241 : vector<16x64xf32>
    %cst_79 = arith.constant -1.000000e+00 : f32
    %243 = vector.broadcast %cst_79 : f32 to vector<16x64xf32>
    %244 = arith.subf %243, %51 : vector<16x64xf32>
    %cst_80 = arith.constant 1.250000e+00 : f32
    %245 = vector.broadcast %cst_80 : f32 to vector<16x64xf32>
    %246 = arith.mulf %244, %245 : vector<16x64xf32>
    %247 = arith.mulf %242, %139 : vector<16x64xf32>
    %248 = arith.mulf %246, %150 : vector<16x64xf32>
    %249 = arith.addf %247, %248 : vector<16x64xf32>
    %cst_81 = arith.constant -1.800000e+00 : f32
    %250 = vector.broadcast %cst_81 : f32 to vector<16x64xf32>
    %251 = arith.subf %51, %250 : vector<16x64xf32>
    %cst_82 = arith.constant 1.250000e+00 : f32
    %252 = vector.broadcast %cst_82 : f32 to vector<16x64xf32>
    %253 = arith.mulf %251, %252 : vector<16x64xf32>
    %cst_83 = arith.constant -6.000000e-01 : f32
    %254 = vector.broadcast %cst_83 : f32 to vector<16x64xf32>
    %255 = arith.subf %254, %51 : vector<16x64xf32>
    %cst_84 = arith.constant 1.250000e+00 : f32
    %256 = vector.broadcast %cst_84 : f32 to vector<16x64xf32>
    %257 = arith.mulf %255, %256 : vector<16x64xf32>
    %258 = arith.mulf %253, %150 : vector<16x64xf32>
    %259 = arith.mulf %257, %161 : vector<16x64xf32>
    %260 = arith.addf %258, %259 : vector<16x64xf32>
    %cst_85 = arith.constant -1.400000e+00 : f32
    %261 = vector.broadcast %cst_85 : f32 to vector<16x64xf32>
    %262 = arith.subf %51, %261 : vector<16x64xf32>
    %cst_86 = arith.constant 1.250000e+00 : f32
    %263 = vector.broadcast %cst_86 : f32 to vector<16x64xf32>
    %264 = arith.mulf %262, %263 : vector<16x64xf32>
    %cst_87 = arith.constant -2.000000e-01 : f32
    %265 = vector.broadcast %cst_87 : f32 to vector<16x64xf32>
    %266 = arith.subf %265, %51 : vector<16x64xf32>
    %cst_88 = arith.constant 1.250000e+00 : f32
    %267 = vector.broadcast %cst_88 : f32 to vector<16x64xf32>
    %268 = arith.mulf %266, %267 : vector<16x64xf32>
    %269 = arith.mulf %264, %161 : vector<16x64xf32>
    %270 = arith.mulf %268, %172 : vector<16x64xf32>
    %271 = arith.addf %269, %270 : vector<16x64xf32>
    %cst_89 = arith.constant -1.000000e+00 : f32
    %272 = vector.broadcast %cst_89 : f32 to vector<16x64xf32>
    %273 = arith.subf %51, %272 : vector<16x64xf32>
    %cst_90 = arith.constant 1.250000e+00 : f32
    %274 = vector.broadcast %cst_90 : f32 to vector<16x64xf32>
    %275 = arith.mulf %273, %274 : vector<16x64xf32>
    %cst_91 = arith.constant 2.000000e-01 : f32
    %276 = vector.broadcast %cst_91 : f32 to vector<16x64xf32>
    %277 = arith.subf %276, %51 : vector<16x64xf32>
    %cst_92 = arith.constant 1.250000e+00 : f32
    %278 = vector.broadcast %cst_92 : f32 to vector<16x64xf32>
    %279 = arith.mulf %277, %278 : vector<16x64xf32>
    %280 = arith.mulf %275, %172 : vector<16x64xf32>
    %281 = arith.mulf %279, %183 : vector<16x64xf32>
    %282 = arith.addf %280, %281 : vector<16x64xf32>
    %cst_93 = arith.constant -6.000000e-01 : f32
    %283 = vector.broadcast %cst_93 : f32 to vector<16x64xf32>
    %284 = arith.subf %51, %283 : vector<16x64xf32>
    %cst_94 = arith.constant 1.250000e+00 : f32
    %285 = vector.broadcast %cst_94 : f32 to vector<16x64xf32>
    %286 = arith.mulf %284, %285 : vector<16x64xf32>
    %cst_95 = arith.constant 6.000000e-01 : f32
    %287 = vector.broadcast %cst_95 : f32 to vector<16x64xf32>
    %288 = arith.subf %287, %51 : vector<16x64xf32>
    %cst_96 = arith.constant 1.250000e+00 : f32
    %289 = vector.broadcast %cst_96 : f32 to vector<16x64xf32>
    %290 = arith.mulf %288, %289 : vector<16x64xf32>
    %291 = arith.mulf %286, %183 : vector<16x64xf32>
    %292 = arith.mulf %290, %194 : vector<16x64xf32>
    %293 = arith.addf %291, %292 : vector<16x64xf32>
    %cst_97 = arith.constant -2.000000e-01 : f32
    %294 = vector.broadcast %cst_97 : f32 to vector<16x64xf32>
    %295 = arith.subf %51, %294 : vector<16x64xf32>
    %cst_98 = arith.constant 1.250000e+00 : f32
    %296 = vector.broadcast %cst_98 : f32 to vector<16x64xf32>
    %297 = arith.mulf %295, %296 : vector<16x64xf32>
    %cst_99 = arith.constant 1.000000e+00 : f32
    %298 = vector.broadcast %cst_99 : f32 to vector<16x64xf32>
    %299 = arith.subf %298, %51 : vector<16x64xf32>
    %cst_100 = arith.constant 1.250000e+00 : f32
    %300 = vector.broadcast %cst_100 : f32 to vector<16x64xf32>
    %301 = arith.mulf %299, %300 : vector<16x64xf32>
    %302 = arith.mulf %297, %194 : vector<16x64xf32>
    %303 = arith.mulf %301, %205 : vector<16x64xf32>
    %304 = arith.addf %302, %303 : vector<16x64xf32>
    %cst_101 = arith.constant 2.000000e-01 : f32
    %305 = vector.broadcast %cst_101 : f32 to vector<16x64xf32>
    %306 = arith.subf %51, %305 : vector<16x64xf32>
    %cst_102 = arith.constant 1.250000e+00 : f32
    %307 = vector.broadcast %cst_102 : f32 to vector<16x64xf32>
    %308 = arith.mulf %306, %307 : vector<16x64xf32>
    %cst_103 = arith.constant 1.400000e+00 : f32
    %309 = vector.broadcast %cst_103 : f32 to vector<16x64xf32>
    %310 = arith.subf %309, %51 : vector<16x64xf32>
    %cst_104 = arith.constant 1.250000e+00 : f32
    %311 = vector.broadcast %cst_104 : f32 to vector<16x64xf32>
    %312 = arith.mulf %310, %311 : vector<16x64xf32>
    %313 = arith.mulf %308, %205 : vector<16x64xf32>
    %314 = arith.mulf %312, %216 : vector<16x64xf32>
    %315 = arith.addf %313, %314 : vector<16x64xf32>
    %cst_105 = arith.constant 6.000000e-01 : f32
    %316 = vector.broadcast %cst_105 : f32 to vector<16x64xf32>
    %317 = arith.subf %51, %316 : vector<16x64xf32>
    %cst_106 = arith.constant 1.250000e+00 : f32
    %318 = vector.broadcast %cst_106 : f32 to vector<16x64xf32>
    %319 = arith.mulf %317, %318 : vector<16x64xf32>
    %cst_107 = arith.constant 1.800000e+00 : f32
    %320 = vector.broadcast %cst_107 : f32 to vector<16x64xf32>
    %321 = arith.subf %320, %51 : vector<16x64xf32>
    %cst_108 = arith.constant 1.250000e+00 : f32
    %322 = vector.broadcast %cst_108 : f32 to vector<16x64xf32>
    %323 = arith.mulf %321, %322 : vector<16x64xf32>
    %324 = arith.mulf %319, %216 : vector<16x64xf32>
    %325 = arith.mulf %323, %227 : vector<16x64xf32>
    %326 = arith.addf %324, %325 : vector<16x64xf32>
    %cst_109 = arith.constant 1.000000e+00 : f32
    %327 = vector.broadcast %cst_109 : f32 to vector<16x64xf32>
    %328 = arith.subf %51, %327 : vector<16x64xf32>
    %cst_110 = arith.constant 1.250000e+00 : f32
    %329 = vector.broadcast %cst_110 : f32 to vector<16x64xf32>
    %330 = arith.mulf %328, %329 : vector<16x64xf32>
    %cst_111 = arith.constant 2.200000e+00 : f32
    %331 = vector.broadcast %cst_111 : f32 to vector<16x64xf32>
    %332 = arith.subf %331, %51 : vector<16x64xf32>
    %cst_112 = arith.constant 1.250000e+00 : f32
    %333 = vector.broadcast %cst_112 : f32 to vector<16x64xf32>
    %334 = arith.mulf %332, %333 : vector<16x64xf32>
    %335 = arith.mulf %330, %227 : vector<16x64xf32>
    %336 = arith.mulf %334, %238 : vector<16x64xf32>
    %337 = arith.addf %335, %336 : vector<16x64xf32>
    %cst_113 = arith.constant -2.200000e+00 : f32
    %338 = vector.broadcast %cst_113 : f32 to vector<16x64xf32>
    %339 = arith.subf %51, %338 : vector<16x64xf32>
    %cst_114 = arith.constant 0.833333313 : f32
    %340 = vector.broadcast %cst_114 : f32 to vector<16x64xf32>
    %341 = arith.mulf %339, %340 : vector<16x64xf32>
    %cst_115 = arith.constant -6.000000e-01 : f32
    %342 = vector.broadcast %cst_115 : f32 to vector<16x64xf32>
    %343 = arith.subf %342, %51 : vector<16x64xf32>
    %cst_116 = arith.constant 0.833333313 : f32
    %344 = vector.broadcast %cst_116 : f32 to vector<16x64xf32>
    %345 = arith.mulf %343, %344 : vector<16x64xf32>
    %346 = arith.mulf %341, %249 : vector<16x64xf32>
    %347 = arith.mulf %345, %260 : vector<16x64xf32>
    %348 = arith.addf %346, %347 : vector<16x64xf32>
    %cst_117 = arith.constant -1.800000e+00 : f32
    %349 = vector.broadcast %cst_117 : f32 to vector<16x64xf32>
    %350 = arith.subf %51, %349 : vector<16x64xf32>
    %cst_118 = arith.constant 0.833333313 : f32
    %351 = vector.broadcast %cst_118 : f32 to vector<16x64xf32>
    %352 = arith.mulf %350, %351 : vector<16x64xf32>
    %cst_119 = arith.constant -2.000000e-01 : f32
    %353 = vector.broadcast %cst_119 : f32 to vector<16x64xf32>
    %354 = arith.subf %353, %51 : vector<16x64xf32>
    %cst_120 = arith.constant 0.833333313 : f32
    %355 = vector.broadcast %cst_120 : f32 to vector<16x64xf32>
    %356 = arith.mulf %354, %355 : vector<16x64xf32>
    %357 = arith.mulf %352, %260 : vector<16x64xf32>
    %358 = arith.mulf %356, %271 : vector<16x64xf32>
    %359 = arith.addf %357, %358 : vector<16x64xf32>
    %cst_121 = arith.constant -1.400000e+00 : f32
    %360 = vector.broadcast %cst_121 : f32 to vector<16x64xf32>
    %361 = arith.subf %51, %360 : vector<16x64xf32>
    %cst_122 = arith.constant 0.833333313 : f32
    %362 = vector.broadcast %cst_122 : f32 to vector<16x64xf32>
    %363 = arith.mulf %361, %362 : vector<16x64xf32>
    %cst_123 = arith.constant 2.000000e-01 : f32
    %364 = vector.broadcast %cst_123 : f32 to vector<16x64xf32>
    %365 = arith.subf %364, %51 : vector<16x64xf32>
    %cst_124 = arith.constant 0.833333313 : f32
    %366 = vector.broadcast %cst_124 : f32 to vector<16x64xf32>
    %367 = arith.mulf %365, %366 : vector<16x64xf32>
    %368 = arith.mulf %363, %271 : vector<16x64xf32>
    %369 = arith.mulf %367, %282 : vector<16x64xf32>
    %370 = arith.addf %368, %369 : vector<16x64xf32>
    %cst_125 = arith.constant -1.000000e+00 : f32
    %371 = vector.broadcast %cst_125 : f32 to vector<16x64xf32>
    %372 = arith.subf %51, %371 : vector<16x64xf32>
    %cst_126 = arith.constant 0.833333313 : f32
    %373 = vector.broadcast %cst_126 : f32 to vector<16x64xf32>
    %374 = arith.mulf %372, %373 : vector<16x64xf32>
    %cst_127 = arith.constant 6.000000e-01 : f32
    %375 = vector.broadcast %cst_127 : f32 to vector<16x64xf32>
    %376 = arith.subf %375, %51 : vector<16x64xf32>
    %cst_128 = arith.constant 0.833333313 : f32
    %377 = vector.broadcast %cst_128 : f32 to vector<16x64xf32>
    %378 = arith.mulf %376, %377 : vector<16x64xf32>
    %379 = arith.mulf %374, %282 : vector<16x64xf32>
    %380 = arith.mulf %378, %293 : vector<16x64xf32>
    %381 = arith.addf %379, %380 : vector<16x64xf32>
    %cst_129 = arith.constant -6.000000e-01 : f32
    %382 = vector.broadcast %cst_129 : f32 to vector<16x64xf32>
    %383 = arith.subf %51, %382 : vector<16x64xf32>
    %cst_130 = arith.constant 0.833333313 : f32
    %384 = vector.broadcast %cst_130 : f32 to vector<16x64xf32>
    %385 = arith.mulf %383, %384 : vector<16x64xf32>
    %cst_131 = arith.constant 1.000000e+00 : f32
    %386 = vector.broadcast %cst_131 : f32 to vector<16x64xf32>
    %387 = arith.subf %386, %51 : vector<16x64xf32>
    %cst_132 = arith.constant 0.833333313 : f32
    %388 = vector.broadcast %cst_132 : f32 to vector<16x64xf32>
    %389 = arith.mulf %387, %388 : vector<16x64xf32>
    %390 = arith.mulf %385, %293 : vector<16x64xf32>
    %391 = arith.mulf %389, %304 : vector<16x64xf32>
    %392 = arith.addf %390, %391 : vector<16x64xf32>
    %cst_133 = arith.constant -2.000000e-01 : f32
    %393 = vector.broadcast %cst_133 : f32 to vector<16x64xf32>
    %394 = arith.subf %51, %393 : vector<16x64xf32>
    %cst_134 = arith.constant 0.833333313 : f32
    %395 = vector.broadcast %cst_134 : f32 to vector<16x64xf32>
    %396 = arith.mulf %394, %395 : vector<16x64xf32>
    %cst_135 = arith.constant 1.400000e+00 : f32
    %397 = vector.broadcast %cst_135 : f32 to vector<16x64xf32>
    %398 = arith.subf %397, %51 : vector<16x64xf32>
    %cst_136 = arith.constant 0.833333313 : f32
    %399 = vector.broadcast %cst_136 : f32 to vector<16x64xf32>
    %400 = arith.mulf %398, %399 : vector<16x64xf32>
    %401 = arith.mulf %396, %304 : vector<16x64xf32>
    %402 = arith.mulf %400, %315 : vector<16x64xf32>
    %403 = arith.addf %401, %402 : vector<16x64xf32>
    %cst_137 = arith.constant 2.000000e-01 : f32
    %404 = vector.broadcast %cst_137 : f32 to vector<16x64xf32>
    %405 = arith.subf %51, %404 : vector<16x64xf32>
    %cst_138 = arith.constant 0.833333313 : f32
    %406 = vector.broadcast %cst_138 : f32 to vector<16x64xf32>
    %407 = arith.mulf %405, %406 : vector<16x64xf32>
    %cst_139 = arith.constant 1.800000e+00 : f32
    %408 = vector.broadcast %cst_139 : f32 to vector<16x64xf32>
    %409 = arith.subf %408, %51 : vector<16x64xf32>
    %cst_140 = arith.constant 0.833333313 : f32
    %410 = vector.broadcast %cst_140 : f32 to vector<16x64xf32>
    %411 = arith.mulf %409, %410 : vector<16x64xf32>
    %412 = arith.mulf %407, %315 : vector<16x64xf32>
    %413 = arith.mulf %411, %326 : vector<16x64xf32>
    %414 = arith.addf %412, %413 : vector<16x64xf32>
    %cst_141 = arith.constant 6.000000e-01 : f32
    %415 = vector.broadcast %cst_141 : f32 to vector<16x64xf32>
    %416 = arith.subf %51, %415 : vector<16x64xf32>
    %cst_142 = arith.constant 0.833333313 : f32
    %417 = vector.broadcast %cst_142 : f32 to vector<16x64xf32>
    %418 = arith.mulf %416, %417 : vector<16x64xf32>
    %cst_143 = arith.constant 2.200000e+00 : f32
    %419 = vector.broadcast %cst_143 : f32 to vector<16x64xf32>
    %420 = arith.subf %419, %51 : vector<16x64xf32>
    %cst_144 = arith.constant 0.833333313 : f32
    %421 = vector.broadcast %cst_144 : f32 to vector<16x64xf32>
    %422 = arith.mulf %420, %421 : vector<16x64xf32>
    %423 = arith.mulf %418, %326 : vector<16x64xf32>
    %424 = arith.mulf %422, %337 : vector<16x64xf32>
    %425 = arith.addf %423, %424 : vector<16x64xf32>
    %426 = arith.negf %51 : vector<16x64xf32>
    %427 = math.exp %426 : vector<16x64xf32>
    %cst_145 = arith.constant 1.000000e+00 : f32
    %428 = vector.broadcast %cst_145 : f32 to vector<16x64xf32>
    %429 = arith.addf %428, %427 : vector<16x64xf32>
    %430 = arith.divf %428, %429 : vector<16x64xf32>
    %431 = arith.mulf %51, %430 : vector<16x64xf32>
    %432 = tpu.concatenate %348, %359, %370, %381, %392, %403, %414, %425, %431 in 1 : vector<16x64xf32>, vector<16x64xf32>, vector<16x64xf32>, vector<16x64xf32>, vector<16x64xf32>, vector<16x64xf32>, vector<16x64xf32>, vector<16x64xf32>, vector<16x64xf32> -> vector<16x576xf32>
    %433 = arith.truncf %432 : vector<16x576xf32> to vector<16x576xbf16>
    %c144 = arith.constant 144 : index
    %c0_146 = arith.constant 0 : index
    %434 = vector.load %arg1[%c144, %c0_146] : memref<1008x128xbf16, #tpu.memory_space<vmem>>, vector<576x128xbf16>
    %cst_147 = arith.constant dense<0.000000e+00> : vector<16x128xf32>
    %435 = tpu.matmul %433, %434, %cst_147 {dimension_numbers = #tpu.dot_dimension_numbers<[1], [0], [0], [1], [0, 0, 1, 1], [], []>} : vector<16x576xbf16>, vector<576x128xbf16>, vector<16x128xf32> -> vector<16x128xf32>
    %436 = vector.extract_strided_slice %435 {offsets = [0, 0], sizes = [16, 32], strides = [1, 1]} : vector<16x128xf32> to vector<16x32xf32>
    %cst_148 = arith.constant -2.200000e+00 : f32
    %437 = vector.broadcast %cst_148 : f32 to vector<16x32xf32>
    %438 = arith.cmpf oge, %436, %437 : vector<16x32xf32>
    %cst_149 = arith.constant -1.800000e+00 : f32
    %439 = vector.broadcast %cst_149 : f32 to vector<16x32xf32>
    %440 = arith.cmpf olt, %436, %439 : vector<16x32xf32>
    %441 = arith.andi %438, %440 : vector<16x32xi1>
    %442 = arith.extui %441 : vector<16x32xi1> to vector<16x32xi32>
    %443 = arith.sitofp %442 : vector<16x32xi32> to vector<16x32xf32>
    %cst_150 = arith.constant -1.800000e+00 : f32
    %444 = vector.broadcast %cst_150 : f32 to vector<16x32xf32>
    %445 = arith.cmpf oge, %436, %444 : vector<16x32xf32>
    %cst_151 = arith.constant -1.400000e+00 : f32
    %446 = vector.broadcast %cst_151 : f32 to vector<16x32xf32>
    %447 = arith.cmpf olt, %436, %446 : vector<16x32xf32>
    %448 = arith.andi %445, %447 : vector<16x32xi1>
    %449 = arith.extui %448 : vector<16x32xi1> to vector<16x32xi32>
    %450 = arith.sitofp %449 : vector<16x32xi32> to vector<16x32xf32>
    %cst_152 = arith.constant -1.400000e+00 : f32
    %451 = vector.broadcast %cst_152 : f32 to vector<16x32xf32>
    %452 = arith.cmpf oge, %436, %451 : vector<16x32xf32>
    %cst_153 = arith.constant -1.000000e+00 : f32
    %453 = vector.broadcast %cst_153 : f32 to vector<16x32xf32>
    %454 = arith.cmpf olt, %436, %453 : vector<16x32xf32>
    %455 = arith.andi %452, %454 : vector<16x32xi1>
    %456 = arith.extui %455 : vector<16x32xi1> to vector<16x32xi32>
    %457 = arith.sitofp %456 : vector<16x32xi32> to vector<16x32xf32>
    %cst_154 = arith.constant -1.000000e+00 : f32
    %458 = vector.broadcast %cst_154 : f32 to vector<16x32xf32>
    %459 = arith.cmpf oge, %436, %458 : vector<16x32xf32>
    %cst_155 = arith.constant -6.000000e-01 : f32
    %460 = vector.broadcast %cst_155 : f32 to vector<16x32xf32>
    %461 = arith.cmpf olt, %436, %460 : vector<16x32xf32>
    %462 = arith.andi %459, %461 : vector<16x32xi1>
    %463 = arith.extui %462 : vector<16x32xi1> to vector<16x32xi32>
    %464 = arith.sitofp %463 : vector<16x32xi32> to vector<16x32xf32>
    %cst_156 = arith.constant -6.000000e-01 : f32
    %465 = vector.broadcast %cst_156 : f32 to vector<16x32xf32>
    %466 = arith.cmpf oge, %436, %465 : vector<16x32xf32>
    %cst_157 = arith.constant -2.000000e-01 : f32
    %467 = vector.broadcast %cst_157 : f32 to vector<16x32xf32>
    %468 = arith.cmpf olt, %436, %467 : vector<16x32xf32>
    %469 = arith.andi %466, %468 : vector<16x32xi1>
    %470 = arith.extui %469 : vector<16x32xi1> to vector<16x32xi32>
    %471 = arith.sitofp %470 : vector<16x32xi32> to vector<16x32xf32>
    %cst_158 = arith.constant -2.000000e-01 : f32
    %472 = vector.broadcast %cst_158 : f32 to vector<16x32xf32>
    %473 = arith.cmpf oge, %436, %472 : vector<16x32xf32>
    %cst_159 = arith.constant 2.000000e-01 : f32
    %474 = vector.broadcast %cst_159 : f32 to vector<16x32xf32>
    %475 = arith.cmpf olt, %436, %474 : vector<16x32xf32>
    %476 = arith.andi %473, %475 : vector<16x32xi1>
    %477 = arith.extui %476 : vector<16x32xi1> to vector<16x32xi32>
    %478 = arith.sitofp %477 : vector<16x32xi32> to vector<16x32xf32>
    %cst_160 = arith.constant 2.000000e-01 : f32
    %479 = vector.broadcast %cst_160 : f32 to vector<16x32xf32>
    %480 = arith.cmpf oge, %436, %479 : vector<16x32xf32>
    %cst_161 = arith.constant 6.000000e-01 : f32
    %481 = vector.broadcast %cst_161 : f32 to vector<16x32xf32>
    %482 = arith.cmpf olt, %436, %481 : vector<16x32xf32>
    %483 = arith.andi %480, %482 : vector<16x32xi1>
    %484 = arith.extui %483 : vector<16x32xi1> to vector<16x32xi32>
    %485 = arith.sitofp %484 : vector<16x32xi32> to vector<16x32xf32>
    %cst_162 = arith.constant 6.000000e-01 : f32
    %486 = vector.broadcast %cst_162 : f32 to vector<16x32xf32>
    %487 = arith.cmpf oge, %436, %486 : vector<16x32xf32>
    %cst_163 = arith.constant 1.000000e+00 : f32
    %488 = vector.broadcast %cst_163 : f32 to vector<16x32xf32>
    %489 = arith.cmpf olt, %436, %488 : vector<16x32xf32>
    %490 = arith.andi %487, %489 : vector<16x32xi1>
    %491 = arith.extui %490 : vector<16x32xi1> to vector<16x32xi32>
    %492 = arith.sitofp %491 : vector<16x32xi32> to vector<16x32xf32>
    %cst_164 = arith.constant 1.000000e+00 : f32
    %493 = vector.broadcast %cst_164 : f32 to vector<16x32xf32>
    %494 = arith.cmpf oge, %436, %493 : vector<16x32xf32>
    %cst_165 = arith.constant 1.400000e+00 : f32
    %495 = vector.broadcast %cst_165 : f32 to vector<16x32xf32>
    %496 = arith.cmpf olt, %436, %495 : vector<16x32xf32>
    %497 = arith.andi %494, %496 : vector<16x32xi1>
    %498 = arith.extui %497 : vector<16x32xi1> to vector<16x32xi32>
    %499 = arith.sitofp %498 : vector<16x32xi32> to vector<16x32xf32>
    %cst_166 = arith.constant 1.400000e+00 : f32
    %500 = vector.broadcast %cst_166 : f32 to vector<16x32xf32>
    %501 = arith.cmpf oge, %436, %500 : vector<16x32xf32>
    %cst_167 = arith.constant 1.800000e+00 : f32
    %502 = vector.broadcast %cst_167 : f32 to vector<16x32xf32>
    %503 = arith.cmpf olt, %436, %502 : vector<16x32xf32>
    %504 = arith.andi %501, %503 : vector<16x32xi1>
    %505 = arith.extui %504 : vector<16x32xi1> to vector<16x32xi32>
    %506 = arith.sitofp %505 : vector<16x32xi32> to vector<16x32xf32>
    %cst_168 = arith.constant 1.800000e+00 : f32
    %507 = vector.broadcast %cst_168 : f32 to vector<16x32xf32>
    %508 = arith.cmpf oge, %436, %507 : vector<16x32xf32>
    %cst_169 = arith.constant 2.200000e+00 : f32
    %509 = vector.broadcast %cst_169 : f32 to vector<16x32xf32>
    %510 = arith.cmpf olt, %436, %509 : vector<16x32xf32>
    %511 = arith.andi %508, %510 : vector<16x32xi1>
    %512 = arith.extui %511 : vector<16x32xi1> to vector<16x32xi32>
    %513 = arith.sitofp %512 : vector<16x32xi32> to vector<16x32xf32>
    %cst_170 = arith.constant -2.200000e+00 : f32
    %514 = vector.broadcast %cst_170 : f32 to vector<16x32xf32>
    %515 = arith.subf %436, %514 : vector<16x32xf32>
    %cst_171 = arith.constant 2.500000e+00 : f32
    %516 = vector.broadcast %cst_171 : f32 to vector<16x32xf32>
    %517 = arith.mulf %515, %516 : vector<16x32xf32>
    %cst_172 = arith.constant -1.400000e+00 : f32
    %518 = vector.broadcast %cst_172 : f32 to vector<16x32xf32>
    %519 = arith.subf %518, %436 : vector<16x32xf32>
    %cst_173 = arith.constant 2.500000e+00 : f32
    %520 = vector.broadcast %cst_173 : f32 to vector<16x32xf32>
    %521 = arith.mulf %519, %520 : vector<16x32xf32>
    %522 = arith.mulf %517, %443 : vector<16x32xf32>
    %523 = arith.mulf %521, %450 : vector<16x32xf32>
    %524 = arith.addf %522, %523 : vector<16x32xf32>
    %cst_174 = arith.constant -1.800000e+00 : f32
    %525 = vector.broadcast %cst_174 : f32 to vector<16x32xf32>
    %526 = arith.subf %436, %525 : vector<16x32xf32>
    %cst_175 = arith.constant 2.500000e+00 : f32
    %527 = vector.broadcast %cst_175 : f32 to vector<16x32xf32>
    %528 = arith.mulf %526, %527 : vector<16x32xf32>
    %cst_176 = arith.constant -1.000000e+00 : f32
    %529 = vector.broadcast %cst_176 : f32 to vector<16x32xf32>
    %530 = arith.subf %529, %436 : vector<16x32xf32>
    %cst_177 = arith.constant 2.500000e+00 : f32
    %531 = vector.broadcast %cst_177 : f32 to vector<16x32xf32>
    %532 = arith.mulf %530, %531 : vector<16x32xf32>
    %533 = arith.mulf %528, %450 : vector<16x32xf32>
    %534 = arith.mulf %532, %457 : vector<16x32xf32>
    %535 = arith.addf %533, %534 : vector<16x32xf32>
    %cst_178 = arith.constant -1.400000e+00 : f32
    %536 = vector.broadcast %cst_178 : f32 to vector<16x32xf32>
    %537 = arith.subf %436, %536 : vector<16x32xf32>
    %cst_179 = arith.constant 2.500000e+00 : f32
    %538 = vector.broadcast %cst_179 : f32 to vector<16x32xf32>
    %539 = arith.mulf %537, %538 : vector<16x32xf32>
    %cst_180 = arith.constant -6.000000e-01 : f32
    %540 = vector.broadcast %cst_180 : f32 to vector<16x32xf32>
    %541 = arith.subf %540, %436 : vector<16x32xf32>
    %cst_181 = arith.constant 2.500000e+00 : f32
    %542 = vector.broadcast %cst_181 : f32 to vector<16x32xf32>
    %543 = arith.mulf %541, %542 : vector<16x32xf32>
    %544 = arith.mulf %539, %457 : vector<16x32xf32>
    %545 = arith.mulf %543, %464 : vector<16x32xf32>
    %546 = arith.addf %544, %545 : vector<16x32xf32>
    %cst_182 = arith.constant -1.000000e+00 : f32
    %547 = vector.broadcast %cst_182 : f32 to vector<16x32xf32>
    %548 = arith.subf %436, %547 : vector<16x32xf32>
    %cst_183 = arith.constant 2.500000e+00 : f32
    %549 = vector.broadcast %cst_183 : f32 to vector<16x32xf32>
    %550 = arith.mulf %548, %549 : vector<16x32xf32>
    %cst_184 = arith.constant -2.000000e-01 : f32
    %551 = vector.broadcast %cst_184 : f32 to vector<16x32xf32>
    %552 = arith.subf %551, %436 : vector<16x32xf32>
    %cst_185 = arith.constant 2.500000e+00 : f32
    %553 = vector.broadcast %cst_185 : f32 to vector<16x32xf32>
    %554 = arith.mulf %552, %553 : vector<16x32xf32>
    %555 = arith.mulf %550, %464 : vector<16x32xf32>
    %556 = arith.mulf %554, %471 : vector<16x32xf32>
    %557 = arith.addf %555, %556 : vector<16x32xf32>
    %cst_186 = arith.constant -6.000000e-01 : f32
    %558 = vector.broadcast %cst_186 : f32 to vector<16x32xf32>
    %559 = arith.subf %436, %558 : vector<16x32xf32>
    %cst_187 = arith.constant 2.500000e+00 : f32
    %560 = vector.broadcast %cst_187 : f32 to vector<16x32xf32>
    %561 = arith.mulf %559, %560 : vector<16x32xf32>
    %cst_188 = arith.constant 2.000000e-01 : f32
    %562 = vector.broadcast %cst_188 : f32 to vector<16x32xf32>
    %563 = arith.subf %562, %436 : vector<16x32xf32>
    %cst_189 = arith.constant 2.500000e+00 : f32
    %564 = vector.broadcast %cst_189 : f32 to vector<16x32xf32>
    %565 = arith.mulf %563, %564 : vector<16x32xf32>
    %566 = arith.mulf %561, %471 : vector<16x32xf32>
    %567 = arith.mulf %565, %478 : vector<16x32xf32>
    %568 = arith.addf %566, %567 : vector<16x32xf32>
    %cst_190 = arith.constant -2.000000e-01 : f32
    %569 = vector.broadcast %cst_190 : f32 to vector<16x32xf32>
    %570 = arith.subf %436, %569 : vector<16x32xf32>
    %cst_191 = arith.constant 2.500000e+00 : f32
    %571 = vector.broadcast %cst_191 : f32 to vector<16x32xf32>
    %572 = arith.mulf %570, %571 : vector<16x32xf32>
    %cst_192 = arith.constant 6.000000e-01 : f32
    %573 = vector.broadcast %cst_192 : f32 to vector<16x32xf32>
    %574 = arith.subf %573, %436 : vector<16x32xf32>
    %cst_193 = arith.constant 2.500000e+00 : f32
    %575 = vector.broadcast %cst_193 : f32 to vector<16x32xf32>
    %576 = arith.mulf %574, %575 : vector<16x32xf32>
    %577 = arith.mulf %572, %478 : vector<16x32xf32>
    %578 = arith.mulf %576, %485 : vector<16x32xf32>
    %579 = arith.addf %577, %578 : vector<16x32xf32>
    %cst_194 = arith.constant 2.000000e-01 : f32
    %580 = vector.broadcast %cst_194 : f32 to vector<16x32xf32>
    %581 = arith.subf %436, %580 : vector<16x32xf32>
    %cst_195 = arith.constant 2.500000e+00 : f32
    %582 = vector.broadcast %cst_195 : f32 to vector<16x32xf32>
    %583 = arith.mulf %581, %582 : vector<16x32xf32>
    %cst_196 = arith.constant 1.000000e+00 : f32
    %584 = vector.broadcast %cst_196 : f32 to vector<16x32xf32>
    %585 = arith.subf %584, %436 : vector<16x32xf32>
    %cst_197 = arith.constant 2.500000e+00 : f32
    %586 = vector.broadcast %cst_197 : f32 to vector<16x32xf32>
    %587 = arith.mulf %585, %586 : vector<16x32xf32>
    %588 = arith.mulf %583, %485 : vector<16x32xf32>
    %589 = arith.mulf %587, %492 : vector<16x32xf32>
    %590 = arith.addf %588, %589 : vector<16x32xf32>
    %cst_198 = arith.constant 6.000000e-01 : f32
    %591 = vector.broadcast %cst_198 : f32 to vector<16x32xf32>
    %592 = arith.subf %436, %591 : vector<16x32xf32>
    %cst_199 = arith.constant 2.500000e+00 : f32
    %593 = vector.broadcast %cst_199 : f32 to vector<16x32xf32>
    %594 = arith.mulf %592, %593 : vector<16x32xf32>
    %cst_200 = arith.constant 1.400000e+00 : f32
    %595 = vector.broadcast %cst_200 : f32 to vector<16x32xf32>
    %596 = arith.subf %595, %436 : vector<16x32xf32>
    %cst_201 = arith.constant 2.500000e+00 : f32
    %597 = vector.broadcast %cst_201 : f32 to vector<16x32xf32>
    %598 = arith.mulf %596, %597 : vector<16x32xf32>
    %599 = arith.mulf %594, %492 : vector<16x32xf32>
    %600 = arith.mulf %598, %499 : vector<16x32xf32>
    %601 = arith.addf %599, %600 : vector<16x32xf32>
    %cst_202 = arith.constant 1.000000e+00 : f32
    %602 = vector.broadcast %cst_202 : f32 to vector<16x32xf32>
    %603 = arith.subf %436, %602 : vector<16x32xf32>
    %cst_203 = arith.constant 2.500000e+00 : f32
    %604 = vector.broadcast %cst_203 : f32 to vector<16x32xf32>
    %605 = arith.mulf %603, %604 : vector<16x32xf32>
    %cst_204 = arith.constant 1.800000e+00 : f32
    %606 = vector.broadcast %cst_204 : f32 to vector<16x32xf32>
    %607 = arith.subf %606, %436 : vector<16x32xf32>
    %cst_205 = arith.constant 2.500000e+00 : f32
    %608 = vector.broadcast %cst_205 : f32 to vector<16x32xf32>
    %609 = arith.mulf %607, %608 : vector<16x32xf32>
    %610 = arith.mulf %605, %499 : vector<16x32xf32>
    %611 = arith.mulf %609, %506 : vector<16x32xf32>
    %612 = arith.addf %610, %611 : vector<16x32xf32>
    %cst_206 = arith.constant 1.400000e+00 : f32
    %613 = vector.broadcast %cst_206 : f32 to vector<16x32xf32>
    %614 = arith.subf %436, %613 : vector<16x32xf32>
    %cst_207 = arith.constant 2.500000e+00 : f32
    %615 = vector.broadcast %cst_207 : f32 to vector<16x32xf32>
    %616 = arith.mulf %614, %615 : vector<16x32xf32>
    %cst_208 = arith.constant 2.200000e+00 : f32
    %617 = vector.broadcast %cst_208 : f32 to vector<16x32xf32>
    %618 = arith.subf %617, %436 : vector<16x32xf32>
    %cst_209 = arith.constant 2.500000e+00 : f32
    %619 = vector.broadcast %cst_209 : f32 to vector<16x32xf32>
    %620 = arith.mulf %618, %619 : vector<16x32xf32>
    %621 = arith.mulf %616, %506 : vector<16x32xf32>
    %622 = arith.mulf %620, %513 : vector<16x32xf32>
    %623 = arith.addf %621, %622 : vector<16x32xf32>
    %cst_210 = arith.constant -2.200000e+00 : f32
    %624 = vector.broadcast %cst_210 : f32 to vector<16x32xf32>
    %625 = arith.subf %436, %624 : vector<16x32xf32>
    %cst_211 = arith.constant 1.250000e+00 : f32
    %626 = vector.broadcast %cst_211 : f32 to vector<16x32xf32>
    %627 = arith.mulf %625, %626 : vector<16x32xf32>
    %cst_212 = arith.constant -1.000000e+00 : f32
    %628 = vector.broadcast %cst_212 : f32 to vector<16x32xf32>
    %629 = arith.subf %628, %436 : vector<16x32xf32>
    %cst_213 = arith.constant 1.250000e+00 : f32
    %630 = vector.broadcast %cst_213 : f32 to vector<16x32xf32>
    %631 = arith.mulf %629, %630 : vector<16x32xf32>
    %632 = arith.mulf %627, %524 : vector<16x32xf32>
    %633 = arith.mulf %631, %535 : vector<16x32xf32>
    %634 = arith.addf %632, %633 : vector<16x32xf32>
    %cst_214 = arith.constant -1.800000e+00 : f32
    %635 = vector.broadcast %cst_214 : f32 to vector<16x32xf32>
    %636 = arith.subf %436, %635 : vector<16x32xf32>
    %cst_215 = arith.constant 1.250000e+00 : f32
    %637 = vector.broadcast %cst_215 : f32 to vector<16x32xf32>
    %638 = arith.mulf %636, %637 : vector<16x32xf32>
    %cst_216 = arith.constant -6.000000e-01 : f32
    %639 = vector.broadcast %cst_216 : f32 to vector<16x32xf32>
    %640 = arith.subf %639, %436 : vector<16x32xf32>
    %cst_217 = arith.constant 1.250000e+00 : f32
    %641 = vector.broadcast %cst_217 : f32 to vector<16x32xf32>
    %642 = arith.mulf %640, %641 : vector<16x32xf32>
    %643 = arith.mulf %638, %535 : vector<16x32xf32>
    %644 = arith.mulf %642, %546 : vector<16x32xf32>
    %645 = arith.addf %643, %644 : vector<16x32xf32>
    %cst_218 = arith.constant -1.400000e+00 : f32
    %646 = vector.broadcast %cst_218 : f32 to vector<16x32xf32>
    %647 = arith.subf %436, %646 : vector<16x32xf32>
    %cst_219 = arith.constant 1.250000e+00 : f32
    %648 = vector.broadcast %cst_219 : f32 to vector<16x32xf32>
    %649 = arith.mulf %647, %648 : vector<16x32xf32>
    %cst_220 = arith.constant -2.000000e-01 : f32
    %650 = vector.broadcast %cst_220 : f32 to vector<16x32xf32>
    %651 = arith.subf %650, %436 : vector<16x32xf32>
    %cst_221 = arith.constant 1.250000e+00 : f32
    %652 = vector.broadcast %cst_221 : f32 to vector<16x32xf32>
    %653 = arith.mulf %651, %652 : vector<16x32xf32>
    %654 = arith.mulf %649, %546 : vector<16x32xf32>
    %655 = arith.mulf %653, %557 : vector<16x32xf32>
    %656 = arith.addf %654, %655 : vector<16x32xf32>
    %cst_222 = arith.constant -1.000000e+00 : f32
    %657 = vector.broadcast %cst_222 : f32 to vector<16x32xf32>
    %658 = arith.subf %436, %657 : vector<16x32xf32>
    %cst_223 = arith.constant 1.250000e+00 : f32
    %659 = vector.broadcast %cst_223 : f32 to vector<16x32xf32>
    %660 = arith.mulf %658, %659 : vector<16x32xf32>
    %cst_224 = arith.constant 2.000000e-01 : f32
    %661 = vector.broadcast %cst_224 : f32 to vector<16x32xf32>
    %662 = arith.subf %661, %436 : vector<16x32xf32>
    %cst_225 = arith.constant 1.250000e+00 : f32
    %663 = vector.broadcast %cst_225 : f32 to vector<16x32xf32>
    %664 = arith.mulf %662, %663 : vector<16x32xf32>
    %665 = arith.mulf %660, %557 : vector<16x32xf32>
    %666 = arith.mulf %664, %568 : vector<16x32xf32>
    %667 = arith.addf %665, %666 : vector<16x32xf32>
    %cst_226 = arith.constant -6.000000e-01 : f32
    %668 = vector.broadcast %cst_226 : f32 to vector<16x32xf32>
    %669 = arith.subf %436, %668 : vector<16x32xf32>
    %cst_227 = arith.constant 1.250000e+00 : f32
    %670 = vector.broadcast %cst_227 : f32 to vector<16x32xf32>
    %671 = arith.mulf %669, %670 : vector<16x32xf32>
    %cst_228 = arith.constant 6.000000e-01 : f32
    %672 = vector.broadcast %cst_228 : f32 to vector<16x32xf32>
    %673 = arith.subf %672, %436 : vector<16x32xf32>
    %cst_229 = arith.constant 1.250000e+00 : f32
    %674 = vector.broadcast %cst_229 : f32 to vector<16x32xf32>
    %675 = arith.mulf %673, %674 : vector<16x32xf32>
    %676 = arith.mulf %671, %568 : vector<16x32xf32>
    %677 = arith.mulf %675, %579 : vector<16x32xf32>
    %678 = arith.addf %676, %677 : vector<16x32xf32>
    %cst_230 = arith.constant -2.000000e-01 : f32
    %679 = vector.broadcast %cst_230 : f32 to vector<16x32xf32>
    %680 = arith.subf %436, %679 : vector<16x32xf32>
    %cst_231 = arith.constant 1.250000e+00 : f32
    %681 = vector.broadcast %cst_231 : f32 to vector<16x32xf32>
    %682 = arith.mulf %680, %681 : vector<16x32xf32>
    %cst_232 = arith.constant 1.000000e+00 : f32
    %683 = vector.broadcast %cst_232 : f32 to vector<16x32xf32>
    %684 = arith.subf %683, %436 : vector<16x32xf32>
    %cst_233 = arith.constant 1.250000e+00 : f32
    %685 = vector.broadcast %cst_233 : f32 to vector<16x32xf32>
    %686 = arith.mulf %684, %685 : vector<16x32xf32>
    %687 = arith.mulf %682, %579 : vector<16x32xf32>
    %688 = arith.mulf %686, %590 : vector<16x32xf32>
    %689 = arith.addf %687, %688 : vector<16x32xf32>
    %cst_234 = arith.constant 2.000000e-01 : f32
    %690 = vector.broadcast %cst_234 : f32 to vector<16x32xf32>
    %691 = arith.subf %436, %690 : vector<16x32xf32>
    %cst_235 = arith.constant 1.250000e+00 : f32
    %692 = vector.broadcast %cst_235 : f32 to vector<16x32xf32>
    %693 = arith.mulf %691, %692 : vector<16x32xf32>
    %cst_236 = arith.constant 1.400000e+00 : f32
    %694 = vector.broadcast %cst_236 : f32 to vector<16x32xf32>
    %695 = arith.subf %694, %436 : vector<16x32xf32>
    %cst_237 = arith.constant 1.250000e+00 : f32
    %696 = vector.broadcast %cst_237 : f32 to vector<16x32xf32>
    %697 = arith.mulf %695, %696 : vector<16x32xf32>
    %698 = arith.mulf %693, %590 : vector<16x32xf32>
    %699 = arith.mulf %697, %601 : vector<16x32xf32>
    %700 = arith.addf %698, %699 : vector<16x32xf32>
    %cst_238 = arith.constant 6.000000e-01 : f32
    %701 = vector.broadcast %cst_238 : f32 to vector<16x32xf32>
    %702 = arith.subf %436, %701 : vector<16x32xf32>
    %cst_239 = arith.constant 1.250000e+00 : f32
    %703 = vector.broadcast %cst_239 : f32 to vector<16x32xf32>
    %704 = arith.mulf %702, %703 : vector<16x32xf32>
    %cst_240 = arith.constant 1.800000e+00 : f32
    %705 = vector.broadcast %cst_240 : f32 to vector<16x32xf32>
    %706 = arith.subf %705, %436 : vector<16x32xf32>
    %cst_241 = arith.constant 1.250000e+00 : f32
    %707 = vector.broadcast %cst_241 : f32 to vector<16x32xf32>
    %708 = arith.mulf %706, %707 : vector<16x32xf32>
    %709 = arith.mulf %704, %601 : vector<16x32xf32>
    %710 = arith.mulf %708, %612 : vector<16x32xf32>
    %711 = arith.addf %709, %710 : vector<16x32xf32>
    %cst_242 = arith.constant 1.000000e+00 : f32
    %712 = vector.broadcast %cst_242 : f32 to vector<16x32xf32>
    %713 = arith.subf %436, %712 : vector<16x32xf32>
    %cst_243 = arith.constant 1.250000e+00 : f32
    %714 = vector.broadcast %cst_243 : f32 to vector<16x32xf32>
    %715 = arith.mulf %713, %714 : vector<16x32xf32>
    %cst_244 = arith.constant 2.200000e+00 : f32
    %716 = vector.broadcast %cst_244 : f32 to vector<16x32xf32>
    %717 = arith.subf %716, %436 : vector<16x32xf32>
    %cst_245 = arith.constant 1.250000e+00 : f32
    %718 = vector.broadcast %cst_245 : f32 to vector<16x32xf32>
    %719 = arith.mulf %717, %718 : vector<16x32xf32>
    %720 = arith.mulf %715, %612 : vector<16x32xf32>
    %721 = arith.mulf %719, %623 : vector<16x32xf32>
    %722 = arith.addf %720, %721 : vector<16x32xf32>
    %cst_246 = arith.constant -2.200000e+00 : f32
    %723 = vector.broadcast %cst_246 : f32 to vector<16x32xf32>
    %724 = arith.subf %436, %723 : vector<16x32xf32>
    %cst_247 = arith.constant 0.833333313 : f32
    %725 = vector.broadcast %cst_247 : f32 to vector<16x32xf32>
    %726 = arith.mulf %724, %725 : vector<16x32xf32>
    %cst_248 = arith.constant -6.000000e-01 : f32
    %727 = vector.broadcast %cst_248 : f32 to vector<16x32xf32>
    %728 = arith.subf %727, %436 : vector<16x32xf32>
    %cst_249 = arith.constant 0.833333313 : f32
    %729 = vector.broadcast %cst_249 : f32 to vector<16x32xf32>
    %730 = arith.mulf %728, %729 : vector<16x32xf32>
    %731 = arith.mulf %726, %634 : vector<16x32xf32>
    %732 = arith.mulf %730, %645 : vector<16x32xf32>
    %733 = arith.addf %731, %732 : vector<16x32xf32>
    %cst_250 = arith.constant -1.800000e+00 : f32
    %734 = vector.broadcast %cst_250 : f32 to vector<16x32xf32>
    %735 = arith.subf %436, %734 : vector<16x32xf32>
    %cst_251 = arith.constant 0.833333313 : f32
    %736 = vector.broadcast %cst_251 : f32 to vector<16x32xf32>
    %737 = arith.mulf %735, %736 : vector<16x32xf32>
    %cst_252 = arith.constant -2.000000e-01 : f32
    %738 = vector.broadcast %cst_252 : f32 to vector<16x32xf32>
    %739 = arith.subf %738, %436 : vector<16x32xf32>
    %cst_253 = arith.constant 0.833333313 : f32
    %740 = vector.broadcast %cst_253 : f32 to vector<16x32xf32>
    %741 = arith.mulf %739, %740 : vector<16x32xf32>
    %742 = arith.mulf %737, %645 : vector<16x32xf32>
    %743 = arith.mulf %741, %656 : vector<16x32xf32>
    %744 = arith.addf %742, %743 : vector<16x32xf32>
    %cst_254 = arith.constant -1.400000e+00 : f32
    %745 = vector.broadcast %cst_254 : f32 to vector<16x32xf32>
    %746 = arith.subf %436, %745 : vector<16x32xf32>
    %cst_255 = arith.constant 0.833333313 : f32
    %747 = vector.broadcast %cst_255 : f32 to vector<16x32xf32>
    %748 = arith.mulf %746, %747 : vector<16x32xf32>
    %cst_256 = arith.constant 2.000000e-01 : f32
    %749 = vector.broadcast %cst_256 : f32 to vector<16x32xf32>
    %750 = arith.subf %749, %436 : vector<16x32xf32>
    %cst_257 = arith.constant 0.833333313 : f32
    %751 = vector.broadcast %cst_257 : f32 to vector<16x32xf32>
    %752 = arith.mulf %750, %751 : vector<16x32xf32>
    %753 = arith.mulf %748, %656 : vector<16x32xf32>
    %754 = arith.mulf %752, %667 : vector<16x32xf32>
    %755 = arith.addf %753, %754 : vector<16x32xf32>
    %cst_258 = arith.constant -1.000000e+00 : f32
    %756 = vector.broadcast %cst_258 : f32 to vector<16x32xf32>
    %757 = arith.subf %436, %756 : vector<16x32xf32>
    %cst_259 = arith.constant 0.833333313 : f32
    %758 = vector.broadcast %cst_259 : f32 to vector<16x32xf32>
    %759 = arith.mulf %757, %758 : vector<16x32xf32>
    %cst_260 = arith.constant 6.000000e-01 : f32
    %760 = vector.broadcast %cst_260 : f32 to vector<16x32xf32>
    %761 = arith.subf %760, %436 : vector<16x32xf32>
    %cst_261 = arith.constant 0.833333313 : f32
    %762 = vector.broadcast %cst_261 : f32 to vector<16x32xf32>
    %763 = arith.mulf %761, %762 : vector<16x32xf32>
    %764 = arith.mulf %759, %667 : vector<16x32xf32>
    %765 = arith.mulf %763, %678 : vector<16x32xf32>
    %766 = arith.addf %764, %765 : vector<16x32xf32>
    %cst_262 = arith.constant -6.000000e-01 : f32
    %767 = vector.broadcast %cst_262 : f32 to vector<16x32xf32>
    %768 = arith.subf %436, %767 : vector<16x32xf32>
    %cst_263 = arith.constant 0.833333313 : f32
    %769 = vector.broadcast %cst_263 : f32 to vector<16x32xf32>
    %770 = arith.mulf %768, %769 : vector<16x32xf32>
    %cst_264 = arith.constant 1.000000e+00 : f32
    %771 = vector.broadcast %cst_264 : f32 to vector<16x32xf32>
    %772 = arith.subf %771, %436 : vector<16x32xf32>
    %cst_265 = arith.constant 0.833333313 : f32
    %773 = vector.broadcast %cst_265 : f32 to vector<16x32xf32>
    %774 = arith.mulf %772, %773 : vector<16x32xf32>
    %775 = arith.mulf %770, %678 : vector<16x32xf32>
    %776 = arith.mulf %774, %689 : vector<16x32xf32>
    %777 = arith.addf %775, %776 : vector<16x32xf32>
    %cst_266 = arith.constant -2.000000e-01 : f32
    %778 = vector.broadcast %cst_266 : f32 to vector<16x32xf32>
    %779 = arith.subf %436, %778 : vector<16x32xf32>
    %cst_267 = arith.constant 0.833333313 : f32
    %780 = vector.broadcast %cst_267 : f32 to vector<16x32xf32>
    %781 = arith.mulf %779, %780 : vector<16x32xf32>
    %cst_268 = arith.constant 1.400000e+00 : f32
    %782 = vector.broadcast %cst_268 : f32 to vector<16x32xf32>
    %783 = arith.subf %782, %436 : vector<16x32xf32>
    %cst_269 = arith.constant 0.833333313 : f32
    %784 = vector.broadcast %cst_269 : f32 to vector<16x32xf32>
    %785 = arith.mulf %783, %784 : vector<16x32xf32>
    %786 = arith.mulf %781, %689 : vector<16x32xf32>
    %787 = arith.mulf %785, %700 : vector<16x32xf32>
    %788 = arith.addf %786, %787 : vector<16x32xf32>
    %cst_270 = arith.constant 2.000000e-01 : f32
    %789 = vector.broadcast %cst_270 : f32 to vector<16x32xf32>
    %790 = arith.subf %436, %789 : vector<16x32xf32>
    %cst_271 = arith.constant 0.833333313 : f32
    %791 = vector.broadcast %cst_271 : f32 to vector<16x32xf32>
    %792 = arith.mulf %790, %791 : vector<16x32xf32>
    %cst_272 = arith.constant 1.800000e+00 : f32
    %793 = vector.broadcast %cst_272 : f32 to vector<16x32xf32>
    %794 = arith.subf %793, %436 : vector<16x32xf32>
    %cst_273 = arith.constant 0.833333313 : f32
    %795 = vector.broadcast %cst_273 : f32 to vector<16x32xf32>
    %796 = arith.mulf %794, %795 : vector<16x32xf32>
    %797 = arith.mulf %792, %700 : vector<16x32xf32>
    %798 = arith.mulf %796, %711 : vector<16x32xf32>
    %799 = arith.addf %797, %798 : vector<16x32xf32>
    %cst_274 = arith.constant 6.000000e-01 : f32
    %800 = vector.broadcast %cst_274 : f32 to vector<16x32xf32>
    %801 = arith.subf %436, %800 : vector<16x32xf32>
    %cst_275 = arith.constant 0.833333313 : f32
    %802 = vector.broadcast %cst_275 : f32 to vector<16x32xf32>
    %803 = arith.mulf %801, %802 : vector<16x32xf32>
    %cst_276 = arith.constant 2.200000e+00 : f32
    %804 = vector.broadcast %cst_276 : f32 to vector<16x32xf32>
    %805 = arith.subf %804, %436 : vector<16x32xf32>
    %cst_277 = arith.constant 0.833333313 : f32
    %806 = vector.broadcast %cst_277 : f32 to vector<16x32xf32>
    %807 = arith.mulf %805, %806 : vector<16x32xf32>
    %808 = arith.mulf %803, %711 : vector<16x32xf32>
    %809 = arith.mulf %807, %722 : vector<16x32xf32>
    %810 = arith.addf %808, %809 : vector<16x32xf32>
    %811 = arith.negf %436 : vector<16x32xf32>
    %812 = math.exp %811 : vector<16x32xf32>
    %cst_278 = arith.constant 1.000000e+00 : f32
    %813 = vector.broadcast %cst_278 : f32 to vector<16x32xf32>
    %814 = arith.addf %813, %812 : vector<16x32xf32>
    %815 = arith.divf %813, %814 : vector<16x32xf32>
    %816 = arith.mulf %436, %815 : vector<16x32xf32>
    %817 = tpu.concatenate %733, %744, %755, %766, %777, %788, %799, %810, %816 in 1 : vector<16x32xf32>, vector<16x32xf32>, vector<16x32xf32>, vector<16x32xf32>, vector<16x32xf32>, vector<16x32xf32>, vector<16x32xf32>, vector<16x32xf32>, vector<16x32xf32> -> vector<16x288xf32>
    %818 = arith.truncf %817 : vector<16x288xf32> to vector<16x288xbf16>
    %c720 = arith.constant 720 : index
    %c0_279 = arith.constant 0 : index
    %819 = vector.load %arg1[%c720, %c0_279] : memref<1008x128xbf16, #tpu.memory_space<vmem>>, vector<288x128xbf16>
    %cst_280 = arith.constant dense<0.000000e+00> : vector<16x128xf32>
    %820 = tpu.matmul %818, %819, %cst_280 {dimension_numbers = #tpu.dot_dimension_numbers<[1], [0], [0], [1], [0, 0, 1, 1], [], []>} : vector<16x288xbf16>, vector<288x128xbf16>, vector<16x128xf32> -> vector<16x128xf32>
    %821 = arith.negf %820 : vector<16x128xf32>
    %822 = math.exp %821 : vector<16x128xf32>
    %cst_281 = arith.constant 1.000000e+00 : f32
    %823 = vector.broadcast %cst_281 : f32 to vector<16x128xf32>
    %824 = arith.addf %823, %822 : vector<16x128xf32>
    %825 = arith.divf %823, %824 : vector<16x128xf32>
    %c0_282 = arith.constant 0 : index
    %c0_283 = arith.constant 0 : index
    %826 = vector.load %arg3[%c0_282, %c0_283] : memref<16x128xf32, #tpu.memory_space<vmem>>, vector<16x128xf32>
    tpu.vector_store %arg3[%c0_282, %c0_283], %825 {strides = array<i32>} : memref<16x128xf32, #tpu.memory_space<vmem>>, vector<16x128xf32>,
    return
  }
}

</mosaic_0001>

<bundles_post_ra>
// kernel: rnn_small_kan_forward.1
= control target key start
LH: loop header
LB: loop body
LE: loop exit
PB: predicated region body
PF: predicated region fallthrough
CT: control target
= control target key end

     0   :  { %8 = vsyncpa [#allocation3], 0  ;;  %s2654_s15 = smov [#allocation2]   ;;  %s2655_s17 = smov 64   ;;  %s3473_s0 = inlined_call_operand.vmem [shape: bf16[144,16], index: 0, kind: input, shape index: {}]   ;;  %s3474_s1 = inlined_call_operand.hbm [shape: bf16[1008,128], index: 1, kind: input, shape index: {}]   ;;  %s3475_s2 = inlined_call_operand.vmem [shape: f32[1,128], index: 2, kind: input, shape index: {}]   ;;  %s3476_s3 = inlined_call_operand.vmem [shape: f32[16,128], index: 3, kind: output, shape index: {}]  }
   0x1   :  { %s15_s14 = sshll.u32 %s3474_s1, 4  ;;  %s17_s16 = sshll.u32 %s2654_s15, 4  ;;  %s16_s14 = int_to_ptr.hbm [resolvable:$true] %s15_s14  ;;  %s18_s16 = int_to_ptr.vmem [resolvable:$true] %s17_s16 }
   0x2   :  { %s2656_s18 = smov 4  }
   0x3   :  { %23 = dma.hbm_to_vmem [thread:$0]  %s16_s14, 8064, %s18_s16, [#allocation3], %s2655_s17, %s2655_s17, %s2656_s18  }
   0x4   :  { %2652 = dma.done.wait [#allocation3], 8064  }
   0x5   :  { %2653 = vsyncadd [#allocation3], 4294959232  ;;  %v2434_v0 = vld [vmem:[#allocation2] sm:$0xff]  ;;  %vm106_vm0 = vcmask 130048   ;;  %v2691_v3 = vld [vmem:[#allocation2 + $0x38] sm:$0xff]  ;;  %vm206_vm1 = vcmask 523264  }
   0x6   :  { %v2685_v1 = vld [vmem:[#allocation2 + $0x40] sm:$0xff]  ;;  %141 = vmatpush.bf16.msra.mxu0 %v2434_v0  ;;  %v2697_v4 = vld [vmem:[#allocation2 + $0x30] sm:$0xff]  ;;  %v2704_v5 = vld [vmem:[#allocation2 + $0x28] sm:$0xff]  ;;  %s2659_s10 = smov 32  }
   0x7   :  { %v2435_v2 = vld [vmem:[%s3473_s0] sm:$0xff]  ;;  %258 = vmatpush.bf16.msra.mxu1 %v2685_v1  ;;  %277 = vmatpush.bf16.msra.mxu2 %v2685_v1  ;;  %v2714_v7 = vld [vmem:[#allocation2 + $0x18] sm:$0xff]  ;;  %v2436_v8 = vld [vmem:[%s3473_s0 + $0x8] sm:$0xff] }
   0x8   :  { %296 = vmatpush.bf16.msra.mxu3 %v2685_v1  ;;  %v2709_v6 = vld [vmem:[#allocation2 + $0x20] sm:$0xff]  ;;  %v2723_v9 = vld [vmem:[#allocation2 + $0x10] sm:$0xff]  ;;  %v2726_v10 = vld [vmem:[#allocation2 + $0x8] sm:$0xff] }
   0x9   :  { %2082 = vmatmul.msk.bf16.vlgmr.msra.gmra.mxu0 %vm106_vm0, %v2435_v2  ;;  %v2748_v12 = vld [vmem:[%s3475_s2] ss:$0 sm:$0xff]  ;;  %vm2123_vm2 = vmpackc.low %vm206_vm1, %vm206_vm1  ;;  %v2437_v19 = vld [vmem:[%s3473_s0 + $0x10] sm:$0xff] }
   0xa   :  { %v2438_v31 = vld [vmem:[%s3473_s0 + $0x18] sm:$0xff]  ;;  %v2439_v43 = vld [vmem:[%s3473_s0 + $0x20] sm:$0xff]  ;;  %v2440_v55 = vld [vmem:[%s3473_s0 + $0x28] sm:$0xff] }
   0xb   :  { %259 = vmatpush.bf16.msra.mxu1 %v2691_v3  ;;  %278 = vmatpush.bf16.msra.mxu2 %v2691_v3 }
   0xc   :  { %297 = vmatpush.bf16.msra.mxu3 %v2691_v3 }
   0xf   :  { %260 = vmatpush.bf16.msra.mxu1 %v2697_v4  ;;  %279 = vmatpush.bf16.msra.mxu2 %v2697_v4 }
  0x10   :  { %298 = vmatpush.bf16.msra.mxu3 %v2697_v4 }
  0x13   :  { %261 = vmatpush.bf16.msra.mxu1 %v2704_v5  ;;  %280 = vmatpush.bf16.msra.mxu2 %v2704_v5 }
  0x14   :  { %299 = vmatpush.bf16.msra.mxu3 %v2704_v5 }
  0x17   :  { %262 = vmatpush.bf16.msra.mxu1 %v2709_v6  ;;  %281 = vmatpush.bf16.msra.mxu2 %v2709_v6 }
  0x18   :  { %300 = vmatpush.bf16.msra.mxu3 %v2709_v6 }
  0x19   :  { %2083 = vmatmul.msk.bf16.gmra.mxu0 %vm106_vm0, %v2436_v8 }
  0x1b   :  { %263 = vmatpush.bf16.msra.mxu1 %v2714_v7  ;;  %282 = vmatpush.bf16.msra.mxu2 %v2714_v7 }
  0x1c   :  { %301 = vmatpush.bf16.msra.mxu3 %v2714_v7 }
  0x1f   :  { %264 = vmatpush.bf16.msra.mxu1 %v2723_v9  ;;  %283 = vmatpush.bf16.msra.mxu2 %v2723_v9 }
  0x20   :  { %302 = vmatpush.bf16.msra.mxu3 %v2723_v9 }
  0x23   :  { %265 = vmatpush.bf16.msra.mxu1 %v2726_v10  ;;  %284 = vmatpush.bf16.msra.mxu2 %v2726_v10 }
  0x24   :  { %303 = vmatpush.bf16.msra.mxu3 %v2726_v10 }
  0x27   :  { %315 = vmatpush.bf16.msrb.mxu1 %v2685_v1  ;;  %334 = vmatpush.bf16.msrb.mxu2 %v2685_v1 }
  0x28   :  { %353 = vmatpush.bf16.msrb.mxu3 %v2685_v1 }
  0x29   :  { %2084 = vmatmul.msk.bf16.gmra.mxu0 %vm106_vm0, %v2437_v19 }
  0x2b   :  { %316 = vmatpush.bf16.msrb.mxu1 %v2691_v3  ;;  %335 = vmatpush.bf16.msrb.mxu2 %v2691_v3 }
  0x2c   :  { %354 = vmatpush.bf16.msrb.mxu3 %v2691_v3 }
  0x2f   :  { %317 = vmatpush.bf16.msrb.mxu1 %v2697_v4  ;;  %336 = vmatpush.bf16.msrb.mxu2 %v2697_v4 }
  0x30   :  { %355 = vmatpush.bf16.msrb.mxu3 %v2697_v4 }
  0x33   :  { %318 = vmatpush.bf16.msrb.mxu1 %v2704_v5  ;;  %337 = vmatpush.bf16.msrb.mxu2 %v2704_v5 }
  0x34   :  { %356 = vmatpush.bf16.msrb.mxu3 %v2704_v5 }
  0x37   :  { %319 = vmatpush.bf16.msrb.mxu1 %v2709_v6  ;;  %338 = vmatpush.bf16.msrb.mxu2 %v2709_v6 }
  0x38   :  { %357 = vmatpush.bf16.msrb.mxu3 %v2709_v6 }
  0x39   :  { %2085 = vmatmul.msk.bf16.gmra.mxu0 %vm106_vm0, %v2438_v31 }
  0x3b   :  { %320 = vmatpush.bf16.msrb.mxu1 %v2714_v7  ;;  %339 = vmatpush.bf16.msrb.mxu2 %v2714_v7 }
  0x3c   :  { %358 = vmatpush.bf16.msrb.mxu3 %v2714_v7 }
  0x3f   :  { %321 = vmatpush.bf16.msrb.mxu1 %v2723_v9  ;;  %340 = vmatpush.bf16.msrb.mxu2 %v2723_v9 }
  0x40   :  { %359 = vmatpush.bf16.msrb.mxu3 %v2723_v9 }
  0x43   :  { %322 = vmatpush.bf16.msrb.mxu1 %v2726_v10  ;;  %341 = vmatpush.bf16.msrb.mxu2 %v2726_v10 }
  0x44   :  { %360 = vmatpush.bf16.msrb.mxu3 %v2726_v10 }
  0x49   :  { %2086 = vmatmul.msk.bf16.gmra.mxu0 %vm106_vm0, %v2439_v43 }
  0x59   :  { %2087 = vmatmul.msk.bf16.gmra.mxu0 %vm106_vm0, %v2440_v55 }
  0x86   :  { %v143_v11 = vpop.f32.mrf.mxu0 }
  0x87   :  { %v144_v13 = vadd.f32 %v2748_v12, %v143_v11 }
  0x89   :  { %2568 = vtanh.f32 %v144_v13 }
  0x8e   :  { %v145_v14 = vpop.f32.mrf.mxu0 }
  0x8f   :  { %v146_v15 = vadd.f32 %v2748_v12, %v145_v14  ;;  %v2569_v16 = vpop.eup %2568 }
  0x91   :  { %2570 = vtanh.f32 %v146_v15 }
  0x96   :  { %v148_v20 = vpop.f32.mrf.mxu0 }
  0x97   :  { %v2571_v17 = vpop.eup %2570  ;;  %v149_v22 = vadd.f32 %v2748_v12, %v148_v20 }
  0x98   :  { %v2124_v18 = vpack.c.bf16 %v2571_v17, %v2569_v16  ;;  %v2442_v16 = vld [vmem:[%s3473_s0 + $0x38] sm:$0xff] }
  0x9a   :  { %2125 = vmatmul.msk.bf16.vlgmr.msra.gmra.mxu1 %vm2123_vm2, %v2124_v18 }
  0x9b   :  { %372 = vmatpush.bf16.msra.mxu1 %v2685_v1 }
  0x9e   :  { %v150_v23 = vpop.f32.mrf.mxu0 }
  0x9f   :  { %373 = vmatpush.bf16.msra.mxu1 %v2691_v3  ;;  %v151_v25 = vadd.f32 %v2748_v12, %v150_v23 }
  0xa3   :  { %374 = vmatpush.bf16.msra.mxu1 %v2697_v4 }
  0xa6   :  { %v153_v32 = vpop.f32.mrf.mxu0 }
  0xa7   :  { %375 = vmatpush.bf16.msra.mxu1 %v2704_v5  ;;  %v154_v34 = vadd.f32 %v2748_v12, %v153_v32 }
  0xab   :  { %376 = vmatpush.bf16.msra.mxu1 %v2709_v6 }
  0xae   :  { %v155_v35 = vpop.f32.mrf.mxu0 }
  0xaf   :  { %377 = vmatpush.bf16.msra.mxu1 %v2714_v7  ;;  %v156_v37 = vadd.f32 %v2748_v12, %v155_v35 }
  0xb3   :  { %378 = vmatpush.bf16.msra.mxu1 %v2723_v9 }
  0xb6   :  { %v158_v44 = vpop.f32.mrf.mxu0 }
  0xb7   :  { %379 = vmatpush.bf16.msra.mxu1 %v2726_v10  ;;  %v159_v46 = vadd.f32 %v2748_v12, %v158_v44 }
  0xbe   :  { %v160_v47 = vpop.f32.mrf.mxu0 }
  0xbf   :  { %v161_v49 = vadd.f32 %v2748_v12, %v160_v47 }
  0xc6   :  { %v163_v56 = vpop.f32.mrf.mxu0 }
  0xc7   :  { %v164_v58 = vadd.f32 %v2748_v12, %v163_v56 }
  0xce   :  { %v165_v59 = vpop.f32.mrf.mxu0 }
  0xcf   :  { %v166_v61 = vadd.f32 %v2748_v12, %v165_v59 }
 0x117   :  { %v267_v21 = vpop.f32.mrf.mxu1 }
 0x118   :  { %v272_v24 = vadd.f32 %v267_v21, %v149_v22 }
 0x11a   :  { %2572 = vtanh.f32 %v272_v24 }
 0x11f   :  { %v269_v26 = vpop.f32.mrf.mxu1 }
 0x120   :  { %v273_v27 = vadd.f32 %v269_v26, %v151_v25  ;;  %v2573_v28 = vpop.eup %2572 }
 0x122   :  { %2574 = vtanh.f32 %v273_v27 }
 0x128   :  { %v2575_v29 = vpop.eup %2574 }
 0x129   :  { %v276_v30 = vpack.c.bf16 %v2575_v29, %v2573_v28  ;;  %v2443_v28 = vld [vmem:[%s3473_s0 + $0x40] sm:$0xff] }
 0x12b   :  { %285 = vmatmul.bf16.vlgmr.msra.gmra.mxu2 %v276_v30 }
 0x12c   :  { %391 = vmatpush.bf16.msra.mxu2 %v2685_v1 }
 0x130   :  { %392 = vmatpush.bf16.msra.mxu2 %v2691_v3  ;;  %v2441_v3 = vld [vmem:[%s3473_s0 + $0x30] sm:$0xff]  ;;  %s2658_s0 = smov 96  }
 0x131   :  { %2088 = vmatmul.msk.bf16.gmra.mxu0 %vm106_vm0, %v2441_v3 }
 0x134   :  { %393 = vmatpush.bf16.msra.mxu2 %v2697_v4  ;;  %v168_v4 = vpop.f32.mrf.mxu0 }
 0x138   :  { %394 = vmatpush.bf16.msra.mxu2 %v2704_v5 }
 0x13c   :  { %395 = vmatpush.bf16.msra.mxu2 %v2709_v6  ;;  %v169_v6 = vadd.f32 %v2748_v12, %v168_v4 }
 0x140   :  { %396 = vmatpush.bf16.msra.mxu2 %v2714_v7  ;;  %v170_v7 = vpop.f32.mrf.mxu0 }
 0x141   :  { %2089 = vmatmul.msk.bf16.gmra.mxu0 %vm106_vm0, %v2442_v16 }
 0x144   :  { %397 = vmatpush.bf16.msra.mxu2 %v2723_v9  ;;  %v171_v9 = vadd.f32 %v2748_v12, %v170_v7 }
 0x148   :  { %398 = vmatpush.bf16.msra.mxu2 %v2726_v10 }
 0x151   :  { %2090 = vmatmul.msk.bf16.gmra.mxu0 %vm106_vm0, %v2443_v28 }
 0x1ae   :  { %v286_v33 = vpop.f32.mrf.mxu2  ;;  %v173_v17 = vpop.f32.mrf.mxu0 }
 0x1af   :  { %v291_v36 = vadd.f32 %v286_v33, %v154_v34  ;;  %v174_v19 = vadd.f32 %v2748_v12, %v173_v17 }
 0x1b1   :  { %2576 = vtanh.f32 %v291_v36 }
 0x1b6   :  { %v288_v38 = vpop.f32.mrf.mxu2  ;;  %v175_v20 = vpop.f32.mrf.mxu0 }
 0x1b7   :  { %v292_v39 = vadd.f32 %v288_v38, %v156_v37  ;;  %v2577_v40 = vpop.eup %2576  ;;  %v176_v22 = vadd.f32 %v2748_v12, %v175_v20 }
 0x1b9   :  { %2578 = vtanh.f32 %v292_v39 }
 0x1be   :  { %v178_v29 = vpop.f32.mrf.mxu0 }
 0x1bf   :  { %v2579_v41 = vpop.eup %2578  ;;  %v179_v31 = vadd.f32 %v2748_v12, %v178_v29 }
 0x1c0   :  { %v295_v42 = vpack.c.bf16 %v2579_v41, %v2577_v40 }
 0x1c2   :  { %304 = vmatmul.bf16.vlgmr.msra.gmra.mxu3 %v295_v42 }
 0x1c6   :  { %v180_v32 = vpop.f32.mrf.mxu0 }
 0x1c7   :  { %v181_v34 = vadd.f32 %v2748_v12, %v180_v32 }
 0x1ce   :  { %v183_v40 = vpop.f32.mrf.mxu0 }
 0x1cf   :  { %v184_v41 = vadd.f32 %v2748_v12, %v183_v40 }
 0x1d6   :  { %v185_v44 = vpop.f32.mrf.mxu0 }
 0x245   :  { %v305_v45 = vpop.f32.mrf.mxu3 }
 0x246   :  { %v310_v48 = vadd.f32 %v305_v45, %v159_v46  ;;  %v186_v45 = vadd.f32 %v2748_v12, %v185_v44 }
 0x248   :  { %2580 = vtanh.f32 %v310_v48 }
 0x24d   :  { %v307_v50 = vpop.f32.mrf.mxu3 }
 0x24e   :  { %v311_v51 = vadd.f32 %v307_v50, %v161_v49  ;;  %v2581_v52 = vpop.eup %2580  ;;  %v2657_v49 = vmov 0.0  }
 0x250   :  { %2582 = vtanh.f32 %v311_v51 }
 0x256   :  { %v2583_v53 = vpop.eup %2582 }
 0x257   :  { %v314_v54 = vpack.c.bf16 %v2583_v53, %v2581_v52 }
 0x259   :  { %323 = vmatmul.bf16.vlgmr.msrb.gmra.mxu1 %v314_v54 }
 0x2d6   :  { %v324_v57 = vpop.f32.mrf.mxu1 }
 0x2d7   :  { %v329_v60 = vadd.f32 %v324_v57, %v164_v58 }
 0x2d9   :  { %2584 = vtanh.f32 %v329_v60 }
 0x2de   :  { %v326_v62 = vpop.f32.mrf.mxu1 }
 0x2df   :  { %v330_v63 = vadd.f32 %v326_v62, %v166_v61  ;;  %v2585_v0 = vpop.eup %2584 }
 0x2e1   :  { %2586 = vtanh.f32 %v330_v63 }
 0x2e7   :  { %v2587_v1 = vpop.eup %2586 }
 0x2e8   :  { %v333_v2 = vpack.c.bf16 %v2587_v1, %v2585_v0 }
 0x2ea   :  { %342 = vmatmul.bf16.vlgmr.msrb.gmra.mxu2 %v333_v2 }
 0x36d   :  { %v343_v5 = vpop.f32.mrf.mxu2 }
 0x36e   :  { %v348_v8 = vadd.f32 %v343_v5, %v169_v6 }
 0x370   :  { %2588 = vtanh.f32 %v348_v8 }
 0x375   :  { %v345_v10 = vpop.f32.mrf.mxu2 }
 0x376   :  { %v349_v11 = vadd.f32 %v345_v10, %v171_v9  ;;  %v2589_v13 = vpop.eup %2588 }
 0x378   :  { %2590 = vtanh.f32 %v349_v11 }
 0x37e   :  { %v2591_v14 = vpop.eup %2590 }
 0x37f   :  { %v352_v15 = vpack.c.bf16 %v2591_v14, %v2589_v13 }
 0x381   :  { %361 = vmatmul.bf16.vlgmr.msrb.gmra.mxu3 %v352_v15 }
 0x404   :  { %v362_v18 = vpop.f32.mrf.mxu3 }
 0x405   :  { %v367_v21 = vadd.f32 %v362_v18, %v174_v19 }
 0x407   :  { %2592 = vtanh.f32 %v367_v21 }
 0x40c   :  { %v364_v23 = vpop.f32.mrf.mxu3 }
 0x40d   :  { %v368_v24 = vadd.f32 %v364_v23, %v176_v22  ;;  %v2593_v25 = vpop.eup %2592 }
 0x40f   :  { %2594 = vtanh.f32 %v368_v24 }
 0x415   :  { %v2595_v26 = vpop.eup %2594 }
 0x416   :  { %v371_v27 = vpack.c.bf16 %v2595_v26, %v2593_v25 }
 0x418   :  { %380 = vmatmul.bf16.vlgmr.msra.gmra.mxu1 %v371_v27 }
 0x495   :  { %v381_v30 = vpop.f32.mrf.mxu1 }
 0x496   :  { %v386_v33 = vadd.f32 %v381_v30, %v179_v31 }
 0x498   :  { %2596 = vtanh.f32 %v386_v33 }
 0x49d   :  { %v383_v35 = vpop.f32.mrf.mxu1 }
 0x49e   :  { %v387_v36 = vadd.f32 %v383_v35, %v181_v34  ;;  %v2597_v37 = vpop.eup %2596 }
 0x4a0   :  { %2598 = vtanh.f32 %v387_v36 }
 0x4a6   :  { %v2599_v38 = vpop.eup %2598 }
 0x4a7   :  { %v390_v39 = vpack.c.bf16 %v2599_v38, %v2597_v37 }
 0x4a9   :  { %399 = vmatmul.bf16.vlgmr.msra.gmra.mxu2 %v390_v39 }
 0x52c   :  { %v400_v42 = vpop.f32.mrf.mxu2 }
 0x52d   :  { %v405_v43 = vadd.f32 %v400_v42, %v184_v41 }
 0x52f   :  { %2600 = vtanh.f32 %v405_v43 }
 0x534   :  { %v402_v46 = vpop.f32.mrf.mxu2 }
 0x535   :  { %v2826_v47 = vpop.eup %2600  ;;  %v406_v48 = vadd.f32 %v402_v46, %v186_v45 }
 0x536   :  { %vm449_vm3 = vcmp.ge.f32.partialorder %v2826_v47, -0.6  ;;  %vm451_vm4 = vcmp.lt.f32.partialorder %v2826_v47, -0.2  ;;  %vm459_vm5 = vcmp.ge.f32.partialorder %v2826_v47, -0.2 }
 0x537   :  { %2602 = vtanh.f32 %v406_v48  ;;  %vm453_vm6 = vmand %vm449_vm3, %vm451_vm4  ;;  %vm461_vm7 = vcmp.lt.f32.partialorder %v2826_v47, 0.2  ;;  %vm469_vm8 = vcmp.ge.f32.partialorder %v2826_v47, 0.2  ;;  %vm471_vm9 = vcmp.lt.f32.partialorder %v2826_v47, 0.6 }
 0x538   :  { %v2835_v12 = vsel %vm453_vm6, 1.0, %v2657_v49  ;;  %vm463_vm10 = vmand %vm459_vm5, %vm461_vm7  ;;  %vm479_vm11 = vcmp.ge.f32.partialorder %v2826_v47, 0.6  ;;  %vm481_vm12 = vcmp.lt.f32.partialorder %v2826_v47, 1.0  ;;  %v2840_v50 = vadd.f32 0.6, %v2826_v47 }
 0x539   :  { %v2136_v51 = vsel %vm463_vm10, 1.0, %v2657_v49  ;;  %vm473_vm13 = vmand %vm469_vm8, %vm471_vm9  ;;  %v2844_v52 = vsub.f32 0.2, %v2826_v47  ;;  %v2847_v53 = vadd.f32 0.2, %v2826_v47  ;;  %v2850_v54 = vsub.f32 1.0, %v2826_v47 }
 0x53a   :  { %v2138_v55 = vsel %vm473_vm13, 1.0, %v2657_v49  ;;  %vm483_vm14 = vmand %vm479_vm11, %vm481_vm12  ;;  %v577_v56 = vmul.f32 2.5, %v2840_v50  ;;  %v2855_v57 = vsub.f32 0.6, %v2826_v47  ;;  %v2858_v58 = vadd.f32 -0.2, %v2826_v47 }
 0x53b   :  { %v2861_v59 = vsel %vm483_vm14, 1.0, %v2657_v49  ;;  %v581_v60 = vmul.f32 2.5, %v2844_v52  ;;  %v591_v61 = vmul.f32 2.5, %v2847_v53  ;;  %v609_v62 = vmul.f32 2.5, %v2850_v54 }
 0x53c   :  { %v583_v63 = vmul.f32 %v2835_v12, %v577_v56  ;;  %v595_v0 = vmul.f32 2.5, %v2855_v57  ;;  %v605_v1 = vmul.f32 2.5, %v2858_v58  ;;  %v699_v2 = vmul.f32 1.25, %v2840_v50 }
 0x53d   :  { %v2870_v3 = vpop.eup %2602  ;;  %v585_v4 = vmul.f32 %v2136_v51, %v581_v60  ;;  %v597_v5 = vmul.f32 %v2136_v51, %v591_v61  ;;  %v613_v6 = vmul.f32 %v2861_v59, %v609_v62  ;;  %v701_v7 = vmul.f32 1.25, %v2855_v57 }
 0x53e   :  { %vm450_vm15 = vcmp.ge.f32.partialorder %v2870_v3, -0.6  ;;  %vm452_vm0 = vcmp.lt.f32.partialorder %v2870_v3, -0.2  ;;  %vm460_vm2 = vcmp.ge.f32.partialorder %v2870_v3, -0.2  ;;  %v599_v8 = vmul.f32 %v2138_v55, %v595_v0 }
 0x53f   :  { %vm454_vm3 = vmand %vm450_vm15, %vm452_vm0  ;;  %vm462_vm4 = vcmp.lt.f32.partialorder %v2870_v3, 0.2  ;;  %vm470_vm5 = vcmp.ge.f32.partialorder %v2870_v3, 0.2  ;;  %vm472_vm6 = vcmp.lt.f32.partialorder %v2870_v3, 0.6  ;;  %v2880_v9 = vadd.f32 %v585_v4, %v583_v63 }
 0x540   :  { %v2883_v10 = vsel %vm454_vm3, 1.0, %v2657_v49  ;;  %vm464_vm7 = vmand %vm460_vm2, %vm462_vm4  ;;  %vm480_vm8 = vcmp.ge.f32.partialorder %v2870_v3, 0.6  ;;  %vm482_vm9 = vcmp.lt.f32.partialorder %v2870_v3, 1.0  ;;  %v2157_v11 = vadd.f32 0.6, %v2870_v3 }
 0x541   :  { %v2137_v13 = vsel %vm464_vm7, 1.0, %v2657_v49  ;;  %vm474_vm10 = vmand %vm470_vm5, %vm472_vm6  ;;  %v2890_v14 = vsub.f32 0.2, %v2870_v3  ;;  %v2159_v15 = vadd.f32 0.2, %v2870_v3  ;;  %v601_v16 = vadd.f32 %v599_v8, %v597_v5 }
 0x542   :  { %v2139_v17 = vsel %vm474_vm10, 1.0, %v2657_v49  ;;  %vm484_vm11 = vmand %vm480_vm8, %vm482_vm9  ;;  %v578_v18 = vmul.f32 2.5, %v2157_v11  ;;  %v594_v19 = vsub.f32 0.6, %v2870_v3  ;;  %v2896_v20 = vadd.f32 -0.2, %v2870_v3 }
 0x543   :  { %v2899_v21 = vsel %vm484_vm11, 1.0, %v2657_v49  ;;  %v582_v22 = vmul.f32 2.5, %v2890_v14  ;;  %v592_v23 = vmul.f32 2.5, %v2159_v15  ;;  %v608_v24 = vsub.f32 1.0, %v2870_v3 }
 0x544   :  { %v584_v25 = vmul.f32 %v2883_v10, %v578_v18  ;;  %v596_v26 = vmul.f32 2.5, %v594_v19  ;;  %v606_v27 = vmul.f32 2.5, %v2896_v20  ;;  %v611_v28 = vmul.f32 %v2138_v55, %v605_v1 }
 0x545   :  { %v586_v29 = vmul.f32 %v2137_v13, %v582_v22  ;;  %v598_v30 = vmul.f32 %v2137_v13, %v592_v23  ;;  %v610_v31 = vmul.f32 2.5, %v608_v24  ;;  %v700_v32 = vmul.f32 1.25, %v2157_v11 }
 0x546   :  { %v600_v33 = vmul.f32 %v2139_v17, %v596_v26  ;;  %v612_v34 = vmul.f32 %v2139_v17, %v606_v27  ;;  %v2905_v35 = vadd.f32 %v613_v6, %v611_v28  ;;  %v702_v36 = vmul.f32 1.25, %v594_v19 }
 0x547   :  { %v2907_v37 = vadd.f32 %v586_v29, %v584_v25  ;;  %v614_v38 = vmul.f32 %v2899_v21, %v610_v31  ;;  %v703_v39 = vmul.f32 %v699_v2, %v2880_v9  ;;  %v705_v40 = vmul.f32 %v701_v7, %v601_v16 }
 0x548   :  { %v602_v41 = vadd.f32 %v600_v33, %v598_v30  ;;  %v709_v42 = vmul.f32 1.25, %v2847_v53  ;;  %v710_v43 = vmul.f32 1.25, %v2159_v15  ;;  %v711_v44 = vmul.f32 1.25, %v2850_v54 }
 0x549   :  { %v2913_v45 = vadd.f32 %v614_v38, %v612_v34  ;;  %v704_v46 = vmul.f32 %v700_v32, %v2907_v37  ;;  %v707_v48 = vadd.f32 %v705_v40, %v703_v39  ;;  %v712_v51 = vmul.f32 1.25, %v608_v24 }
 0x54a   :  { %v706_v55 = vmul.f32 %v702_v36, %v602_v41  ;;  %v713_v56 = vmul.f32 %v709_v42, %v601_v16  ;;  %v714_v60 = vmul.f32 %v710_v43, %v602_v41  ;;  %v715_v61 = vmul.f32 %v711_v44, %v2905_v35 }
 0x54b   :  { %v716_v62 = vmul.f32 %v712_v51, %v2913_v45  ;;  %v781_v63 = vmul.f32 0.8333333, %v2855_v57  ;;  %v782_v0 = vmul.f32 0.8333333, %v594_v19  ;;  %v789_v1 = vmul.f32 0.8333333, %v2840_v50 }
 0x54c   :  { %v708_v2 = vadd.f32 %v706_v55, %v704_v46  ;;  %v717_v4 = vadd.f32 %v715_v61, %v713_v56  ;;  %v790_v5 = vmul.f32 0.8333333, %v2157_v11  ;;  %v791_v6 = vmul.f32 0.8333333, %v2850_v54 }
 0x54d   :  { %v718_v7 = vadd.f32 %v716_v62, %v714_v60  ;;  %v2921_v8 = vmul.f32 %v781_v63, %v707_v48  ;;  %v792_v13 = vmul.f32 0.8333333, %v608_v24  ;;  %v793_v16 = vmul.f32 %v789_v1, %v707_v48 }
 0x54e   :  { %v794_v17 = vmul.f32 %v790_v5, %v708_v2  ;;  %v795_v18 = vmul.f32 %v791_v6, %v717_v4  ;;  %v799_v22 = vmul.f32 0.8333333, %v2847_v53  ;;  %v800_v23 = vmul.f32 0.8333333, %v2159_v15 }
 0x54f   :  { %v796_v25 = vmul.f32 %v792_v13, %v718_v7  ;;  %v2924_v57 = vmul.f32 %v782_v0, %v708_v2  ;;  %vm409_vm12 = vcmp.ge.f32.partialorder %v2826_v47, -2.2  ;;  %vm410_vm13 = vcmp.ge.f32.partialorder %v2870_v3, -2.2 }
 0x550   :  { %v797_v50 = vadd.f32 %v795_v18, %v793_v16  ;;  %v2928_v11 = vmul.f32 %v799_v22, %v717_v4  ;;  %v2930_v54 = vmul.f32 %v800_v23, %v718_v7  ;;  %vm411_vm14 = vcmp.lt.f32.partialorder %v2826_v47, -1.8 }
 0x551   :  { %v798_v19 = vadd.f32 %v796_v25, %v794_v17  ;;  %vm412_vm15 = vcmp.lt.f32.partialorder %v2870_v3, -1.8  ;;  %vm413_vm0 = vmand %vm409_vm12, %vm411_vm14  ;;  %vm419_vm2 = vcmp.ge.f32.partialorder %v2826_v47, -1.8  ;;  %vm420_vm3 = vcmp.ge.f32.partialorder %v2870_v3, -1.8 }
 0x552   :  { %vm414_vm4 = vmand %vm410_vm13, %vm412_vm15  ;;  %v2126_v53 = vsel %vm413_vm0, 1.0, %v2657_v49  ;;  %vm421_vm5 = vcmp.lt.f32.partialorder %v2826_v47, -1.4  ;;  %vm422_vm6 = vcmp.lt.f32.partialorder %v2870_v3, -1.4  ;;  %vm431_vm7 = vcmp.lt.f32.partialorder %v2826_v47, -1.0 }
 0x553   :  { %v2522_v15 = vpack.i.bf16 %v798_v19, %v797_v50  ;;  %v2127_v24 = vsel %vm414_vm4, 1.0, %v2657_v49  ;;  %vm423_vm8 = vmand %vm419_vm2, %vm421_vm5  ;;  %vm429_vm9 = vcmp.ge.f32.partialorder %v2826_v47, -1.4  ;;  %vm430_vm10 = vcmp.ge.f32.partialorder %v2870_v3, -1.4 }
 0x554   :  { %vm424_vm11 = vmand %vm420_vm3, %vm422_vm6  ;;  %v2128_v26 = vsel %vm423_vm8, 1.0, %v2657_v49  ;;  %vm432_vm12 = vcmp.lt.f32.partialorder %v2870_v3, -1.0  ;;  %vm439_vm13 = vcmp.ge.f32.partialorder %v2826_v47, -1.0  ;;  %vm440_vm14 = vcmp.ge.f32.partialorder %v2870_v3, -1.0 }
 0x555   :  { %2523 = vrot.lane.b32.xlu1 %v2522_v15, %s2655_s17  ;;  %v2129_v27 = vsel %vm424_vm11, 1.0, %v2657_v49  ;;  %vm433_vm15 = vmand %vm429_vm9, %vm431_vm7  ;;  %vm441_vm0 = vcmp.lt.f32.partialorder %v2826_v47, -0.6  ;;  %vm442_vm2 = vcmp.lt.f32.partialorder %v2870_v3, -0.6  ;;  %v537_v28 = vsub.f32 -1.0, %v2826_v47 }
 0x556   :  { %vm434_vm3 = vmand %vm430_vm10, %vm432_vm12  ;;  %v2130_v29 = vsel %vm433_vm15, 1.0, %v2657_v49  ;;  %v2954_v30 = vadd.f32 2.2, %v2826_v47  ;;  %v2149_v31 = vadd.f32 2.2, %v2870_v3  ;;  %v538_v32 = vsub.f32 -1.0, %v2870_v3 }
 0x557   :  { %v2131_v33 = vsel %vm434_vm3, 1.0, %v2657_v49  ;;  %vm443_vm4 = vmand %vm439_vm13, %vm441_vm0  ;;  %v523_v34 = vsub.f32 -1.4, %v2826_v47  ;;  %v524_v36 = vsub.f32 -1.4, %v2870_v3  ;;  %v539_v38 = vmul.f32 2.5, %v537_v28 }
 0x558   :  { %vm444_vm5 = vmand %vm440_vm14, %vm442_vm2  ;;  %v2964_v39 = vsel %vm443_vm4, 1.0, %v2657_v49  ;;  %v521_v40 = vmul.f32 2.5, %v2954_v30  ;;  %v522_v41 = vmul.f32 2.5, %v2149_v31  ;;  %v2150_v42 = vadd.f32 1.8, %v2826_v47 }
 0x559   :  { %v2969_v43 = vsel %vm444_vm5, 1.0, %v2657_v49  ;;  %v525_v44 = vmul.f32 2.5, %v523_v34  ;;  %v526_v46 = vmul.f32 2.5, %v524_v36  ;;  %v2151_v48 = vadd.f32 1.8, %v2870_v3 }
 0x55a   :  { %v527_v51 = vmul.f32 %v2126_v53, %v521_v40  ;;  %v528_v55 = vmul.f32 %v2127_v24, %v522_v41  ;;  %v535_v56 = vmul.f32 2.5, %v2150_v42  ;;  %v540_v60 = vmul.f32 2.5, %v538_v32 }
 0x55b   :  { %v529_v61 = vmul.f32 %v2128_v26, %v525_v44  ;;  %v530_v62 = vmul.f32 %v2129_v27, %v526_v46  ;;  %v536_v63 = vmul.f32 2.5, %v2151_v48  ;;  %v543_v0 = vmul.f32 %v2130_v29, %v539_v38 }
 0x55c   :  { %v541_v1 = vmul.f32 %v2128_v26, %v535_v56  ;;  %v544_v2 = vmul.f32 %v2131_v33, %v540_v60  ;;  %v2973_v4 = vadd.f32 1.4, %v2826_v47  ;;  %v2976_v5 = vadd.f32 1.4, %v2870_v3 }
 0x55d   :  { %v531_v6 = vadd.f32 %v529_v61, %v527_v51  ;;  %v532_v7 = vadd.f32 %v530_v62, %v528_v55  ;;  %v542_v13 = vmul.f32 %v2129_v27, %v536_v63  ;;  %v551_v16 = vsub.f32 -0.6, %v2826_v47 }
 0x55e   :  { %v545_v17 = vadd.f32 %v543_v0, %v541_v1  ;;  %v549_v18 = vmul.f32 2.5, %v2973_v4  ;;  %v550_v22 = vmul.f32 2.5, %v2976_v5  ;;  %v552_v23 = vsub.f32 -0.6, %v2870_v3 }
 0x55f   :  { %v546_v25 = vadd.f32 %v544_v2, %v542_v13  ;;  %v553_v50 = vmul.f32 2.5, %v551_v16  ;;  %v659_v19 = vmul.f32 1.25, %v2954_v30  ;;  %v660_v53 = vmul.f32 1.25, %v2149_v31 }
 0x560   :  { %v554_v15 = vmul.f32 2.5, %v552_v23  ;;  %v555_v24 = vmul.f32 %v2130_v29, %v549_v18  ;;  %v556_v26 = vmul.f32 %v2131_v33, %v550_v22  ;;  %v661_v34 = vmul.f32 1.25, %v537_v28 }
 0x561   :  { %v557_v27 = vmul.f32 %v2964_v39, %v553_v50  ;;  %v662_v36 = vmul.f32 1.25, %v538_v32  ;;  %v663_v38 = vmul.f32 %v659_v19, %v531_v6  ;;  %v664_v40 = vmul.f32 %v660_v53, %v532_v7 }
 0x562   :  { %v558_v41 = vmul.f32 %v2969_v43, %v554_v15  ;;  %v665_v44 = vmul.f32 %v661_v34, %v545_v17  ;;  %v669_v46 = vmul.f32 1.25, %v2150_v42  ;;  %v670_v51 = vmul.f32 1.25, %v2151_v48 }
 0x563   :  { %v2985_v55 = vadd.f32 %v557_v27, %v555_v24  ;;  %v666_v56 = vmul.f32 %v662_v36, %v546_v25  ;;  %v671_v60 = vmul.f32 1.25, %v551_v16  ;;  %v672_v61 = vmul.f32 1.25, %v552_v23 }
 0x564   :  { %v2987_v62 = vadd.f32 %v558_v41, %v556_v26  ;;  %v667_v29 = vadd.f32 %v665_v44, %v663_v38  ;;  %v673_v33 = vmul.f32 %v669_v46, %v545_v17  ;;  %v674_v28 = vmul.f32 %v670_v51, %v546_v25 }
 0x565   :  { %v668_v63 = vadd.f32 %v666_v56, %v664_v40  ;;  %v675_v32 = vmul.f32 %v671_v60, %v2985_v55  ;;  %v749_v0 = vmul.f32 0.8333333, %v2954_v30  ;;  %v750_v1 = vmul.f32 0.8333333, %v2149_v31 }
 0x566   :  { %v676_v2 = vmul.f32 %v672_v61, %v2987_v62  ;;  %v751_v6 = vmul.f32 0.8333333, %v551_v16  ;;  %v752_v7 = vmul.f32 0.8333333, %v552_v23  ;;  %v759_v13 = vmul.f32 0.8333333, %v2150_v42 }
 0x567   :  { %v677_v18 = vadd.f32 %v675_v32, %v673_v33  ;;  %v753_v22 = vmul.f32 %v749_v0, %v667_v29  ;;  %v754_v50 = vmul.f32 %v750_v1, %v668_v63  ;;  %v760_v19 = vmul.f32 0.8333333, %v2151_v48 }
 0x568   :  { %v678_v53 = vadd.f32 %v676_v2, %v674_v28  ;;  %vm489_vm6 = vcmp.ge.f32.partialorder %v2826_v47, 1.0  ;;  %vm490_vm7 = vcmp.ge.f32.partialorder %v2870_v3, 1.0  ;;  %vm491_vm8 = vcmp.lt.f32.partialorder %v2826_v47, 1.4 }
 0x569   :  { %v755_v17 = vmul.f32 %v751_v6, %v677_v18  ;;  %v2995_v25 = vmul.f32 %v759_v13, %v677_v18  ;;  %vm492_vm9 = vcmp.lt.f32.partialorder %v2870_v3, 1.4  ;;  %vm493_vm10 = vmand %vm489_vm6, %vm491_vm8  ;;  %vm499_vm11 = vcmp.ge.f32.partialorder %v2826_v47, 1.4 }
 0x56a   :  { %v756_v30 = vmul.f32 %v752_v7, %v678_v53  ;;  %v2999_v31 = vmul.f32 %v760_v19, %v678_v53  ;;  %vm494_vm12 = vmand %vm490_vm7, %vm492_vm9  ;;  %v2142_v42 = vsel %vm493_vm10, 1.0, %v2657_v49  ;;  %vm500_vm13 = vcmp.ge.f32.partialorder %v2870_v3, 1.4 }
 0x56b   :  { %v757_v48 = vadd.f32 %v755_v17, %v753_v22  ;;  %v2143_v16 = vsel %vm494_vm12, 1.0, %v2657_v49  ;;  %vm501_vm14 = vcmp.lt.f32.partialorder %v2826_v47, 1.8  ;;  %vm502_vm15 = vcmp.lt.f32.partialorder %v2870_v3, 1.8 }
 0x56c   :  { %v758_v23 = vadd.f32 %v756_v30, %v754_v50  ;;  %vm503_vm0 = vmand %vm499_vm11, %vm501_vm14  ;;  %vm509_vm2 = vcmp.ge.f32.partialorder %v2826_v47, 1.8  ;;  %vm510_vm3 = vcmp.ge.f32.partialorder %v2870_v3, 1.8  ;;  %vm511_vm4 = vcmp.lt.f32.partialorder %v2826_v47, 2.2 }
 0x56d   :  { %vm504_vm5 = vmand %vm500_vm13, %vm502_vm15  ;;  %v2144_v15 = vsel %vm503_vm0, 1.0, %v2657_v49  ;;  %vm512_vm6 = vcmp.lt.f32.partialorder %v2870_v3, 2.2  ;;  %v3012_v24 = vadd.f32 -0.6, %v2826_v47  ;;  %v3015_v26 = vadd.f32 -1.0, %v2826_v47 }
 0x56e   :  { %v2512_v34 = vpack.i.bf16 %v758_v23, %v757_v48  ;;  %v2145_v27 = vsel %vm504_vm5, 1.0, %v2657_v49  ;;  %vm513_vm7 = vmand %vm509_vm2, %vm511_vm4  ;;  %v3019_v36 = vadd.f32 -0.6, %v2870_v3  ;;  %v3022_v38 = vsub.f32 1.4, %v2826_v47 }
 0x56f   :  { %vm514_vm8 = vmand %vm510_vm3, %vm512_vm6  ;;  %v2146_v40 = vsel %vm513_vm7, 1.0, %v2657_v49  ;;  %v619_v41 = vmul.f32 2.5, %v3012_v24  ;;  %v622_v44 = vsub.f32 1.4, %v2870_v3  ;;  %v2165_v46 = vadd.f32 -1.0, %v2870_v3 }
 0x570   :  { %2513 = vrot.lane.b32.xlu0 %v2512_v34, %s2655_s17  ;;  %v2147_v51 = vsel %vm514_vm8, 1.0, %v2657_v49  ;;  %v620_v56 = vmul.f32 2.5, %v3019_v36  ;;  %v623_v60 = vmul.f32 2.5, %v3022_v38  ;;  %v633_v61 = vmul.f32 2.5, %v3015_v26 }
 0x571   :  { %v624_v29 = vmul.f32 2.5, %v622_v44  ;;  %v625_v33 = vmul.f32 %v2861_v59, %v619_v41  ;;  %v634_v28 = vmul.f32 2.5, %v2165_v46  ;;  %v635_v63 = vsub.f32 1.8, %v2826_v47 }
 0x572   :  { %v626_v32 = vmul.f32 %v2899_v21, %v620_v56  ;;  %v627_v0 = vmul.f32 %v2142_v42, %v623_v60  ;;  %v636_v1 = vsub.f32 1.8, %v2870_v3  ;;  %v639_v2 = vmul.f32 %v2142_v42, %v633_v61 }
 0x573   :  { %v628_v6 = vmul.f32 %v2143_v16, %v624_v29  ;;  %v637_v7 = vmul.f32 2.5, %v635_v63  ;;  %v640_v13 = vmul.f32 %v2143_v16, %v634_v28  ;;  %v2166_v18 = vadd.f32 -1.4, %v2826_v47 }
 0x574   :  { %v629_v22 = vadd.f32 %v627_v0, %v625_v33  ;;  %v638_v50 = vmul.f32 2.5, %v636_v1  ;;  %v2167_v19 = vadd.f32 -1.4, %v2870_v3  ;;  %v3040_v59 = vsub.f32 2.2, %v2826_v47 }
 0x575   :  { %v630_v53 = vadd.f32 %v628_v6, %v626_v32  ;;  %v641_v17 = vmul.f32 %v2144_v15, %v637_v7  ;;  %v647_v30 = vmul.f32 2.5, %v2166_v18  ;;  %v3043_v21 = vsub.f32 2.2, %v2870_v3 }
 0x576   :  { %v642_v48 = vmul.f32 %v2145_v27, %v638_v50  ;;  %v648_v42 = vmul.f32 2.5, %v2167_v19  ;;  %v651_v23 = vmul.f32 2.5, %v3040_v59  ;;  %v719_v16 = vmul.f32 1.25, %v2858_v58 }
 0x577   :  { %v643_v34 = vadd.f32 %v641_v17, %v639_v2  ;;  %v652_v41 = vmul.f32 2.5, %v3043_v21  ;;  %v653_v56 = vmul.f32 %v2144_v15, %v647_v30  ;;  %v720_v60 = vmul.f32 1.25, %v2896_v20 }
 0x578   :  { %v644_v61 = vadd.f32 %v642_v48, %v640_v13  ;;  %v654_v29 = vmul.f32 %v2145_v27, %v648_v42  ;;  %v655_v33 = vmul.f32 %v2146_v40, %v651_v23  ;;  %v721_v28 = vmul.f32 1.25, %v3022_v38 }
 0x579   :  { %v656_v32 = vmul.f32 %v2147_v51, %v652_v41  ;;  %v722_v0 = vmul.f32 1.25, %v622_v44  ;;  %v723_v6 = vmul.f32 %v719_v16, %v2905_v35  ;;  %v724_v7 = vmul.f32 %v720_v60, %v2913_v45 }
 0x57a   :  { %v3052_v18 = vadd.f32 %v655_v33, %v653_v56  ;;  %v725_v50 = vmul.f32 %v721_v28, %v629_v22  ;;  %v729_v2 = vmul.f32 1.25, %v3012_v24  ;;  %v730_v15 = vmul.f32 1.25, %v3019_v36 }
 0x57b   :  { %v3056_v19 = vadd.f32 %v656_v32, %v654_v29  ;;  %v726_v13 = vmul.f32 %v722_v0, %v630_v53  ;;  %v731_v27 = vmul.f32 1.25, %v635_v63  ;;  %v732_v40 = vmul.f32 1.25, %v636_v1 }
 0x57c   :  { %v727_v17 = vadd.f32 %v725_v50, %v723_v6  ;;  %v733_v30 = vmul.f32 %v729_v2, %v629_v22  ;;  %v734_v51 = vmul.f32 %v730_v15, %v630_v53  ;;  %v739_v48 = vmul.f32 1.25, %v3015_v26 }
 0x57d   :  { %v728_v35 = vadd.f32 %v726_v13, %v724_v7  ;;  %v735_v42 = vmul.f32 %v731_v27, %v643_v34  ;;  %v736_v45 = vmul.f32 %v732_v40, %v644_v61  ;;  %v740_v23 = vmul.f32 1.25, %v2165_v46 }
 0x57e   :  { %v3059_v16 = vmul.f32 %v739_v48, %v643_v34  ;;  %v801_v41 = vmul.f32 0.8333333, %v3022_v38  ;;  %v802_v56 = vmul.f32 0.8333333, %v622_v44  ;;  %v809_v60 = vmul.f32 0.8333333, %v2858_v58 }
 0x57f   :  { %v737_v29 = vadd.f32 %v735_v42, %v733_v30  ;;  %v738_v33 = vadd.f32 %v736_v45, %v734_v51  ;;  %v3063_v28 = vmul.f32 %v740_v23, %v644_v61  ;;  %v810_v22 = vmul.f32 0.8333333, %v2896_v20 }
 0x580   :  { %v805_v53 = vmul.f32 %v801_v41, %v727_v17  ;;  %v811_v32 = vmul.f32 0.8333333, %v635_v63  ;;  %v812_v26 = vmul.f32 0.8333333, %v636_v1  ;;  %v813_v0 = vmul.f32 %v809_v60, %v727_v17 }
 0x581   :  { %v814_v6 = vmul.f32 %v810_v22, %v728_v35  ;;  %v819_v46 = vmul.f32 0.8333333, %v3012_v24  ;;  %v820_v34 = vmul.f32 0.8333333, %v3019_v36  ;;  %v3068_v7 = vmul.f32 %v802_v56, %v728_v35 }
 0x582   :  { %v815_v38 = vmul.f32 %v811_v32, %v737_v29  ;;  %v816_v44 = vmul.f32 %v812_v26, %v738_v33  ;;  %v2154_v58 = vadd.f32 1.0, %v2826_v47  ;;  %v2155_v61 = vadd.f32 1.0, %v2870_v3 }
 0x583   :  { %v3072_v50 = vmul.f32 %v819_v46, %v737_v29  ;;  %v3074_v20 = vmul.f32 %v820_v34, %v738_v33  ;;  %v565_v63 = vsub.f32 -0.2, %v2826_v47  ;;  %v566_v1 = vsub.f32 -0.2, %v2870_v3 }
 0x584   :  { %v817_v2 = vadd.f32 %v815_v38, %v813_v0  ;;  %v818_v24 = vadd.f32 %v816_v44, %v814_v6  ;;  %v563_v15 = vmul.f32 2.5, %v2154_v58  ;;  %v564_v36 = vmul.f32 2.5, %v2155_v61 }
 0x585   :  { %v567_v13 = vmul.f32 2.5, %v565_v63  ;;  %v568_v27 = vmul.f32 2.5, %v566_v1  ;;  %v679_v40 = vmul.f32 1.25, %v2973_v4  ;;  %v680_v17 = vmul.f32 1.25, %v2976_v5 }
 0x586   :  { %v2527_v30 = vpack.i.bf16 %v818_v24, %v817_v2  ;;  %v569_v51 = vmul.f32 %v2964_v39, %v563_v15  ;;  %v570_v48 = vmul.f32 %v2969_v43, %v564_v36  ;;  %v681_v35 = vmul.f32 1.25, %v565_v63 }
 0x587   :  { %v571_v42 = vmul.f32 %v2835_v12, %v567_v13  ;;  %v572_v45 = vmul.f32 %v2883_v10, %v568_v27  ;;  %v682_v23 = vmul.f32 1.25, %v566_v1  ;;  %v683_v41 = vmul.f32 %v679_v40, %v2985_v55 }
 0x588   :  { %2528 = vrot.lane.b32.xlu1 %v2527_v30, %s2655_s17  ;;  %v684_v56 = vmul.f32 %v680_v17, %v2987_v62  ;;  %v689_v60 = vmul.f32 1.25, %v2154_v58  ;;  %v690_v29 = vmul.f32 1.25, %v2155_v61  ;;  %v691_v33 = vmul.f32 1.25, %v2844_v52  ;;  %v2459_v30 = vld [vmem:[#allocation2 + $0x80] sm:$0xff] }
 0x589   :  { %v573_v22 = vadd.f32 %v571_v42, %v569_v51  ;;  %v574_v39 = vadd.f32 %v572_v45, %v570_v48  ;;  %v692_v43 = vmul.f32 1.25, %v2890_v14  ;;  %v761_v32 = vmul.f32 0.8333333, %v565_v63  ;;  %1213 = vmatpush.bf16.msra.mxu3 %v2459_v30  ;;  %v2467_v42 = vld [vmem:[#allocation2 + $0xc0] sm:$0xff] }
 0x58a   :  { %v695_v12 = vmul.f32 %v691_v33, %v2880_v9  ;;  %v762_v26 = vmul.f32 0.8333333, %v566_v1  ;;  %v769_v10 = vmul.f32 0.8333333, %v2973_v4  ;;  %v770_v55 = vmul.f32 0.8333333, %v2976_v5  ;;  %1227 = vmatpush.bf16.msrb.mxu1 %v2467_v42 }
 0x58b   :  { %v685_v0 = vmul.f32 %v681_v35, %v573_v22  ;;  %v686_v6 = vmul.f32 %v682_v23, %v574_v39  ;;  %v693_v46 = vmul.f32 %v689_v60, %v573_v22  ;;  %v694_v62 = vmul.f32 %v690_v29, %v574_v39  ;;  %v2466_v60 = vld [vmem:[#allocation2 + $0xb8] sm:$0xff]  ;;  %v2457_v33 = vld [vmem:[#allocation2 + $0x70] sm:$0xff] }
 0x58c   :  { %v696_v34 = vmul.f32 %v692_v43, %v2907_v37  ;;  %v771_v38 = vmul.f32 0.8333333, %v2844_v52  ;;  %v772_v44 = vmul.f32 0.8333333, %v2890_v14  ;;  %v779_v2 = vmul.f32 0.8333333, %v2154_v58 }
 0x58d   :  { %v687_v24 = vadd.f32 %v685_v0, %v683_v41  ;;  %v688_v63 = vadd.f32 %v686_v6, %v684_v56  ;;  %v697_v15 = vadd.f32 %v695_v12, %v693_v46  ;;  %v780_v9 = vmul.f32 0.8333333, %v2155_v61  ;;  %v2475_v61 = vld [vmem:[#allocation2 + $0x100] sm:$0xff]  ;;  %v2474_v41 = vld [vmem:[#allocation2 + $0xf8] sm:$0xff]  ;;  %v2473_v43 = vld [vmem:[#allocation2 + $0xf0] sm:$0xff] }
 0x58e   :  { %v698_v1 = vadd.f32 %v696_v34, %v694_v62  ;;  %v2168_v4 = vmul.f32 -1.442695, %v2826_v47  ;;  %v2169_v5 = vmul.f32 -1.442695, %v2870_v3  ;;  %v3098_v36 = vadd.f32 %v805_v53, %v2928_v11  ;;  %v2458_v53 = vld [vmem:[#allocation2 + $0x78] sm:$0xff]  ;;  %1241 = vmatpush.bf16.msrb.mxu2 %v2475_v61  ;;  %1228 = vmatpush.bf16.msrb.mxu1 %v2466_v60  ;;  %v2471_v61 = vld [vmem:[#allocation2 + $0xe0] sm:$0xff] }
 0x58f   :  { %v765_v13 = vmul.f32 %v761_v32, %v687_v24  ;;  %v773_v27 = vmul.f32 %v769_v10, %v687_v24  ;;  %v774_v37 = vmul.f32 %v770_v55, %v688_v63  ;;  %v775_v40 = vmul.f32 %v771_v38, %v697_v15  ;;  %1214 = vmatpush.bf16.msra.mxu3 %v2458_v53  ;;  %v2456_v55 = vld [vmem:[#allocation2 + $0x68] sm:$0xff]  ;;  %v2454_v34 = vld [vmem:[#allocation2 + $0x58] sm:$0xff] }
 0x590   :  { %v776_v52 = vmul.f32 %v772_v44, %v698_v1  ;;  %v783_v17 = vmul.f32 %v779_v2, %v697_v15  ;;  %v784_v14 = vmul.f32 %v780_v9, %v698_v1  ;;  %v766_v58 = vmul.f32 %v762_v26, %v688_v63  ;;  %v2453_v9 = vld [vmem:[#allocation2 + $0x50] sm:$0xff]  ;;  %v2464_v60 = vld [vmem:[#allocation2 + $0xa8] sm:$0xff] }
 0x591   :  { %v777_v51 = vadd.f32 %v775_v40, %v773_v27  ;;  %2604 = vpow2.f32 %v2168_v4  ;;  %v3102_v48 = vadd.f32 %v3068_v7, %v2930_v54  ;;  %v3105_v35 = vadd.f32 %v765_v13, %v2995_v25 }
 0x592   :  { %v778_v11 = vadd.f32 %v776_v52, %v774_v37  ;;  %2606 = vpow2.f32 %v2169_v5  ;;  %v3108_v45 = vadd.f32 %v766_v58, %v2999_v31  ;;  %v741_v23 = vmul.f32 1.25, %v3040_v59  ;;  %1242 = vmatpush.bf16.msrb.mxu2 %v2474_v41  ;;  %v2452_v52 = vld [vmem:[#allocation2 + $0x48] sm:$0xff] }
 0x593   :  { %v742_v56 = vmul.f32 1.25, %v3043_v21  ;;  %v3113_v54 = vadd.f32 %v2921_v8, %v783_v17  ;;  %v3116_v25 = vadd.f32 %v2924_v57, %v784_v14  ;;  %v821_v39 = vmul.f32 0.8333333, %v3040_v59  ;;  %1215 = vmatpush.bf16.msra.mxu3 %v2457_v33 }
 0x594   :  { %v2517_v7 = vpack.i.bf16 %v778_v11, %v777_v51  ;;  %v745_v29 = vmul.f32 %v741_v23, %v3052_v18  ;;  %v822_v32 = vmul.f32 0.8333333, %v3043_v21  ;;  %v2455_v21 = vld [vmem:[#allocation2 + $0x60] sm:$0xff]  ;;  %v2465_v51 = vld [vmem:[#allocation2 + $0xb0] sm:$0xff] }
 0x595   :  { %v746_v31 = vmul.f32 %v742_v56, %v3056_v19  ;;  %v2483_v11 = vld [vmem:[#allocation2 + $0x140] sm:$0xff]  ;;  %1229 = vmatpush.bf16.msrb.mxu1 %v2465_v51 }
 0x596   :  { %2518 = vrot.lane.b32.xlu0 %v2517_v7, %s2655_s17  ;;  %v747_v22 = vadd.f32 %v745_v29, %v3059_v16  ;;  %1243 = vmatpush.bf16.msrb.mxu2 %v2473_v43  ;;  %v2472_v16 = vld [vmem:[#allocation2 + $0xe8] sm:$0xff]  ;;  %v2470_v29 = vld [vmem:[#allocation2 + $0xd8] sm:$0xff]  ;;  %v2463_v43 = vld [vmem:[#allocation2 + $0xa0] sm:$0xff] }
 0x597   :  { %v2605_v8 = vpop.eup %2604  ;;  %v748_v57 = vadd.f32 %v746_v31, %v3063_v28  ;;  %1216 = vmatpush.bf16.msra.mxu3 %v2456_v55 }
 0x598   :  { %v2607_v12 = vpop.eup %2606  ;;  %v835_v26 = vadd.f32 1.0, %v2605_v8  ;;  %v825_v18 = vmul.f32 %v821_v39, %v747_v22 }
 0x599   :  { %v836_v19 = vadd.f32 1.0, %v2607_v12  ;;  %v826_v10 = vmul.f32 %v822_v32, %v748_v57  ;;  %1230 = vmatpush.bf16.msrb.mxu1 %v2464_v60  ;;  %v2469_v57 = vld [vmem:[#allocation2 + $0xd0] sm:$0xff]  ;;  %v2468_v12 = vld [vmem:[#allocation2 + $0xc8] sm:$0xff] }
 0x59a   :  { %2608 = vrcp.f32 %v835_v26  ;;  %v3126_v59 = vadd.f32 %v825_v18, %v3072_v50  ;;  %1244 = vmatpush.bf16.msrb.mxu2 %v2472_v16  ;;  %v848_v44 = vand.u32 2147483648, %v835_v26  ;;  %v846_v63 = vand.u32 2147483647, %v835_v26  ;;  %v2481_v32 = vld [vmem:[#allocation2 + $0x130] sm:$0xff] }
 0x59b   :  { %2610 = vrcp.f32 %v836_v19  ;;  %v3129_v0 = vadd.f32 %v826_v10, %v3074_v20  ;;  %1217 = vmatpush.bf16.msra.mxu3 %v2455_v21  ;;  %v863_v50 = vand.u32 2147483648, %v836_v19  ;;  %v861_v20 = vand.u32 2147483647, %v836_v19  ;;  %v2460_v21 = vld [vmem:[#allocation2 + $0x88] sm:$0xff] }
 0x59c   :  { %vm842_vm11 = vweird.f32 %v835_v26  ;;  %v849_v4 = vor.u32 1.1754944e-38, %v848_v44  ;;  %vm857_vm13 = vweird.f32 %v836_v19  ;;  %vm847_vm14 = vcmp.eq.f32.partialorder %v846_v63, 8.507059e+37 }
 0x59d   :  { %v864_v27 = vor.u32 1.1754944e-38, %v863_v50  ;;  %vm862_vm0 = vcmp.eq.f32.partialorder %v861_v20, 8.507059e+37  ;;  %1231 = vmatpush.bf16.msrb.mxu1 %v2463_v43  ;;  %v2484_v50 = vld [vmem:[#allocation2 + $0x148] sm:$0xff] }
 0x59e   :  { %1245 = vmatpush.bf16.msrb.mxu2 %v2471_v61 }
 0x59f   :  { %1218 = vmatpush.bf16.msra.mxu3 %v2454_v34 }
 0x5a0   :  { %v2609_v28 = vpop.eup %2608 }
 0x5a1   :  { %v2611_v6 = vpop.eup %2610  ;;  %v838_v46 = vmul.f32 %v2609_v28, %v835_v26  ;;  %vm843_vm9 = vweird.f32 %v2609_v28 }
 0x5a2   :  { %v853_v62 = vmul.f32 %v2611_v6, %v836_v19  ;;  %vm858_vm10 = vweird.f32 %v2611_v6  ;;  %vm844_vm12 = vmor %vm842_vm11, %vm843_vm9  ;;  %1246 = vmatpush.bf16.msrb.mxu2 %v2470_v29  ;;  %v2479_v19 = vld [vmem:[#allocation2 + $0x120] sm:$0xff] }
 0x5a3   :  { %v839_v38 = vsub.f32 1.0, %v838_v46  ;;  %vm859_vm15 = vmor %vm857_vm13, %vm858_vm10  ;;  %1219 = vmatpush.bf16.msra.mxu3 %v2453_v9  ;;  %v2477_v46 = vld [vmem:[#allocation2 + $0x110] sm:$0xff] }
 0x5a4   :  { %v854_v2 = vsub.f32 1.0, %v853_v62  ;;  %v2486_v62 = vld [vmem:[#allocation2 + $0x158] sm:$0xff] }
 0x5a5   :  { %v840_v24 = vmul.f32 %v2609_v28, %v839_v38  ;;  %v2476_v38 = vld [vmem:[#allocation2 + $0x108] sm:$0xff] }
 0x5a6   :  { %v855_v15 = vmul.f32 %v2611_v6, %v854_v2  ;;  %1247 = vmatpush.bf16.msrb.mxu2 %v2469_v57 }
 0x5a7   :  { %v841_v1 = vadd.f32 %v2609_v28, %v840_v24  ;;  %1220 = vmatpush.bf16.msra.mxu3 %v2452_v52 }
 0x5a8   :  { %v856_v5 = vadd.f32 %v2611_v6, %v855_v15 }
 0x5a9   :  { %v845_v13 = vsel %vm844_vm12, %v2609_v28, %v841_v1  ;;  %v2478_v28 = vld [vmem:[#allocation2 + $0x118] sm:$0xff] }
 0x5aa   :  { %v850_v37 = vsel %vm847_vm14, %v849_v4, %v845_v13  ;;  %v860_v40 = vsel %vm859_vm15, %v2611_v6, %v856_v5  ;;  %1248 = vmatpush.bf16.msrb.mxu2 %v2468_v12  ;;  %v2487_v6 = vld [vmem:[#allocation2 + $0x160] sm:$0xff] }
 0x5ab   :  { %v865_v17 = vsel %vm862_vm0, %v864_v27, %v860_v40  ;;  %v867_v14 = vmul.f32 %v2826_v47, %v850_v37  ;;  %1255 = vmatpush.bf16.msrb.mxu3 %v2483_v11  ;;  %v2482_v47 = vld [vmem:[#allocation2 + $0x138] sm:$0xff]  ;;  %v2495_v5 = vld [vmem:[#allocation2 + $0x1a0] sm:$0xff] }
 0x5ac   :  { %v868_v58 = vmul.f32 %v2870_v3, %v865_v17  ;;  %1955 = vmatpush.bf16.msrb.mxu0 %v2495_v5 }
 0x5ae   :  { %v2532_v30 = vpack.i.bf16 %v868_v58, %v867_v14 }
 0x5af   :  { %1256 = vmatpush.bf16.msrb.mxu3 %v2482_v47 }
 0x5b0   :  { %2533 = vrot.lane.b32.xlu2 %v2532_v30, %s2655_s17 }
 0x5b3   :  { %1257 = vmatpush.bf16.msrb.mxu3 %v2481_v32 }
 0x5c7   :  { %v2524_v53 = vpop.permute.xlu1 %2523 }
 0x5c8   :  { %v2526_v23 = vunpack.i.h.bf16 %v2524_v53  ;;  %v2525_v41 = vunpack.i.l.bf16 %v2524_v53 }
 0x5ca   :  { %v914_v3 = vsel %vm206_vm1, %v2526_v23, %v3102_v48  ;;  %v913_v31 = vsel %vm206_vm1, %v2525_v41, %v3098_v36  ;;  %v2462_v48 = vld [vmem:[#allocation2 + $0x98] sm:$0xff]  ;;  %v2480_v36 = vld [vmem:[#allocation2 + $0x128] sm:$0xff] }
 0x5cb   :  { %v919_v39 = vpack.c.bf16 %v914_v3, %v913_v31  ;;  %1232 = vmatpush.bf16.msrb.mxu1 %v2462_v48  ;;  %1258 = vmatpush.bf16.msrb.mxu3 %v2480_v36 }
 0x5cd   :  { %1249 = vmatmul.bf16.vlgmr.msrb.gmra.mxu2 %v919_v39 }
 0x5cf   :  { %1259 = vmatpush.bf16.msrb.mxu3 %v2479_v19 }
 0x5d3   :  { %1260 = vmatpush.bf16.msrb.mxu3 %v2478_v28 }
 0x5d7   :  { %1261 = vmatpush.bf16.msrb.mxu3 %v2477_v46 }
 0x5db   :  { %1262 = vmatpush.bf16.msrb.mxu3 %v2476_v38 }
 0x5e2   :  { %v2514_v42 = vpop.permute.xlu0 %2513 }
 0x5e3   :  { %v2516_v56 = vunpack.i.h.bf16 %v2514_v42  ;;  %v2515_v7 = vunpack.i.l.bf16 %v2514_v42 }
 0x5e5   :  { %v910_v33 = vsel %vm206_vm1, %v2516_v56, %v3108_v45  ;;  %v909_v22 = vsel %vm206_vm1, %v2515_v7, %v3105_v35  ;;  %v2461_v45 = vld [vmem:[#allocation2 + $0x90] sm:$0xff] }
 0x5e6   :  { %v917_v8 = vpack.c.bf16 %v910_v33, %v909_v22  ;;  %1233 = vmatpush.bf16.msrb.mxu1 %v2461_v45 }
 0x5e8   :  { %1221 = vmatmul.bf16.vlgmr.msra.gmra.mxu3 %v917_v8 }
 0x5ea   :  { %1234 = vmatpush.bf16.msrb.mxu1 %v2460_v21 }
 0x5ee   :  { %1273 = vmatpush.bf16.msra.mxu1 %v2487_v6 }
 0x5f2   :  { %1274 = vmatpush.bf16.msra.mxu1 %v2486_v62 }
 0x5fa   :  { %v2529_v26 = vpop.permute.xlu1 %2528 }
 0x5fb   :  { %v2531_v35 = vunpack.i.h.bf16 %v2529_v26  ;;  %v2530_v18 = vunpack.i.l.bf16 %v2529_v26 }
 0x5fd   :  { %v916_v10 = vsel %vm206_vm1, %v2531_v35, %v3129_v0  ;;  %v915_v55 = vsel %vm206_vm1, %v2530_v18, %v3126_v59  ;;  %v2485_v0 = vld [vmem:[#allocation2 + $0x150] sm:$0xff] }
 0x5fe   :  { %v920_v16 = vpack.c.bf16 %v916_v10, %v915_v55  ;;  %1275 = vmatpush.bf16.msra.mxu1 %v2485_v0 }
 0x600   :  { %1263 = vmatmul.bf16.vlgmr.msrb.gmra.mxu3 %v920_v16 }
 0x602   :  { %1276 = vmatpush.bf16.msra.mxu1 %v2484_v50 }
 0x608   :  { %v2519_v34 = vpop.permute.xlu0 %2518 }
 0x609   :  { %v2521_v44 = vunpack.i.h.bf16 %v2519_v34  ;;  %v2520_v2 = vunpack.i.l.bf16 %v2519_v34 }
 0x60a   :  { %v2534_v15 = vpop.permute.xlu2 %2533 }
 0x60b   :  { %v912_v59 = vsel %vm206_vm1, %v2521_v44, %v3116_v25  ;;  %v911_v24 = vsel %vm206_vm1, %v2520_v2, %v3113_v54  ;;  %v2536_v20 = vunpack.i.h.bf16 %v2534_v15  ;;  %v2535_v9 = vunpack.i.l.bf16 %v2534_v15 }
 0x60c   :  { %v918_v63 = vpack.c.bf16 %v912_v59, %v911_v24 }
 0x60d   :  { %v921_v1 = vpack.c.bf16 %v2536_v20, %v2535_v9 }
 0x60e   :  { %1235 = vmatmul.bf16.vlgmr.msrb.gmra.mxu1 %v918_v63 }
 0x61e   :  { %2314 = vmatmul.msk.bf16.vlgmr.msra.gmra.mxu1 %vm206_vm1, %v921_v1 }
 0x650   :  { %v1250_v27 = vpop.f32.mrf.mxu2 }
 0x658   :  { %v1252_v30 = vpop.f32.mrf.mxu2 }
 0x66b   :  { %v1222_v4 = vpop.f32.mrf.mxu3 }
 0x673   :  { %v1224_v25 = vpop.f32.mrf.mxu3 }
 0x683   :  { %v1264_v37 = vpop.f32.mrf.mxu3 }
 0x68b   :  { %v1236_v13 = vpop.f32.mrf.mxu1  ;;  %v1266_v61 = vpop.f32.mrf.mxu3 }
 0x68c   :  { %v1237_v54 = vadd.f32 %v1236_v13, %v1222_v4 }
 0x68e   :  { %v1251_v52 = vadd.f32 %v1250_v27, %v1237_v54 }
 0x690   :  { %v1265_v17 = vadd.f32 %v1264_v37, %v1251_v52 }
 0x693   :  { %v1238_v40 = vpop.f32.mrf.mxu1 }
 0x694   :  { %v1239_v14 = vadd.f32 %v1238_v40, %v1224_v25 }
 0x696   :  { %v1253_v11 = vadd.f32 %v1252_v30, %v1239_v14 }
 0x698   :  { %v1267_v53 = vadd.f32 %v1266_v61, %v1253_v11 }
 0x69b   :  { %v1278_v58 = vpop.f32.mrf.mxu1 }
 0x69c   :  { %v3151_v51 = vadd.f32 %v1278_v58, %v1265_v17 }
 0x69e   :  { %vm1353_vm2 = vcmp.ge.f32.partialorder %v3151_v51, 0.6  ;;  %vm1355_vm3 = vcmp.lt.f32.partialorder %v3151_v51, 1.0  ;;  %vm1363_vm4 = vcmp.ge.f32.partialorder %v3151_v51, 1.0  ;;  %vm1365_vm5 = vcmp.lt.f32.partialorder %v3151_v51, 1.4 }
 0x69f   :  { %vm1357_vm6 = vmand %vm1353_vm2, %vm1355_vm3  ;;  %vm1373_vm7 = vcmp.ge.f32.partialorder %v3151_v51, 1.4  ;;  %vm1375_vm8 = vcmp.lt.f32.partialorder %v3151_v51, 1.8  ;;  %vm1383_vm9 = vcmp.ge.f32.partialorder %v3151_v51, 1.8 }
 0x6a0   :  { %v3161_v42 = vsel %vm1357_vm6, 1.0, %v2657_v49  ;;  %vm1367_vm10 = vmand %vm1363_vm4, %vm1365_vm5  ;;  %vm1385_vm11 = vcmp.lt.f32.partialorder %v3151_v51, 2.2  ;;  %v3165_v23 = vadd.f32 -0.6, %v3151_v51  ;;  %v3168_v41 = vadd.f32 -1.0, %v3151_v51 }
 0x6a1   :  { %v2331_v56 = vsel %vm1367_vm10, 1.0, %v2657_v49  ;;  %vm1377_vm12 = vmand %vm1373_vm7, %vm1375_vm8  ;;  %v3172_v7 = vsub.f32 1.4, %v3151_v51  ;;  %v3175_v60 = vsub.f32 1.8, %v3151_v51  ;;  %v3178_v29 = vsub.f32 1.0, %v3151_v51 }
 0x6a2   :  { %v2333_v47 = vsel %vm1377_vm12, 1.0, %v2657_v49  ;;  %vm1387_vm13 = vmand %vm1383_vm9, %vm1385_vm11  ;;  %v1493_v3 = vmul.f32 2.5, %v3165_v23  ;;  %v1507_v31 = vmul.f32 2.5, %v3168_v41  ;;  %v2355_v33 = vadd.f32 -1.4, %v3151_v51 }
 0x6a3   :  { %v1280_v22 = vpop.f32.mrf.mxu1  ;;  %v2335_v39 = vsel %vm1387_vm13, 1.0, %v2657_v49  ;;  %v1497_v8 = vmul.f32 2.5, %v3172_v7  ;;  %v1511_v43 = vmul.f32 2.5, %v3175_v60  ;;  %v3188_v57 = vsub.f32 2.2, %v3151_v51 }
 0x6a4   :  { %v3190_v32 = vadd.f32 %v1280_v22, %v1267_v53  ;;  %v1499_v48 = vmul.f32 %v3161_v42, %v1493_v3  ;;  %v1513_v12 = vmul.f32 %v2331_v56, %v1507_v31  ;;  %v1521_v36 = vmul.f32 2.5, %v2355_v33 }
 0x6a5   :  { %v1501_v26 = vmul.f32 %v2331_v56, %v1497_v8  ;;  %v1515_v45 = vmul.f32 %v2333_v47, %v1511_v43  ;;  %v1525_v35 = vmul.f32 2.5, %v3188_v57  ;;  %v1603_v18 = vmul.f32 1.25, %v3165_v23 }
 0x6a6   :  { %vm1354_vm14 = vcmp.ge.f32.partialorder %v3190_v32, 0.6  ;;  %vm1356_vm15 = vcmp.lt.f32.partialorder %v3190_v32, 1.0  ;;  %vm1364_vm0 = vcmp.ge.f32.partialorder %v3190_v32, 1.0  ;;  %vm1366_vm2 = vcmp.lt.f32.partialorder %v3190_v32, 1.4 }
 0x6a7   :  { %vm1358_vm3 = vmand %vm1354_vm14, %vm1356_vm15  ;;  %vm1374_vm4 = vcmp.ge.f32.partialorder %v3190_v32, 1.4  ;;  %vm1376_vm5 = vcmp.lt.f32.partialorder %v3190_v32, 1.8  ;;  %vm1384_vm6 = vcmp.ge.f32.partialorder %v3190_v32, 1.8  ;;  %v3202_v19 = vadd.f32 %v1501_v26, %v1499_v48 }
 0x6a8   :  { %v3205_v10 = vsel %vm1358_vm3, 1.0, %v2657_v49  ;;  %vm1368_vm7 = vmand %vm1364_vm0, %vm1366_vm2  ;;  %vm1386_vm8 = vcmp.lt.f32.partialorder %v3190_v32, 2.2  ;;  %v2352_v55 = vadd.f32 -0.6, %v3190_v32  ;;  %v2354_v16 = vadd.f32 -1.0, %v3190_v32 }
 0x6a9   :  { %v2332_v21 = vsel %vm1368_vm7, 1.0, %v2657_v49  ;;  %vm1378_vm9 = vmand %vm1374_vm4, %vm1376_vm5  ;;  %v3212_v28 = vsub.f32 1.4, %v3190_v32  ;;  %v3215_v6 = vsub.f32 1.8, %v3190_v32  ;;  %v1517_v46 = vadd.f32 %v1515_v45, %v1513_v12 }
 0x6aa   :  { %v2334_v62 = vsel %vm1378_vm9, 1.0, %v2657_v49  ;;  %vm1388_vm10 = vmand %vm1384_vm6, %vm1386_vm8  ;;  %v1494_v34 = vmul.f32 2.5, %v2352_v55  ;;  %v1508_v38 = vmul.f32 2.5, %v2354_v16  ;;  %v2356_v0 = vadd.f32 -1.4, %v3190_v32 }
 0x6ab   :  { %v2336_v44 = vsel %vm1388_vm10, 1.0, %v2657_v49  ;;  %v1498_v2 = vmul.f32 2.5, %v3212_v28  ;;  %v1512_v59 = vmul.f32 2.5, %v3215_v6  ;;  %v1524_v24 = vsub.f32 2.2, %v3190_v32 }
 0x6ac   :  { %v1500_v63 = vmul.f32 %v3205_v10, %v1494_v34  ;;  %v1514_v50 = vmul.f32 %v2332_v21, %v1508_v38  ;;  %v1522_v15 = vmul.f32 2.5, %v2356_v0  ;;  %v1527_v20 = vmul.f32 %v2333_v47, %v1521_v36 }
 0x6ad   :  { %v1502_v9 = vmul.f32 %v2332_v21, %v1498_v2  ;;  %v1516_v1 = vmul.f32 %v2334_v62, %v1512_v59  ;;  %v1526_v4 = vmul.f32 2.5, %v1524_v24  ;;  %v1529_v5 = vmul.f32 %v2335_v39, %v1525_v35 }
 0x6ae   :  { %v1528_v25 = vmul.f32 %v2334_v62, %v1522_v15  ;;  %v1604_v13 = vmul.f32 1.25, %v2352_v55  ;;  %v1605_v27 = vmul.f32 1.25, %v3175_v60  ;;  %v1606_v54 = vmul.f32 1.25, %v3215_v6 }
 0x6af   :  { %v3226_v37 = vadd.f32 %v1502_v9, %v1500_v63  ;;  %v1518_v40 = vadd.f32 %v1516_v1, %v1514_v50  ;;  %v1530_v52 = vmul.f32 %v2336_v44, %v1526_v4  ;;  %v1531_v17 = vadd.f32 %v1529_v5, %v1527_v20 }
 0x6b0   :  { %v1607_v14 = vmul.f32 %v1603_v18, %v3202_v19  ;;  %v1609_v58 = vmul.f32 %v1605_v27, %v1517_v46  ;;  %v1613_v30 = vmul.f32 1.25, %v3168_v41  ;;  %v1614_v61 = vmul.f32 1.25, %v2354_v16  ;;  %v2494_v18 = vld [vmem:[#allocation2 + $0x198] sm:$0xff]  ;;  %v2505_v16 = vld [vmem:[#allocation2 + $0x1f0] sm:$0xff] }
 0x6b1   :  { %v1532_v11 = vadd.f32 %v1530_v52, %v1528_v25  ;;  %v1608_v53 = vmul.f32 %v1604_v13, %v3226_v37  ;;  %v1610_v56 = vmul.f32 %v1606_v54, %v1518_v40  ;;  %v1615_v47 = vmul.f32 1.25, %v3188_v57  ;;  %1956 = vmatpush.bf16.msrb.mxu0 %v2494_v18  ;;  %1989 = vmatpush.bf16.msra.mxu3 %v2505_v16 }
 0x6b2   :  { %v3232_v3 = vadd.f32 %v1609_v58, %v1607_v14  ;;  %v1616_v31 = vmul.f32 1.25, %v1524_v24  ;;  %v1617_v33 = vmul.f32 %v1613_v30, %v1517_v46  ;;  %v1618_v22 = vmul.f32 %v1614_v61, %v1518_v40 }
 0x6b3   :  { %v1612_v39 = vadd.f32 %v1610_v56, %v1608_v53  ;;  %v1619_v8 = vmul.f32 %v1615_v47, %v1531_v17  ;;  %v1693_v43 = vmul.f32 0.8333333, %v3165_v23  ;;  %v1694_v48 = vmul.f32 0.8333333, %v2352_v55 }
 0x6b4   :  { %v1620_v12 = vmul.f32 %v1616_v31, %v1532_v11  ;;  %v1695_v41 = vmul.f32 0.8333333, %v3188_v57  ;;  %v1696_v36 = vmul.f32 0.8333333, %v1524_v24  ;;  %vm1343_vm11 = vcmp.ge.f32.partialorder %v3151_v51, 0.2 }
 0x6b5   :  { %v1621_v26 = vadd.f32 %v1619_v8, %v1617_v33  ;;  %v1697_v45 = vmul.f32 %v1693_v43, %v3232_v3  ;;  %v1698_v35 = vmul.f32 %v1694_v48, %v1612_v39  ;;  %vm1344_vm12 = vcmp.ge.f32.partialorder %v3190_v32, 0.2 }
 0x6b6   :  { %v1622_v21 = vadd.f32 %v1620_v12, %v1618_v22  ;;  %vm1345_vm13 = vcmp.lt.f32.partialorder %v3151_v51, 0.6  ;;  %vm1346_vm14 = vcmp.lt.f32.partialorder %v3190_v32, 0.6  ;;  %v3242_v23 = vsub.f32 0.6, %v3151_v51 }
 0x6b7   :  { %v1699_v57 = vmul.f32 %v1695_v41, %v1621_v26  ;;  %vm1347_vm15 = vmand %vm1343_vm11, %vm1345_vm13  ;;  %v3245_v55 = vsub.f32 0.6, %v3190_v32  ;;  %v2349_v46 = vadd.f32 -0.2, %v3151_v51  ;;  %v2350_v62 = vadd.f32 -0.2, %v3190_v32 }
 0x6b8   :  { %v1700_v34 = vmul.f32 %v1696_v36, %v1622_v21  ;;  %vm1348_vm0 = vmand %vm1344_vm12, %vm1346_vm14  ;;  %v2327_v38 = vsel %vm1347_vm15, 1.0, %v2657_v49  ;;  %v1469_v0 = vmul.f32 2.5, %v3242_v23  ;;  %v1482_v44 = vsub.f32 1.0, %v3190_v32 }
 0x6b9   :  { %v1701_v2 = vadd.f32 %v1699_v57, %v1697_v45  ;;  %v2328_v59 = vsel %vm1348_vm0, 1.0, %v2657_v49  ;;  %v1470_v24 = vmul.f32 2.5, %v3245_v55  ;;  %v1479_v63 = vmul.f32 2.5, %v2349_v46 }
 0x6ba   :  { %v1702_v50 = vadd.f32 %v1700_v34, %v1698_v35  ;;  %v1473_v15 = vmul.f32 %v2327_v38, %v1469_v0  ;;  %v1480_v20 = vmul.f32 2.5, %v2350_v62  ;;  %v1483_v9 = vmul.f32 2.5, %v3178_v29 }
 0x6bb   :  { %v1484_v1 = vmul.f32 2.5, %v1482_v44  ;;  %v1485_v4 = vmul.f32 %v2327_v38, %v1479_v63  ;;  %v1593_v5 = vmul.f32 1.25, %v2349_v46  ;;  %v1594_v25 = vmul.f32 1.25, %v2350_v62 }
 0x6bc   :  { %v2547_v13 = vpack.i.bf16 %v1702_v50, %v1701_v2  ;;  %v1486_v27 = vmul.f32 %v2328_v59, %v1480_v20  ;;  %v1487_v54 = vmul.f32 %v3161_v42, %v1483_v9  ;;  %v1595_v40 = vmul.f32 1.25, %v3172_v7 }
 0x6bd   :  { %v1488_v52 = vmul.f32 %v3205_v10, %v1484_v1  ;;  %v1596_v17 = vmul.f32 1.25, %v3212_v28  ;;  %v1683_v14 = vmul.f32 0.8333333, %v2349_v46  ;;  %v1684_v58 = vmul.f32 0.8333333, %v2350_v62 }
 0x6be   :  { %2548 = vrot.lane.b32.xlu1 %v2547_v13, %s2658_s0  ;;  %v1489_v30 = vadd.f32 %v1487_v54, %v1485_v4  ;;  %v1599_v61 = vmul.f32 %v1595_v40, %v3202_v19  ;;  %v1685_v11 = vmul.f32 0.8333333, %v3175_v60  ;;  %v1686_v53 = vmul.f32 0.8333333, %v3215_v6 }
 0x6bf   :  { %v1490_v56 = vadd.f32 %v1488_v52, %v1486_v27  ;;  %v1600_v42 = vmul.f32 %v1596_v17, %v3226_v37  ;;  %v1474_v47 = vmul.f32 %v2328_v59, %v1470_v24  ;;  %vm1333_vm2 = vcmp.ge.f32.partialorder %v3151_v51, -0.2 }
 0x6c0   :  { %v1597_v10 = vmul.f32 %v1593_v5, %v1489_v30  ;;  %v1689_v31 = vmul.f32 %v1685_v11, %v3232_v3  ;;  %v1690_v33 = vmul.f32 %v1686_v53, %v1612_v39  ;;  %vm1334_vm3 = vcmp.ge.f32.partialorder %v3190_v32, -0.2 }
 0x6c1   :  { %v1598_v22 = vmul.f32 %v1594_v25, %v1490_v56  ;;  %vm1335_vm4 = vcmp.lt.f32.partialorder %v3151_v51, 0.2  ;;  %vm1336_vm5 = vcmp.lt.f32.partialorder %v3190_v32, 0.2  ;;  %v2347_v60 = vadd.f32 0.2, %v3151_v51 }
 0x6c2   :  { %v1601_v19 = vadd.f32 %v1599_v61, %v1597_v10  ;;  %vm1337_vm6 = vmand %vm1333_vm2, %vm1335_vm4  ;;  %v2348_v6 = vadd.f32 0.2, %v3190_v32  ;;  %v1585_v37 = vmul.f32 1.25, %v3178_v29  ;;  %v1586_v8 = vmul.f32 1.25, %v1482_v44 }
 0x6c3   :  { %v1602_v43 = vadd.f32 %v1600_v42, %v1598_v22  ;;  %vm1338_vm7 = vmand %vm1334_vm3, %vm1336_vm5  ;;  %v3275_v3 = vsel %vm1337_vm6, 1.0, %v2657_v49  ;;  %v1465_v39 = vmul.f32 2.5, %v2347_v60  ;;  %v1583_v48 = vmul.f32 1.25, %v2347_v60 }
 0x6c4   :  { %v1687_v12 = vmul.f32 %v1683_v14, %v1601_v19  ;;  %v3278_v41 = vsel %vm1338_vm7, 1.0, %v2657_v49  ;;  %v1466_v36 = vmul.f32 2.5, %v2348_v6  ;;  %v1584_v26 = vmul.f32 1.25, %v2348_v6 }
 0x6c5   :  { %v1688_v45 = vmul.f32 %v1684_v58, %v1602_v43  ;;  %v1471_v35 = vmul.f32 %v3275_v3, %v1465_v39  ;;  %v1589_v18 = vmul.f32 %v1585_v37, %v1489_v30  ;;  %v1590_v16 = vmul.f32 %v1586_v8, %v1490_v56 }
 0x6c6   :  { %v1691_v21 = vadd.f32 %v1689_v31, %v1687_v12  ;;  %v1472_v57 = vmul.f32 %v3278_v41, %v1466_v36  ;;  %v1665_v46 = vmul.f32 0.8333333, %v3178_v29  ;;  %v1666_v62 = vmul.f32 0.8333333, %v1482_v44 }
 0x6c7   :  { %v1692_v34 = vadd.f32 %v1690_v33, %v1688_v45  ;;  %v3283_v38 = vadd.f32 %v1473_v15, %v1471_v35  ;;  %v1673_v0 = vmul.f32 0.8333333, %v2347_v60  ;;  %v1674_v2 = vmul.f32 0.8333333, %v2348_v6 }
 0x6c8   :  { %v3285_v59 = vadd.f32 %v1474_v47, %v1472_v57  ;;  %v1675_v24 = vmul.f32 0.8333333, %v3172_v7  ;;  %v1676_v63 = vmul.f32 0.8333333, %v3212_v28  ;;  %vm1313_vm8 = vcmp.ge.f32.partialorder %v3151_v51, -1.0 }
 0x6c9   :  { %v2542_v50 = vpack.i.bf16 %v1692_v34, %v1691_v21  ;;  %v1587_v20 = vmul.f32 %v1583_v48, %v3283_v38  ;;  %vm1314_vm9 = vcmp.ge.f32.partialorder %v3190_v32, -1.0  ;;  %vm1315_vm10 = vcmp.lt.f32.partialorder %v3151_v51, -0.6 }
 0x6ca   :  { %v1588_v29 = vmul.f32 %v1584_v26, %v3285_v59  ;;  %v1679_v44 = vmul.f32 %v1675_v24, %v1601_v19  ;;  %v1680_v15 = vmul.f32 %v1676_v63, %v1602_v43  ;;  %vm1316_vm11 = vcmp.lt.f32.partialorder %v3190_v32, -0.6  ;;  %vm1317_vm12 = vmand %vm1313_vm8, %vm1315_vm10 }
 0x6cb   :  { %2543 = vrot.lane.b32.xlu0 %v2542_v50, %s2655_s17  ;;  %v1591_v7 = vadd.f32 %v1589_v18, %v1587_v20  ;;  %vm1318_vm13 = vmand %vm1314_vm9, %vm1316_vm11  ;;  %v3297_v28 = vsel %vm1317_vm12, 1.0, %v2657_v49  ;;  %vm1323_vm14 = vcmp.ge.f32.partialorder %v3151_v51, -0.6  ;;  %vm1324_vm15 = vcmp.ge.f32.partialorder %v3190_v32, -0.6 }
 0x6cc   :  { %v1592_v9 = vadd.f32 %v1590_v16, %v1588_v29  ;;  %v3302_v1 = vsel %vm1318_vm13, 1.0, %v2657_v49  ;;  %vm1325_vm0 = vcmp.lt.f32.partialorder %v3151_v51, -0.2  ;;  %vm1326_vm2 = vcmp.lt.f32.partialorder %v3190_v32, -0.2 }
 0x6cd   :  { %v3306_v4 = vmul.f32 %v1665_v46, %v1591_v7  ;;  %v1677_v5 = vmul.f32 %v1673_v0, %v1591_v7  ;;  %vm1327_vm3 = vmand %vm1323_vm14, %vm1325_vm0  ;;  %v2343_v25 = vadd.f32 1.0, %v3151_v51  ;;  %v2344_v13 = vadd.f32 1.0, %v3190_v32 }
 0x6ce   :  { %v1678_v27 = vmul.f32 %v1674_v2, %v1592_v9  ;;  %v3310_v54 = vmul.f32 %v1666_v62, %v1592_v9  ;;  %vm1328_vm4 = vmand %vm1324_vm15, %vm1326_vm2  ;;  %v2323_v40 = vsel %vm1327_vm3, 1.0, %v2657_v49  ;;  %v3314_v52 = vsub.f32 -0.2, %v3151_v51 }
 0x6cf   :  { %v1681_v17 = vadd.f32 %v1679_v44, %v1677_v5  ;;  %v2324_v14 = vsel %vm1328_vm4, 1.0, %v2657_v49  ;;  %v1437_v58 = vmul.f32 2.5, %v2343_v25  ;;  %v1438_v30 = vmul.f32 2.5, %v2344_v13 }
 0x6d0   :  { %v1682_v61 = vadd.f32 %v1680_v15, %v1678_v27  ;;  %v3318_v11 = vsub.f32 -0.2, %v3190_v32  ;;  %v1441_v53 = vmul.f32 2.5, %v3314_v52  ;;  %v2345_v56 = vadd.f32 0.6, %v3151_v51 }
 0x6d1   :  { %v1443_v42 = vmul.f32 %v3297_v28, %v1437_v58  ;;  %v1444_v47 = vmul.f32 %v3302_v1, %v1438_v30  ;;  %v2346_v10 = vadd.f32 0.6, %v3190_v32  ;;  %v3326_v31 = vsub.f32 0.2, %v3151_v51 }
 0x6d2   :  { %v2537_v33 = vpack.i.bf16 %v1682_v61, %v1681_v17  ;;  %v1442_v22 = vmul.f32 2.5, %v3318_v11  ;;  %v1445_v60 = vmul.f32 %v2323_v40, %v1441_v53  ;;  %v1451_v19 = vmul.f32 2.5, %v2345_v56 }
 0x6d3   :  { %v1452_v6 = vmul.f32 2.5, %v2346_v10  ;;  %v3330_v37 = vsub.f32 0.2, %v3190_v32  ;;  %v1455_v8 = vmul.f32 2.5, %v3326_v31  ;;  %v1563_v43 = vmul.f32 1.25, %v2343_v25 }
 0x6d4   :  { %2538 = vrot.lane.b32.xlu2 %v2537_v33, %s2659_s10  ;;  %v1446_v39 = vmul.f32 %v2324_v14, %v1442_v22  ;;  %v3334_v48 = vadd.f32 %v1445_v60, %v1443_v42  ;;  %v1457_v12 = vmul.f32 %v2323_v40, %v1451_v19  ;;  %v1564_v36 = vmul.f32 1.25, %v2344_v13 }
 0x6d5   :  { %v1456_v26 = vmul.f32 2.5, %v3330_v37  ;;  %v1458_v45 = vmul.f32 %v2324_v14, %v1452_v6  ;;  %v1459_v35 = vmul.f32 %v3275_v3, %v1455_v8  ;;  %v1565_v18 = vmul.f32 1.25, %v3326_v31 }
 0x6d6   :  { %v3339_v16 = vadd.f32 %v1446_v39, %v1444_v47  ;;  %v1566_v21 = vmul.f32 1.25, %v3330_v37  ;;  %v1567_v57 = vmul.f32 %v1563_v43, %v3334_v48  ;;  %v1573_v46 = vmul.f32 1.25, %v2345_v56 }
 0x6d7   :  { %v1460_v62 = vmul.f32 %v3278_v41, %v1456_v26  ;;  %v1461_v34 = vadd.f32 %v1459_v35, %v1457_v12  ;;  %v1574_v0 = vmul.f32 1.25, %v2346_v10  ;;  %v1575_v2 = vmul.f32 1.25, %v3242_v23 }
 0x6d8   :  { %v1568_v24 = vmul.f32 %v1564_v36, %v3339_v16  ;;  %v1576_v63 = vmul.f32 1.25, %v3245_v55  ;;  %v1653_v3 = vmul.f32 0.8333333, %v2343_v25  ;;  %v1654_v50 = vmul.f32 0.8333333, %v2344_v13 }
 0x6d9   :  { %v1462_v20 = vadd.f32 %v1460_v62, %v1458_v45  ;;  %v1569_v29 = vmul.f32 %v1565_v18, %v1461_v34  ;;  %v1577_v44 = vmul.f32 %v1573_v46, %v1461_v34  ;;  %v1579_v15 = vmul.f32 %v1575_v2, %v3283_v38 }
 0x6da   :  { %v1580_v7 = vmul.f32 %v1576_v63, %v3285_v59  ;;  %v1655_v9 = vmul.f32 0.8333333, %v3242_v23  ;;  %v1656_v41 = vmul.f32 0.8333333, %v3245_v55  ;;  %v1663_v5 = vmul.f32 0.8333333, %v2345_v56 }
 0x6db   :  { %v1570_v27 = vmul.f32 %v1566_v21, %v1462_v20  ;;  %v3351_v40 = vadd.f32 %v1569_v29, %v1567_v57  ;;  %v1578_v17 = vmul.f32 %v1574_v0, %v1462_v20  ;;  %v1581_v14 = vadd.f32 %v1579_v15, %v1577_v44  ;;  %v2504_v23 = vld [vmem:[#allocation2 + $0x1e8] sm:$0xff] }
 0x6dc   :  { %v1664_v58 = vmul.f32 0.8333333, %v2346_v10  ;;  %vm1303_vm5 = vcmp.ge.f32.partialorder %v3151_v51, -1.4  ;;  %vm1304_vm6 = vcmp.ge.f32.partialorder %v3190_v32, -1.4  ;;  %1990 = vmatpush.bf16.msra.mxu3 %v2504_v23 }
 0x6dd   :  { %v3355_v25 = vadd.f32 %v1570_v27, %v1568_v24  ;;  %v1582_v38 = vadd.f32 %v1580_v7, %v1578_v17  ;;  %v1657_v59 = vmul.f32 %v1653_v3, %v3351_v40  ;;  %v1659_v13 = vmul.f32 %v1655_v9, %v1581_v14 }
 0x6de   :  { %v3358_v30 = vmul.f32 %v1663_v5, %v1581_v14  ;;  %vm1305_vm7 = vcmp.lt.f32.partialorder %v3151_v51, -1.0  ;;  %vm1306_vm8 = vcmp.lt.f32.partialorder %v3190_v32, -1.0  ;;  %v1411_v55 = vsub.f32 -1.0, %v3151_v51 }
 0x6df   :  { %v1658_v61 = vmul.f32 %v1654_v50, %v3355_v25  ;;  %v1660_v53 = vmul.f32 %v1656_v41, %v1582_v38  ;;  %v3364_v56 = vmul.f32 %v1664_v58, %v1582_v38  ;;  %vm1307_vm9 = vmand %vm1303_vm5, %vm1305_vm7  ;;  %v1661_v42 = vadd.f32 %v1659_v13, %v1657_v59 }
 0x6e0   :  { %vm1308_vm10 = vmand %vm1304_vm6, %vm1306_vm8  ;;  %v2319_v47 = vsel %vm1307_vm9, 1.0, %v2657_v49  ;;  %v2341_v10 = vadd.f32 1.4, %v3151_v51  ;;  %v1412_v22 = vsub.f32 -1.0, %v3190_v32  ;;  %v2342_v60 = vadd.f32 1.4, %v3190_v32 }
 0x6e1   :  { %v1662_v33 = vadd.f32 %v1660_v53, %v1658_v61  ;;  %v3373_v19 = vsub.f32 -0.6, %v3151_v51  ;;  %v2320_v6 = vsel %vm1308_vm10, 1.0, %v2657_v49  ;;  %v1413_v8 = vmul.f32 2.5, %v1411_v55 }
 0x6e2   :  { %v1423_v43 = vmul.f32 2.5, %v2341_v10  ;;  %v3379_v39 = vsub.f32 -0.6, %v3190_v32  ;;  %v1424_v36 = vmul.f32 2.5, %v2342_v60  ;;  %v1414_v18 = vmul.f32 2.5, %v1412_v22 }
 0x6e3   :  { %v2562_v12 = vpack.i.bf16 %v1662_v33, %v1661_v42  ;;  %v1427_v26 = vmul.f32 2.5, %v3373_v19  ;;  %v1555_v46 = vmul.f32 1.25, %v3314_v52  ;;  %v1417_v62 = vmul.f32 %v2319_v47, %v1413_v8 }
 0x6e4   :  { %v1428_v45 = vmul.f32 2.5, %v3379_v39  ;;  %v1429_v35 = vmul.f32 %v2319_v47, %v1423_v43  ;;  %v1430_v21 = vmul.f32 %v2320_v6, %v1424_v36  ;;  %v1553_v0 = vmul.f32 1.25, %v2341_v10 }
 0x6e5   :  { %2563 = vrot.lane.b32.xlu1 %v2562_v12, %s2658_s0  ;;  %v1431_v57 = vmul.f32 %v3297_v28, %v1427_v26  ;;  %v1556_v2 = vmul.f32 1.25, %v3318_v11  ;;  %v1554_v63 = vmul.f32 1.25, %v2342_v60  ;;  %v1559_v3 = vmul.f32 %v1555_v46, %v3334_v48 }
 0x6e6   :  { %v1432_v34 = vmul.f32 %v3302_v1, %v1428_v45  ;;  %v1643_v50 = vmul.f32 0.8333333, %v2341_v10  ;;  %vm1293_vm11 = vcmp.ge.f32.partialorder %v3151_v51, -1.8  ;;  %vm1294_vm12 = vcmp.ge.f32.partialorder %v3190_v32, -1.8 }
 0x6e7   :  { %v1433_v24 = vadd.f32 %v1431_v57, %v1429_v35  ;;  %v1560_v29 = vmul.f32 %v1556_v2, %v3339_v16  ;;  %v1645_v44 = vmul.f32 0.8333333, %v3326_v31  ;;  %vm1295_vm13 = vcmp.lt.f32.partialorder %v3151_v51, -1.4  ;;  %v2503_v2 = vld [vmem:[#allocation2 + $0x1e0] sm:$0xff] }
 0x6e8   :  { %v1434_v20 = vadd.f32 %v1432_v34, %v1430_v21  ;;  %vm1296_vm14 = vcmp.lt.f32.partialorder %v3190_v32, -1.4  ;;  %v1646_v15 = vmul.f32 0.8333333, %v3330_v37  ;;  %vm1297_vm15 = vmand %vm1293_vm11, %vm1295_vm13  ;;  %v1397_v48 = vsub.f32 -1.4, %v3151_v51  ;;  %1969 = vmatpush.bf16.msra.mxu2 %v2503_v2 }
 0x6e9   :  { %v1557_v28 = vmul.f32 %v1553_v0, %v1433_v24  ;;  %v2339_v7 = vadd.f32 1.8, %v3151_v51  ;;  %v1644_v9 = vmul.f32 0.8333333, %v2342_v60  ;;  %v1649_v41 = vmul.f32 %v1645_v44, %v3351_v40  ;;  %vm1298_vm0 = vmand %vm1294_vm12, %vm1296_vm14  ;;  %v2493_v0 = vld [vmem:[#allocation2 + $0x190] sm:$0xff] }
 0x6ea   :  { %v1558_v1 = vmul.f32 %v1554_v63, %v1434_v20  ;;  %v2340_v5 = vadd.f32 1.8, %v3190_v32  ;;  %v1650_v27 = vmul.f32 %v1646_v15, %v3355_v25  ;;  %v2317_v17 = vsel %vm1297_vm15, 1.0, %v2657_v49  ;;  %1957 = vmatpush.bf16.msrb.mxu0 %v2493_v0 }
 0x6eb   :  { %v1561_v16 = vadd.f32 %v1559_v3, %v1557_v28  ;;  %v3405_v14 = vsel %vm1298_vm0, 1.0, %v2657_v49  ;;  %v1418_v58 = vmul.f32 %v2320_v6, %v1414_v18  ;;  %v1409_v38 = vmul.f32 2.5, %v2339_v7  ;;  %v2492_v3 = vld [vmem:[#allocation2 + $0x188] sm:$0xff] }
 0x6ec   :  { %v1562_v31 = vadd.f32 %v1560_v29, %v1558_v1  ;;  %v1410_v59 = vmul.f32 2.5, %v2340_v5  ;;  %v1399_v23 = vmul.f32 2.5, %v1397_v48  ;;  %v1545_v61 = vmul.f32 1.25, %v3373_v19  ;;  %v2491_v48 = vld [vmem:[#allocation2 + $0x180] sm:$0xff] }
 0x6ed   :  { %v1647_v37 = vmul.f32 %v1643_v50, %v1561_v16  ;;  %v1546_v40 = vmul.f32 1.25, %v3379_v39  ;;  %v1415_v53 = vmul.f32 %v2317_v17, %v1409_v38  ;;  %v1543_v47 = vmul.f32 1.25, %v2339_v7 }
 0x6ee   :  { %v1648_v13 = vmul.f32 %v1644_v9, %v1562_v31  ;;  %v1416_v42 = vmul.f32 %v3405_v14, %v1410_v59  ;;  %v1544_v25 = vmul.f32 1.25, %v2340_v5  ;;  %v1549_v60 = vmul.f32 %v1545_v61, %v1433_v24  ;;  %1958 = vmatpush.bf16.msrb.mxu0 %v2492_v3  ;;  %v2490_v59 = vld [vmem:[#allocation2 + $0x178] sm:$0xff] }
 0x6ef   :  { %v1651_v10 = vadd.f32 %v1649_v41, %v1647_v37  ;;  %v1550_v8 = vmul.f32 %v1546_v40, %v1434_v20  ;;  %v1419_v43 = vadd.f32 %v1417_v62, %v1415_v53  ;;  %v1633_v6 = vmul.f32 0.8333333, %v2339_v7 }
 0x6f0   :  { %v1652_v33 = vadd.f32 %v1650_v27, %v1648_v13  ;;  %v3410_v12 = vadd.f32 %v1418_v58, %v1416_v42  ;;  %v1635_v36 = vmul.f32 0.8333333, %v3314_v52  ;;  %v1636_v45 = vmul.f32 0.8333333, %v3318_v11 }
 0x6f1   :  { %v2357_v35 = vmul.f32 -1.442695, %v3151_v51  ;;  %v2358_v18 = vmul.f32 -1.442695, %v3190_v32  ;;  %v1547_v21 = vmul.f32 %v1543_v47, %v1419_v43  ;;  %v1634_v46 = vmul.f32 0.8333333, %v2340_v5 }
 0x6f2   :  { %v2557_v26 = vpack.i.bf16 %v1652_v33, %v1651_v10  ;;  %v1548_v57 = vmul.f32 %v1544_v25, %v3410_v12  ;;  %v1639_v34 = vmul.f32 %v1635_v36, %v1561_v16  ;;  %v1640_v62 = vmul.f32 %v1636_v45, %v1562_v31  ;;  %1959 = vmatpush.bf16.msrb.mxu0 %v2491_v48 }
 0x6f3   :  { %2612 = vpow2.f32 %v2357_v35  ;;  %v3420_v52 = vadd.f32 %v3306_v4, %v3358_v30  ;;  %v3424_v11 = vadd.f32 %v3310_v54, %v3364_v56  ;;  %v1551_v24 = vadd.f32 %v1549_v60, %v1547_v21 }
 0x6f4   :  { %2558 = vrot.lane.b32.xlu0 %v2557_v26, %s2655_s17  ;;  %v1552_v63 = vadd.f32 %v1550_v8, %v1548_v57  ;;  %2614 = vpow2.f32 %v2358_v18  ;;  %vm1283_vm2 = vcmp.ge.f32.partialorder %v3151_v51, -2.2  ;;  %v1398_v50 = vsub.f32 -1.4, %v3190_v32 }
 0x6f5   :  { %vm1285_vm3 = vcmp.lt.f32.partialorder %v3151_v51, -1.8  ;;  %v2337_v20 = vadd.f32 2.2, %v3151_v51  ;;  %v1637_v4 = vmul.f32 %v1633_v6, %v1551_v24  ;;  %v2338_v54 = vadd.f32 2.2, %v3190_v32 }
 0x6f6   :  { %v1638_v30 = vmul.f32 %v1634_v46, %v1552_v63  ;;  %vm1287_vm4 = vmand %vm1283_vm2, %vm1285_vm3  ;;  %v1535_v56 = vmul.f32 1.25, %v1411_v55  ;;  %v1403_v29 = vmul.f32 %v2317_v17, %v1399_v23  ;;  %v1400_v9 = vmul.f32 2.5, %v1398_v50  ;;  %1960 = vmatpush.bf16.msrb.mxu0 %v2490_v59 }
 0x6f7   :  { %v2315_v28 = vsel %vm1287_vm4, 1.0, %v2657_v49  ;;  %v1395_v44 = vmul.f32 2.5, %v2337_v20  ;;  %v1641_v1 = vadd.f32 %v1639_v34, %v1637_v4  ;;  %v1625_v5 = vmul.f32 0.8333333, %v3373_v19 }
 0x6f8   :  { %v1642_v15 = vadd.f32 %v1640_v62, %v1638_v30  ;;  %v1539_v7 = vmul.f32 %v1535_v56, %v1419_v43  ;;  %v1396_v58 = vmul.f32 2.5, %v2338_v54  ;;  %vm1284_vm5 = vcmp.ge.f32.partialorder %v3190_v32, -2.2 }
 0x6f9   :  { %v2613_v16 = vpop.eup %2612  ;;  %v1401_v41 = vmul.f32 %v2315_v28, %v1395_v44  ;;  %v1629_v38 = vmul.f32 %v1625_v5, %v1551_v24  ;;  %vm1286_vm6 = vcmp.lt.f32.partialorder %v3190_v32, -1.8  ;;  %v1533_v13 = vmul.f32 1.25, %v2337_v20  ;;  %v2489_v44 = vld [vmem:[#allocation2 + $0x170] sm:$0xff]  ;;  %v2488_v5 = vld [vmem:[#allocation2 + $0x168] sm:$0xff] }
 0x6fa   :  { %v2615_v31 = vpop.eup %2614  ;;  %v2552_v27 = vpack.i.bf16 %v1642_v15, %v1641_v1  ;;  %v1709_v37 = vadd.f32 1.0, %v2613_v16  ;;  %vm1288_vm7 = vmand %vm1284_vm5, %vm1286_vm6  ;;  %v1404_v19 = vmul.f32 %v3405_v14, %v1400_v9  ;;  %v1536_v23 = vmul.f32 1.25, %v1412_v22  ;;  %v2502_v1 = vld [vmem:[#allocation2 + $0x1d8] sm:$0xff]  ;;  %1961 = vmatpush.bf16.msrb.mxu0 %v2489_v44  ;;  %v2501_v15 = vld [vmem:[#allocation2 + $0x1d0] sm:$0xff] }
 0x6fb   :  { %v1710_v55 = vadd.f32 1.0, %v2615_v31  ;;  %v1405_v17 = vadd.f32 %v1403_v29, %v1401_v41  ;;  %v1626_v40 = vmul.f32 0.8333333, %v3379_v39  ;;  %v2316_v53 = vsel %vm1288_vm7, 1.0, %v2657_v49  ;;  %1970 = vmatpush.bf16.msra.mxu2 %v2502_v1 }
 0x6fc   :  { %2553 = vrot.lane.b32.xlu2 %v2552_v27, %s2659_s10  ;;  %2616 = vrcp.f32 %v1709_v37  ;;  %v1402_v42 = vmul.f32 %v2316_v53, %v1396_v58  ;;  %v1540_v47 = vmul.f32 %v1536_v23, %v3410_v12  ;;  %v1623_v10 = vmul.f32 0.8333333, %v2337_v20  ;;  %v2496_v53 = vld [vmem:[#allocation2 + $0x1a8] sm:$0xff] }
 0x6fd   :  { %2618 = vrcp.f32 %v1710_v55  ;;  %v1537_v61 = vmul.f32 %v1533_v13, %v1405_v17  ;;  %v1630_v33 = vmul.f32 %v1626_v40, %v1552_v63  ;;  %v1534_v60 = vmul.f32 1.25, %v2338_v54  ;;  %v2497_v40 = vld [vmem:[#allocation2 + $0x1b0] sm:$0xff] }
 0x6fe   :  { %v1406_v8 = vadd.f32 %v1404_v19, %v1402_v42  ;;  %v1624_v35 = vmul.f32 0.8333333, %v2338_v54  ;;  %v1720_v18 = vand.u32 2147483647, %v1709_v37  ;;  %v1722_v21 = vand.u32 2147483648, %v1709_v37  ;;  %1962 = vmatpush.bf16.msrb.mxu0 %v2488_v5 }
 0x6ff   :  { %v1541_v25 = vadd.f32 %v1539_v7, %v1537_v61  ;;  %v1737_v46 = vand.u32 2147483648, %v1710_v55  ;;  %v1735_v62 = vand.u32 2147483647, %v1710_v55  ;;  %vm1716_vm10 = vweird.f32 %v1709_v37  ;;  %1971 = vmatpush.bf16.msra.mxu2 %v2501_v15  ;;  %v2500_v7 = vld [vmem:[#allocation2 + $0x1c8] sm:$0xff] }
 0x700   :  { %v1538_v26 = vmul.f32 %v1534_v60, %v1406_v8  ;;  %v1723_v63 = vor.u32 1.1754944e-38, %v1722_v21  ;;  %vm1731_vm12 = vweird.f32 %v1710_v55  ;;  %vm1721_vm13 = vcmp.eq.f32.partialorder %v1720_v18, 8.507059e+37 }
 0x701   :  { %v1627_v14 = vmul.f32 %v1623_v10, %v1541_v25  ;;  %v1738_v20 = vor.u32 1.1754944e-38, %v1737_v46  ;;  %vm1736_vm15 = vcmp.eq.f32.partialorder %v1735_v62, 8.507059e+37  ;;  %vm1791_vm0 = vcmask 261120  }
 0x702   :  { %v2617_v43 = vpop.eup %2616  ;;  %v1542_v49 = vadd.f32 %v1540_v47, %v1538_v26  ;;  %vm1796_vm2 = vcmask 785408  }
 0x703   :  { %v2619_v6 = vpop.eup %2618  ;;  %v1712_v36 = vmul.f32 %v2617_v43, %v1709_v37  ;;  %v3444_v45 = vadd.f32 %v1629_v38, %v1627_v14  ;;  %vm1717_vm8 = vweird.f32 %v2617_v43  ;;  %1972 = vmatpush.bf16.msra.mxu2 %v2500_v7  ;;  %v2498_v38 = vld [vmem:[#allocation2 + $0x1b8] sm:$0xff] }
 0x704   :  { %v1727_v22 = vmul.f32 %v2619_v6, %v1710_v55  ;;  %v1628_v34 = vmul.f32 %v1624_v35, %v1542_v49  ;;  %vm1732_vm9 = vweird.f32 %v2619_v6  ;;  %vm1718_vm11 = vmor %vm1716_vm10, %vm1717_vm8 }
 0x705   :  { %v1713_v39 = vsub.f32 1.0, %v1712_v36  ;;  %vm1733_vm14 = vmor %vm1731_vm12, %vm1732_vm9 }
 0x706   :  { %v1728_v12 = vsub.f32 1.0, %v1727_v22  ;;  %v3446_v24 = vadd.f32 %v1630_v33, %v1628_v34 }
 0x707   :  { %v1714_v57 = vmul.f32 %v2617_v43, %v1713_v39 }
 0x708   :  { %v1729_v0 = vmul.f32 %v2619_v6, %v1728_v12 }
 0x709   :  { %v1715_v2 = vadd.f32 %v2617_v43, %v1714_v57 }
 0x70a   :  { %v1730_v3 = vadd.f32 %v2619_v6, %v1729_v0 }
 0x70b   :  { %v1719_v50 = vsel %vm1718_vm11, %v2617_v43, %v1715_v2 }
 0x70c   :  { %v1724_v4 = vsel %vm1721_vm13, %v1723_v63, %v1719_v50  ;;  %v1734_v30 = vsel %vm1733_vm14, %v2619_v6, %v1730_v3 }
 0x70d   :  { %v1739_v54 = vsel %vm1736_vm15, %v1738_v20, %v1734_v30  ;;  %v1741_v56 = vmul.f32 %v1724_v4, %v3151_v51  ;;  %v2499_v51 = vld [vmem:[#allocation2 + $0x1c0] sm:$0xff] }
 0x70e   :  { %v1742_v29 = vmul.f32 %v1739_v54, %v3190_v32  ;;  %1973 = vmatpush.bf16.msra.mxu2 %v2499_v51 }
 0x710   :  { %v1807_v28 = vpack.c.bf16 %v1742_v29, %v1741_v56 }
 0x712   :  { %2431 = vmatmul.msk.bf16.vlgmr.msra.gmra.mxu3 %vm1791_vm0, %v1807_v28  ;;  %1974 = vmatpush.bf16.msra.mxu2 %v2498_v38 }
 0x716   :  { %1975 = vmatpush.bf16.msra.mxu2 %v2497_v40 }
 0x71a   :  { %1976 = vmatpush.bf16.msra.mxu2 %v2496_v53 }
 0x72e   :  { %v2539_v48 = vpop.permute.xlu2 %2538 }
 0x72f   :  { %v2541_v9 = vunpack.i.h.bf16 %v2539_v48  ;;  %v2540_v41 = vunpack.i.l.bf16 %v2539_v48 }
 0x730   :  { %v2549_v16 = vpop.permute.xlu1 %2548 }
 0x731   :  { %v2551_v32 = vunpack.i.h.bf16 %v2549_v16  ;;  %v2550_v31 = vunpack.i.l.bf16 %v2549_v16  ;;  %v1799_v55 = vsel %vm1791_vm0, %v3420_v52, %v2540_v41  ;;  %v1800_v17 = vsel %vm1791_vm0, %v3424_v11, %v2541_v9 }
 0x73d   :  { %v2544_v27 = vpop.permute.xlu0 %2543 }
 0x73e   :  { %v2546_v37 = vunpack.i.h.bf16 %v2544_v27  ;;  %v2545_v58 = vunpack.i.l.bf16 %v2544_v27 }
 0x740   :  { %v1801_v59 = vsel %vm206_vm1, %v1799_v55, %v2545_v58  ;;  %v1802_v13 = vsel %vm206_vm1, %v1800_v17, %v2546_v37 }
 0x741   :  { %v1803_v19 = vsel %vm1796_vm2, %v1801_v59, %v2550_v31  ;;  %v1804_v23 = vsel %vm1796_vm2, %v1802_v13, %v2551_v32 }
 0x742   :  { %v1806_v61 = vpack.c.bf16 %v1804_v23, %v1803_v19 }
 0x744   :  { %1977 = vmatmul.bf16.vlgmr.msra.gmra.mxu2 %v1806_v61 }
 0x756   :  { %v2554_v52 = vpop.permute.xlu2 %2553 }
 0x757   :  { %v2564_v42 = vpop.permute.xlu1 %2563  ;;  %v2556_v11 = vunpack.i.h.bf16 %v2554_v52  ;;  %v2555_v47 = vunpack.i.l.bf16 %v2554_v52 }
 0x758   :  { %v2566_v25 = vunpack.i.h.bf16 %v2564_v42  ;;  %v2565_v10 = vunpack.i.l.bf16 %v2564_v42 }
 0x759   :  { %v1792_v43 = vsel %vm1791_vm0, %v3444_v45, %v2555_v47  ;;  %v1793_v14 = vsel %vm1791_vm0, %v3446_v24, %v2556_v11 }
 0x766   :  { %v2559_v33 = vpop.permute.xlu0 %2558 }
 0x767   :  { %v2561_v60 = vunpack.i.h.bf16 %v2559_v33  ;;  %v2560_v8 = vunpack.i.l.bf16 %v2559_v33 }
 0x769   :  { %v1794_v6 = vsel %vm206_vm1, %v1792_v43, %v2560_v8  ;;  %v1795_v36 = vsel %vm206_vm1, %v1793_v14, %v2561_v60 }
 0x76a   :  { %v1797_v26 = vsel %vm1796_vm2, %v1794_v6, %v2565_v10  ;;  %v1798_v22 = vsel %vm1796_vm2, %v1795_v36, %v2566_v25 }
 0x76b   :  { %v1805_v39 = vpack.c.bf16 %v1798_v22, %v1797_v26 }
 0x76d   :  { %1963 = vmatmul.bf16.vlgmr.msrb.gmra.mxu0 %v1805_v39 }
 0x795   :  { %v1992_v49 = vpop.f32.mrf.mxu3 }
 0x79d   :  { %v1994_v0 = vpop.f32.mrf.mxu3 }
 0x7c7   :  { %v1978_v35 = vpop.f32.mrf.mxu2 }
 0x7cf   :  { %v1980_v45 = vpop.f32.mrf.mxu2 }
 0x7ea   :  { %v1964_v18 = vpop.f32.mrf.mxu0 }
 0x7eb   :  { %v1979_v21 = vadd.f32 %v1978_v35, %v1964_v18 }
 0x7ed   :  { %v1993_v12 = vadd.f32 %v1992_v49, %v1979_v21 }
 0x7ef   :  { %v2432_v57 = vmul.f32 -1.442695, %v1993_v12 }
 0x7f1   :  { %2620 = vpow2.f32 %v2432_v57 }
 0x7f2   :  { %v1966_v46 = vpop.f32.mrf.mxu0 }
 0x7f3   :  { %v1981_v34 = vadd.f32 %v1980_v45, %v1966_v46 }
 0x7f5   :  { %v1995_v62 = vadd.f32 %v1994_v0, %v1981_v34 }
 0x7f7   :  { %v2621_v2 = vpop.eup %2620  ;;  %v2433_v24 = vmul.f32 -1.442695, %v1995_v62 }
 0x7f8   :  { %v2003_v63 = vadd.f32 1.0, %v2621_v2 }
 0x7f9   :  { %2622 = vpow2.f32 %v2433_v24 }
 0x7fa   :  { %2624 = vrcp.f32 %v2003_v63  ;;  %v2016_v54 = vand.u32 2147483648, %v2003_v63  ;;  %v2014_v29 = vand.u32 2147483647, %v2003_v63  ;;  %vm2010_vm3 = vweird.f32 %v2003_v63 }
 0x7fc   :  { %v2017_v1 = vor.u32 1.1754944e-38, %v2016_v54  ;;  %vm2015_vm5 = vcmp.eq.f32.partialorder %v2014_v29, 8.507059e+37 }
 0x7ff   :  { %v2623_v3 = vpop.eup %2622 }
 0x800   :  { %v2625_v50 = vpop.eup %2624  ;;  %v2004_v20 = vadd.f32 1.0, %v2623_v3 }
 0x801   :  { %v2006_v4 = vmul.f32 %v2625_v50, %v2003_v63  ;;  %vm2011_vm1 = vweird.f32 %v2625_v50 }
 0x802   :  { %2626 = vrcp.f32 %v2004_v20  ;;  %vm2012_vm4 = vmor %vm2010_vm3, %vm2011_vm1  ;;  %v2031_v9 = vand.u32 2147483648, %v2004_v20  ;;  %v2029_v5 = vand.u32 2147483647, %v2004_v20  ;;  %vm2025_vm7 = vweird.f32 %v2004_v20 }
 0x803   :  { %v2007_v30 = vsub.f32 1.0, %v2006_v4 }
 0x804   :  { %v2032_v32 = vor.u32 1.1754944e-38, %v2031_v9  ;;  %vm2030_vm9 = vcmp.eq.f32.partialorder %v2029_v5, 8.507059e+37 }
 0x805   :  { %v2008_v56 = vmul.f32 %v2625_v50, %v2007_v30 }
 0x807   :  { %v2009_v28 = vadd.f32 %v2625_v50, %v2008_v56 }
 0x808   :  { %v2627_v44 = vpop.eup %2626 }
 0x809   :  { %v2013_v15 = vsel %vm2012_vm4, %v2625_v50, %v2009_v28  ;;  %v2021_v48 = vmul.f32 %v2627_v44, %v2004_v20  ;;  %vm2026_vm6 = vweird.f32 %v2627_v44 }
 0x80a   :  { %v2018_v7 = vsel %vm2015_vm5, %v2017_v1, %v2013_v15  ;;  %vm2027_vm8 = vmor %vm2025_vm7, %vm2026_vm6 }
 0x80b   :  { %2035 = vst [vmem:[%s3476_s3] sm:$0xff] %v2018_v7  ;;  %v2022_v16 = vsub.f32 1.0, %v2021_v48 }
 0x80d   :  { %v2023_v41 = vmul.f32 %v2627_v44, %v2022_v16 }
 0x80f   :  { %v2024_v51 = vadd.f32 %v2627_v44, %v2023_v41 }
 0x811   :  { %v2028_v31 = vsel %vm2027_vm8, %v2627_v44, %v2024_v51 }
 0x812   :  { %v2033_v27 = vsel %vm2030_vm9, %v2032_v32, %v2028_v31 }
 0x813   :  { %2036 = vst [vmem:[%s3476_s3 + $0x8] sm:$0xff] %v2033_v27 }
 0x814   :  { %2041 = vsyncpa [#allocation3], 1 }

</bundles_post_ra>
